<compile_context>
chip_gen: v5e
topology: v5e:2x2
jax: 0.10.0
libtpu: 0.0.40
codegen_flags: <defaults>
</compile_context>

<pallas_src>
import jax
import jax.numpy as jnp
from jax import lax
from jax.experimental import pallas as pl
from jax.experimental.pallas import tpu as pltpu

NUM_TAGS = 3
NT = 128          # tag (lane) dimension padded to one lane-width
NR = 8            # prev-tag (reduce) axis padded only to one sublane-width
NEG = -1e9


# ----------------------------------------------------------------------------- kernel

def sentiment_kernel(mask_ref,                                   # SMEM (B, S) int32
                     x_ref, g_ref, b_ref,                        # (1,S,C), (1,C), (1,C)
                     cwp_ref, cwc_ref, cwn_ref, conv_b_ref,      # (C,H) bf16 x3, (1,H) f32
                     wih_ref, bih_ref,                           # (H,8H) bf16, (1,8H) f32
                     whf_ref, whb_ref,                           # (H,4H) bf16 x2
                     wf_ref, wb_ref, fb_ref,                     # (H,NT) bf16 x2, (1,NT)
                     start_ref, end_ref, trans_ref,              # (1,NT), (1,NT), (NR,NT)
                     out_ref,                                    # (1,1,S_OUT) int32
                     gx_ref, hf_ref, hb_ref, emis_ref, hist_ref):
    S, C = x_ref.shape[1], x_ref.shape[2]
    H = whf_ref.shape[0]
    G = 4 * H
    NPREV = trans_ref.shape[0]
    NTAG = trans_ref.shape[1]
    S_OUT = out_ref.shape[2]
    b = pl.program_id(0)
    unroll = S <= 32

    # ---- LayerNorm (RoBERTa final hidden-state stand-in), stats in f32 ----
    x = x_ref[0]                                                  # (S, C)
    mu = jnp.mean(x, axis=-1, keepdims=True)
    xc = x - mu
    var = jnp.mean(xc * xc, axis=-1, keepdims=True)
    y = xc * lax.rsqrt(var + 1e-5) * g_ref[...] + b_ref[...]      # (S, C)
    yb = y.astype(jnp.bfloat16)

    # ---- Conv1d(k=3, pad=1): three shifted matmuls accumulated in f32 (no im2col) ----
    tp = jnp.dot(yb, cwp_ref[...], preferred_element_type=jnp.float32)   # tap * y[t-1]
    tc = jnp.dot(yb, cwc_ref[...], preferred_element_type=jnp.float32)   # tap * y[t]
    tn = jnp.dot(yb, cwn_ref[...], preferred_element_type=jnp.float32)   # tap * y[t+1]
    row = lax.broadcasted_iota(jnp.int32, (S, H), 0)
    conv = (tc + conv_b_ref[...]
            + jnp.where(row == 0, 0.0, pltpu.roll(tp, shift=1, axis=0))
            + jnp.where(row == S - 1, 0.0, pltpu.roll(tn, shift=S - 1, axis=0)))

    # ---- fused BiLSTM input projections (fwd|bwd), single N=8H matmul, stays in VMEM ----
    gx_ref[...] = (jnp.dot(conv.astype(jnp.bfloat16), wih_ref[...],
                           preferred_element_type=jnp.float32) + bih_ref[...])

    # ---- interleaved fwd/bwd LSTM recurrence (PyTorch gate order i,f,g,o) ----
    whf = whf_ref[...]
    whb = whb_ref[...]

    def cell(gvec, h, c, whh):
        g = gvec + jnp.dot(h.astype(jnp.bfloat16), whh, preferred_element_type=jnp.float32)
        i_g = jax.nn.sigmoid(g[:, 0:H])
        f_g = jax.nn.sigmoid(g[:, H:2 * H])
        g_g = jnp.tanh(g[:, 2 * H:3 * H])
        o_g = jax.nn.sigmoid(g[:, 3 * H:4 * H])
        c = f_g * c + i_g * g_g
        h = o_g * jnp.tanh(c)
        return h, c

    def rec(k, carry):
        hf, cf, hb, cb = carry
        tb = S - 1 - k
        hf, cf = cell(gx_ref[pl.ds(k, 1), 0:G], hf, cf, whf)
        hb, cb = cell(gx_ref[pl.ds(tb, 1), G:2 * G], hb, cb, whb)
        hf_ref[pl.ds(k, 1), :] = hf
        hb_ref[pl.ds(tb, 1), :] = hb
        return hf, cf, hb, cb

    z = jnp.zeros((1, H), jnp.float32)
    lax.fori_loop(0, S, rec, (z, z, z, z), unroll=unroll)

    # ---- classifier head hoisted out of the time loop (lane-dense 128-wide emissions) ----
    emis_ref[...] = (
        jnp.dot(hf_ref[...].astype(jnp.bfloat16), wf_ref[...],
                preferred_element_type=jnp.float32)
        + jnp.dot(hb_ref[...].astype(jnp.bfloat16), wb_ref[...],
                  preferred_element_type=jnp.float32)
        + fb_ref[...])

    # ---- CRF Viterbi forward: prev-tag reduce axis = 8 sublanes, iotas hoisted ----
    trans = trans_ref[...]                                        # (8, NT)
    i_idx = lax.broadcasted_iota(jnp.int32, (1, NPREV, NTAG), 1)
    lane = lax.broadcasted_iota(jnp.int32, (1, NTAG), 1)

    score0 = start_ref[...] + emis_ref[pl.ds(0, 1), :]            # (1, NT)

    def vit(t, score):
        cand = score[:, 0:NPREV, None] + trans[None, :, :]        # (1, 8, NT)
        vmax = jnp.max(cand, axis=1)                              # (1, NT)
        bp = jnp.min(jnp.where(cand == vmax[:, None, :], i_idx, NPREV),
                     axis=1).astype(jnp.int32)
        hist_ref[pl.ds(t, 1), :] = bp
        m = mask_ref[b, t] > 0                                    # SMEM scalar compare
        return jnp.where(m, vmax + emis_ref[pl.ds(t, 1), :], score)

    score = lax.fori_loop(1, S, vit, score0, unroll=unroll)

    # ---- best final tag ----
    final = score + end_ref[...]
    fmax = jnp.max(final, axis=-1, keepdims=True)
    best0 = jnp.min(jnp.where(final == fmax, lane, NTAG),
                    axis=-1, keepdims=True).astype(jnp.int32)     # (1, 1)

    # ---- backtrack: tags staged in registers, single lane-dense store at the end ----
    col = lax.broadcasted_iota(jnp.int32, (1, S_OUT), 1)

    def back(k, carry):
        best, tags = carry
        t = S - 1 - k
        m = mask_ref[b, t] > 0
        tags = jnp.where(col == t, jnp.where(m, best, 0), tags)
        sel = jnp.sum(jnp.where(lane == best, hist_ref[pl.ds(t, 1), :], 0),
                      axis=-1, keepdims=True).astype(jnp.int32)
        best = jnp.where(m, sel, best)
        return best, tags

    best, tags = lax.fori_loop(0, S - 1, back,
                               (best0, jnp.zeros((1, S_OUT), jnp.int32)),
                               unroll=unroll)
    tags = jnp.where(col == 0, jnp.where(mask_ref[b, 0] > 0, best, 0), tags)
    out_ref[...] = tags.reshape(1, 1, S_OUT)


# ----------------------------------------------------------------------------- wrapper

def crf_decode_forward(emb, mask_i32, p):
    B, S, C = emb.shape
    H = p["whh_f"].shape[0]
    G = 4 * H
    S_OUT = ((S + 127) // 128) * 128

    wmap = lambda b, m: (0, 0)   # weights: same block every grid step

    in_specs = [
        pl.BlockSpec((1, S, C), lambda b, m: (b, 0, 0)),
        pl.BlockSpec((1, C), wmap), pl.BlockSpec((1, C), wmap),
        pl.BlockSpec((C, H), wmap), pl.BlockSpec((C, H), wmap), pl.BlockSpec((C, H), wmap),
        pl.BlockSpec((1, H), wmap),
        pl.BlockSpec((H, 2 * G), wmap), pl.BlockSpec((1, 2 * G), wmap),
        pl.BlockSpec((H, G), wmap), pl.BlockSpec((H, G), wmap),
        pl.BlockSpec((H, NT), wmap), pl.BlockSpec((H, NT), wmap), pl.BlockSpec((1, NT), wmap),
        pl.BlockSpec((1, NT), wmap), pl.BlockSpec((1, NT), wmap), pl.BlockSpec((NR, NT), wmap),
    ]
    scratch = [
        pltpu.VMEM((S, 2 * G), jnp.float32),   # precomputed gate inputs (fwd|bwd)
        pltpu.VMEM((S, H), jnp.float32),       # fwd hidden states
        pltpu.VMEM((S, H), jnp.float32),       # bwd hidden states
        pltpu.VMEM((S, NT), jnp.float32),      # lane-padded emissions
        pltpu.VMEM((S, NT), jnp.int32),        # Viterbi back-pointers
    ]

    # explicit scoped-VMEM budget (double-buffered blocks + scratch + headroom)
    blk_bytes = (S * C * 4 + 2 * C * 4 + 3 * C * H * 2 + H * 4
                 + H * 2 * G * 2 + 2 * G * 4 + 2 * H * G * 2
                 + 2 * H * NT * 2 + 3 * NT * 4 + NR * NT * 4 + S_OUT * 4)
    scr_bytes = S * (2 * G + 2 * H + NT) * 4 + S * NT * 4
    vmem_limit = min(int(2 * blk_bytes + scr_bytes) + (4 << 20), 32 * 1024 * 1024)

    out = pl.pallas_call(
        sentiment_kernel,
        grid_spec=pltpu.PrefetchScalarGridSpec(
            num_scalar_prefetch=1,              # attention mask -> SMEM (scalar compares)
            grid=(B,),
            in_specs=in_specs,
            out_specs=pl.BlockSpec((1, 1, S_OUT), lambda b, m: (b, 0, 0)),
            scratch_shapes=scratch),
        out_shape=jax.ShapeDtypeStruct((B, 1, S_OUT), jnp.int32),
        compiler_params=pltpu.CompilerParams(
            dimension_semantics=("parallel",),
            vmem_limit_bytes=vmem_limit),
    )(mask_i32, emb,
      p["ln_g"], p["ln_b"],
      p["conv_wp"], p["conv_wc"], p["conv_wn"], p["conv_b"],
      p["wih"], p["bih"], p["whh_f"], p["whh_b"],
      p["fc_wf"], p["fc_wb"], p["fc_b"],
      p["crf_start"], p["crf_end"], p["crf_trans"])
    return out[:, 0, :S]


# ----------------------------------------------------------------------------- model

def init_params(key, vocab, seq_len, C, H, num_tags=NUM_TAGS):
    ks = jax.random.split(key, 11)
    u = lambda k, shape, bound: jax.random.uniform(k, shape, jnp.float32, -bound, bound)
    p = {}
    p["word_emb"] = 0.02 * jax.random.normal(ks[0], (vocab, C), jnp.float32)
    p["pos_emb"] = 0.02 * jax.random.normal(ks[1], (seq_len, C), jnp.float32)
    p["ln_g"] = jnp.ones((1, C), jnp.float32)
    p["ln_b"] = jnp.zeros((1, C), jnp.float32)

    # Conv1d(768 -> H, k=3): PyTorch weight (out, in, k) split per tap, stored (C, H) bf16.
    kb = (3.0 * C) ** -0.5
    conv_w = u(ks[2], (H, C, 3), kb)
    p["conv_wp"] = conv_w[:, :, 0].T.astype(jnp.bfloat16)   # multiplies y[t-1]
    p["conv_wc"] = conv_w[:, :, 1].T.astype(jnp.bfloat16)   # multiplies y[t]
    p["conv_wn"] = conv_w[:, :, 2].T.astype(jnp.bfloat16)   # multiplies y[t+1]
    p["conv_b"] = u(ks[3], (1, H), kb)

    # BiLSTM: fwd|bwd input weights fused into one (H, 8H) bf16 matrix, biases pre-summed;
    # recurrent weights (H, 4H) bf16 (f32 accumulation in-kernel).
    lb = float(H) ** -0.5

    def lstm_dir(k):
        k1, k2, k3, k4 = jax.random.split(k, 4)
        w_ih = u(k1, (4 * H, H), lb)
        w_hh = u(k2, (4 * H, H), lb)
        b_ih = u(k3, (4 * H,), lb)
        b_hh = u(k4, (4 * H,), lb)
        return w_ih.T, w_hh.T.astype(jnp.bfloat16), (b_ih + b_hh)[None, :]

    wih_f, p["whh_f"], b_f = lstm_dir(ks[4])
    wih_b, p["whh_b"], b_b = lstm_dir(ks[5])
    p["wih"] = jnp.concatenate([wih_f, wih_b], axis=1).astype(jnp.bfloat16)   # (H, 8H)
    p["bih"] = jnp.concatenate([b_f, b_b], axis=1)                            # (1, 8H)

    # Linear(2H -> 3) padded to 128 lanes (zero weight / NEG bias on padded tag lanes).
    fb = (2.0 * H) ** -0.5
    fc_w = u(ks[6], (num_tags, 2 * H), fb).T                   # (2H, 3)
    p["fc_wf"] = (jnp.zeros((H, NT), jnp.float32)
                  .at[:, :num_tags].set(fc_w[:H])).astype(jnp.bfloat16)
    p["fc_wb"] = (jnp.zeros((H, NT), jnp.float32)
                  .at[:, :num_tags].set(fc_w[H:])).astype(jnp.bfloat16)
    p["fc_b"] = jnp.full((1, NT), NEG, jnp.float32).at[0, :num_tags].set(
        u(ks[7], (num_tags,), fb))

    # CRF parameters, NEG-padded once (lanes to 128, prev-tag rows only to 8).
    p["crf_start"] = jnp.full((1, NT), NEG, jnp.float32).at[0, :num_tags].set(
        u(ks[8], (num_tags,), 0.1))
    p["crf_end"] = jnp.full((1, NT), NEG, jnp.float32).at[0, :num_tags].set(
        u(ks[9], (num_tags,), 0.1))
    p["crf_trans"] = jnp.full((NR, NT), NEG, jnp.float32).at[
        :num_tags, :num_tags].set(u(ks[10], (num_tags, num_tags), 0.1))
    return p


def sentiment_forward(params, input_ids, attention_mask):
    # RoBERTa stand-in: word + position embeddings (LayerNorm applied in-kernel).
    # TODO(synk): the pretrained 12-layer roberta-base transformer encoder is a checkpoint load
    # and is not reproduced here; last_hidden_state is stood in by the embeddings.
    emb = jnp.take(params["word_emb"], input_ids, axis=0) + params["pos_emb"][None, :, :]
    # dropout: identity (inference/eval semantics).
    # TODO(synk): CRF training-loss branch (labels is not None) not implemented; decode() only.
    return crf_decode_forward(emb, attention_mask.astype(jnp.int32), params)


# ----------------------------------------------------------------------------- main

if __name__ == "__main__":
    B, S, C, H, VOCAB = 2, 8, 768, 32, 512
    key = jax.random.PRNGKey(0)
    pkey, ikey = jax.random.split(key)

    params = init_params(pkey, VOCAB, S, C, H)
    input_ids = jax.random.randint(ikey, (B, S), 0, VOCAB, dtype=jnp.int32)
    attention_mask = jnp.array([[1] * S, [1] * (S - 2) + [0] * 2], dtype=jnp.int32)

    fwd = jax.jit(sentiment_forward)
    tags = jax.block_until_ready(fwd(params, input_ids, attention_mask))

    assert tags.shape == (B, S) and tags.dtype == jnp.int32
    assert int(tags.min()) >= 0 and int(tags.max()) < NUM_TAGS
    print("KERNEL_OK")
</pallas_src>

<mosaic_0001>
module attributes {stable_mosaic.version = 11 : i64} {
  func.func @sentiment_kernel(%arg0: i32, %arg1: memref<2x8xi32, #tpu.memory_space<smem>>, %arg2: memref<1x8x768xf32, #tpu.memory_space<vmem>>, %arg3: memref<1x768xf32, #tpu.memory_space<vmem>>, %arg4: memref<1x768xf32, #tpu.memory_space<vmem>>, %arg5: memref<768x32xbf16, #tpu.memory_space<vmem>>, %arg6: memref<768x32xbf16, #tpu.memory_space<vmem>>, %arg7: memref<768x32xbf16, #tpu.memory_space<vmem>>, %arg8: memref<1x32xf32, #tpu.memory_space<vmem>>, %arg9: memref<32x256xbf16, #tpu.memory_space<vmem>>, %arg10: memref<1x256xf32, #tpu.memory_space<vmem>>, %arg11: memref<32x128xbf16, #tpu.memory_space<vmem>>, %arg12: memref<32x128xbf16, #tpu.memory_space<vmem>>, %arg13: memref<32x128xbf16, #tpu.memory_space<vmem>>, %arg14: memref<32x128xbf16, #tpu.memory_space<vmem>>, %arg15: memref<1x128xf32, #tpu.memory_space<vmem>>, %arg16: memref<1x128xf32, #tpu.memory_space<vmem>>, %arg17: memref<1x128xf32, #tpu.memory_space<vmem>>, %arg18: memref<8x128xf32, #tpu.memory_space<vmem>>, %arg19: memref<1x1x128xi32, #tpu.memory_space<vmem>>, %arg20: memref<8x256xf32, #tpu.memory_space<vmem>>, %arg21: memref<8x32xf32, #tpu.memory_space<vmem>>, %arg22: memref<8x32xf32, #tpu.memory_space<vmem>>, %arg23: memref<8x128xf32, #tpu.memory_space<vmem>>, %arg24: memref<8x128xi32, #tpu.memory_space<vmem>>) attributes {dimension_semantics = [#tpu.dimension_semantics<parallel>], iteration_bounds = array<i64: 2>, scalar_prefetch = 1 : i64, scratch_operands = 5 : i64, tpu.core_type = #tpu.core_type<tc>, window_params = [{transform_indices = @transform_0, window_bounds = array<i64: 1, 8, 768>}, {pipeline_mode = #tpu.pipeline_mode<synchronous>, transform_indices = @transform_1, window_bounds = array<i64: 1, 768>}, {pipeline_mode = #tpu.pipeline_mode<synchronous>, transform_indices = @transform_2, window_bounds = array<i64: 1, 768>}, {pipeline_mode = #tpu.pipeline_mode<synchronous>, transform_indices = @transform_3, window_bounds = array<i64: 768, 32>}, {pipeline_mode = #tpu.pipeline_mode<synchronous>, transform_indices = @transform_4, window_bounds = array<i64: 768, 32>}, {pipeline_mode = #tpu.pipeline_mode<synchronous>, transform_indices = @transform_5, window_bounds = array<i64: 768, 32>}, {pipeline_mode = #tpu.pipeline_mode<synchronous>, transform_indices = @transform_6, window_bounds = array<i64: 1, 32>}, {pipeline_mode = #tpu.pipeline_mode<synchronous>, transform_indices = @transform_7, window_bounds = array<i64: 32, 256>}, {pipeline_mode = #tpu.pipeline_mode<synchronous>, transform_indices = @transform_8, window_bounds = array<i64: 1, 256>}, {pipeline_mode = #tpu.pipeline_mode<synchronous>, transform_indices = @transform_9, window_bounds = array<i64: 32, 128>}, {pipeline_mode = #tpu.pipeline_mode<synchronous>, transform_indices = @transform_10, window_bounds = array<i64: 32, 128>}, {pipeline_mode = #tpu.pipeline_mode<synchronous>, transform_indices = @transform_11, window_bounds = array<i64: 32, 128>}, {pipeline_mode = #tpu.pipeline_mode<synchronous>, transform_indices = @transform_12, window_bounds = array<i64: 32, 128>}, {pipeline_mode = #tpu.pipeline_mode<synchronous>, transform_indices = @transform_13, window_bounds = array<i64: 1, 128>}, {pipeline_mode = #tpu.pipeline_mode<synchronous>, transform_indices = @transform_14, window_bounds = array<i64: 1, 128>}, {pipeline_mode = #tpu.pipeline_mode<synchronous>, transform_indices = @transform_15, window_bounds = array<i64: 1, 128>}, {pipeline_mode = #tpu.pipeline_mode<synchronous>, transform_indices = @transform_16, window_bounds = array<i64: 8, 128>}, {transform_indices = @transform_17, window_bounds = array<i64: 1, 1, 128>}]} {
    %c0 = arith.constant 0 : index
    %c0_0 = arith.constant 0 : index
    %c0_1 = arith.constant 0 : index
    %0 = vector.load %arg2[%c0, %c0_0, %c0_1] : memref<1x8x768xf32, #tpu.memory_space<vmem>>, vector<1x8x768xf32>
    %1 = vector.shape_cast %0 : vector<1x8x768xf32> to vector<8x768xf32>
    %cst = arith.constant dense<0.000000e+00> : vector<8xf32>
    %2 = vector.multi_reduction <add>, %1, %cst [1] : vector<8x768xf32> to vector<8xf32>
    %3 = vector.shape_cast %2 : vector<8xf32> to vector<8x1xf32>
    %cst_2 = arith.constant 7.680000e+02 : f32
    %4 = vector.broadcast %cst_2 : f32 to vector<8x1xf32>
    %5 = arith.divf %3, %4 : vector<8x1xf32>
    %6 = vector.broadcast %5 : vector<8x1xf32> to vector<8x768xf32>
    %7 = arith.subf %1, %6 : vector<8x768xf32>
    %8 = arith.mulf %7, %7 : vector<8x768xf32>
    %cst_3 = arith.constant dense<0.000000e+00> : vector<8xf32>
    %9 = vector.multi_reduction <add>, %8, %cst_3 [1] : vector<8x768xf32> to vector<8xf32>
    %10 = vector.shape_cast %9 : vector<8xf32> to vector<8x1xf32>
    %cst_4 = arith.constant 7.680000e+02 : f32
    %11 = vector.broadcast %cst_4 : f32 to vector<8x1xf32>
    %12 = arith.divf %10, %11 : vector<8x1xf32>
    %cst_5 = arith.constant 9.99999974E-6 : f32
    %13 = vector.broadcast %cst_5 : f32 to vector<8x1xf32>
    %14 = arith.addf %12, %13 : vector<8x1xf32>
    %15 = math.rsqrt %14 : vector<8x1xf32>
    %16 = vector.broadcast %15 : vector<8x1xf32> to vector<8x768xf32>
    %17 = arith.mulf %7, %16 : vector<8x768xf32>
    %c0_6 = arith.constant 0 : index
    %c0_7 = arith.constant 0 : index
    %18 = vector.load %arg3[%c0_6, %c0_7] : memref<1x768xf32, #tpu.memory_space<vmem>>, vector<1x768xf32>
    %19 = vector.broadcast %18 : vector<1x768xf32> to vector<8x768xf32>
    %20 = arith.mulf %17, %19 : vector<8x768xf32>
    %c0_8 = arith.constant 0 : index
    %c0_9 = arith.constant 0 : index
    %21 = vector.load %arg4[%c0_8, %c0_9] : memref<1x768xf32, #tpu.memory_space<vmem>>, vector<1x768xf32>
    %22 = vector.broadcast %21 : vector<1x768xf32> to vector<8x768xf32>
    %23 = arith.addf %20, %22 : vector<8x768xf32>
    %24 = arith.truncf %23 : vector<8x768xf32> to vector<8x768xbf16>
    %c0_10 = arith.constant 0 : index
    %c0_11 = arith.constant 0 : index
    %25 = vector.load %arg5[%c0_10, %c0_11] : memref<768x32xbf16, #tpu.memory_space<vmem>>, vector<768x32xbf16>
    %cst_12 = arith.constant dense<0.000000e+00> : vector<8x32xf32>
    %26 = tpu.matmul %24, %25, %cst_12 {dimension_numbers = #tpu.dot_dimension_numbers<[1], [0], [0], [1], [0, 0, 1, 1], [], []>} : vector<8x768xbf16>, vector<768x32xbf16>, vector<8x32xf32> -> vector<8x32xf32>
    %c0_13 = arith.constant 0 : index
    %c0_14 = arith.constant 0 : index
    %27 = vector.load %arg6[%c0_13, %c0_14] : memref<768x32xbf16, #tpu.memory_space<vmem>>, vector<768x32xbf16>
    %cst_15 = arith.constant dense<0.000000e+00> : vector<8x32xf32>
    %28 = tpu.matmul %24, %27, %cst_15 {dimension_numbers = #tpu.dot_dimension_numbers<[1], [0], [0], [1], [0, 0, 1, 1], [], []>} : vector<8x768xbf16>, vector<768x32xbf16>, vector<8x32xf32> -> vector<8x32xf32>
    %c0_16 = arith.constant 0 : index
    %c0_17 = arith.constant 0 : index
    %29 = vector.load %arg7[%c0_16, %c0_17] : memref<768x32xbf16, #tpu.memory_space<vmem>>, vector<768x32xbf16>
    %cst_18 = arith.constant dense<0.000000e+00> : vector<8x32xf32>
    %30 = tpu.matmul %24, %29, %cst_18 {dimension_numbers = #tpu.dot_dimension_numbers<[1], [0], [0], [1], [0, 0, 1, 1], [], []>} : vector<8x768xbf16>, vector<768x32xbf16>, vector<8x32xf32> -> vector<8x32xf32>
    %31 = tpu.iota {dimensions = array<i32: 0>} : vector<8x32xi32>
    %c0_19 = arith.constant 0 : index
    %c0_20 = arith.constant 0 : index
    %32 = vector.load %arg8[%c0_19, %c0_20] : memref<1x32xf32, #tpu.memory_space<vmem>>, vector<1x32xf32>
    %33 = vector.broadcast %32 : vector<1x32xf32> to vector<8x32xf32>
    %34 = arith.addf %28, %33 : vector<8x32xf32>
    %c0_i32 = arith.constant 0 : i32
    %35 = vector.broadcast %c0_i32 : i32 to vector<8x32xi32>
    %36 = arith.cmpi eq, %31, %35 : vector<8x32xi32>
    %c1_i32 = arith.constant 1 : i32
    %37 = tpu.dynamic_rotate %26 by %c1_i32 dim 0 : vector<8x32xf32>, i32 -> vector<8x32xf32>
    %cst_21 = arith.constant 0.000000e+00 : f32
    %38 = vector.broadcast %cst_21 : f32 to vector<8x32xf32>
    %39 = arith.select %36, %38, %37 : vector<8x32xi1>, vector<8x32xf32>
    %40 = arith.addf %34, %39 : vector<8x32xf32>
    %c7_i32 = arith.constant 7 : i32
    %41 = vector.broadcast %c7_i32 : i32 to vector<8x32xi32>
    %42 = arith.cmpi eq, %31, %41 : vector<8x32xi32>
    %c7_i32_22 = arith.constant 7 : i32
    %43 = tpu.dynamic_rotate %30 by %c7_i32_22 dim 0 : vector<8x32xf32>, i32 -> vector<8x32xf32>
    %cst_23 = arith.constant 0.000000e+00 : f32
    %44 = vector.broadcast %cst_23 : f32 to vector<8x32xf32>
    %45 = arith.select %42, %44, %43 : vector<8x32xi1>, vector<8x32xf32>
    %46 = arith.addf %40, %45 : vector<8x32xf32>
    %47 = arith.truncf %46 : vector<8x32xf32> to vector<8x32xbf16>
    %c0_24 = arith.constant 0 : index
    %c0_25 = arith.constant 0 : index
    %48 = vector.load %arg9[%c0_24, %c0_25] : memref<32x256xbf16, #tpu.memory_space<vmem>>, vector<32x256xbf16>
    %cst_26 = arith.constant dense<0.000000e+00> : vector<8x256xf32>
    %49 = tpu.matmul %47, %48, %cst_26 {dimension_numbers = #tpu.dot_dimension_numbers<[1], [0], [0], [1], [0, 0, 1, 1], [], []>} : vector<8x32xbf16>, vector<32x256xbf16>, vector<8x256xf32> -> vector<8x256xf32>
    %c0_27 = arith.constant 0 : index
    %c0_28 = arith.constant 0 : index
    %50 = vector.load %arg10[%c0_27, %c0_28] : memref<1x256xf32, #tpu.memory_space<vmem>>, vector<1x256xf32>
    %51 = vector.broadcast %50 : vector<1x256xf32> to vector<8x256xf32>
    %52 = arith.addf %49, %51 : vector<8x256xf32>
    %c0_29 = arith.constant 0 : index
    %c0_30 = arith.constant 0 : index
    %53 = vector.load %arg20[%c0_29, %c0_30] : memref<8x256xf32, #tpu.memory_space<vmem>>, vector<8x256xf32>
    tpu.vector_store %arg20[%c0_29, %c0_30], %52 {strides = array<i32>} : memref<8x256xf32, #tpu.memory_space<vmem>>, vector<8x256xf32>,
    %c0_31 = arith.constant 0 : index
    %c0_32 = arith.constant 0 : index
    %54 = vector.load %arg11[%c0_31, %c0_32] : memref<32x128xbf16, #tpu.memory_space<vmem>>, vector<32x128xbf16>
    %c0_33 = arith.constant 0 : index
    %c0_34 = arith.constant 0 : index
    %55 = vector.load %arg12[%c0_33, %c0_34] : memref<32x128xbf16, #tpu.memory_space<vmem>>, vector<32x128xbf16>
    %cst_35 = arith.constant 0.000000e+00 : f32
    %56 = vector.broadcast %cst_35 : f32 to vector<1x32xf32>
    %c0_i32_36 = arith.constant 0 : i32
    %c7_i32_37 = arith.constant 7 : i32
    %57 = arith.subi %c7_i32_37, %c0_i32_36 : i32
    %58 = arith.index_cast %c0_i32_36 : i32 to index
    %c0_38 = arith.constant 0 : index
    %59 = vector.load %arg20[%58, %c0_38] : memref<8x256xf32, #tpu.memory_space<vmem>>, vector<1x128xf32>
    %60 = arith.truncf %56 : vector<1x32xf32> to vector<1x32xbf16>
    %cst_39 = arith.constant dense<0.000000e+00> : vector<1x128xf32>
    %61 = tpu.matmul %60, %54, %cst_39 {dimension_numbers = #tpu.dot_dimension_numbers<[1], [0], [0], [1], [0, 0, 1, 1], [], []>} : vector<1x32xbf16>, vector<32x128xbf16>, vector<1x128xf32> -> vector<1x128xf32>
    %62 = arith.addf %59, %61 : vector<1x128xf32>
    %63 = vector.extract_strided_slice %62 {offsets = [0, 0], sizes = [1, 32], strides = [1, 1]} : vector<1x128xf32> to vector<1x32xf32>
    %64 = arith.negf %63 : vector<1x32xf32>
    %65 = math.exp %64 : vector<1x32xf32>
    %cst_40 = arith.constant 1.000000e+00 : f32
    %66 = vector.broadcast %cst_40 : f32 to vector<1x32xf32>
    %67 = arith.addf %66, %65 : vector<1x32xf32>
    %68 = arith.divf %66, %67 : vector<1x32xf32>
    %69 = vector.extract_strided_slice %62 {offsets = [0, 32], sizes = [1, 32], strides = [1, 1]} : vector<1x128xf32> to vector<1x32xf32>
    %70 = arith.negf %69 : vector<1x32xf32>
    %71 = math.exp %70 : vector<1x32xf32>
    %cst_41 = arith.constant 1.000000e+00 : f32
    %72 = vector.broadcast %cst_41 : f32 to vector<1x32xf32>
    %73 = arith.addf %72, %71 : vector<1x32xf32>
    %74 = arith.divf %72, %73 : vector<1x32xf32>
    %75 = vector.extract_strided_slice %62 {offsets = [0, 64], sizes = [1, 32], strides = [1, 1]} : vector<1x128xf32> to vector<1x32xf32>
    %76 = math.tanh %75 : vector<1x32xf32>
    %77 = vector.extract_strided_slice %62 {offsets = [0, 96], sizes = [1, 32], strides = [1, 1]} : vector<1x128xf32> to vector<1x32xf32>
    %78 = arith.negf %77 : vector<1x32xf32>
    %79 = math.exp %78 : vector<1x32xf32>
    %cst_42 = arith.constant 1.000000e+00 : f32
    %80 = vector.broadcast %cst_42 : f32 to vector<1x32xf32>
    %81 = arith.addf %80, %79 : vector<1x32xf32>
    %82 = arith.divf %80, %81 : vector<1x32xf32>
    %83 = arith.mulf %74, %56 : vector<1x32xf32>
    %84 = arith.mulf %68, %76 : vector<1x32xf32>
    %85 = arith.addf %83, %84 : vector<1x32xf32>
    %86 = math.tanh %85 : vector<1x32xf32>
    %87 = arith.mulf %82, %86 : vector<1x32xf32>
    %88 = arith.index_cast %57 : i32 to index
    %c128 = arith.constant 128 : index
    %89 = vector.load %arg20[%88, %c128] : memref<8x256xf32, #tpu.memory_space<vmem>>, vector<1x128xf32>
    %90 = arith.truncf %56 : vector<1x32xf32> to vector<1x32xbf16>
    %cst_43 = arith.constant dense<0.000000e+00> : vector<1x128xf32>
    %91 = tpu.matmul %90, %55, %cst_43 {dimension_numbers = #tpu.dot_dimension_numbers<[1], [0], [0], [1], [0, 0, 1, 1], [], []>} : vector<1x32xbf16>, vector<32x128xbf16>, vector<1x128xf32> -> vector<1x128xf32>
    %92 = arith.addf %89, %91 : vector<1x128xf32>
    %93 = vector.extract_strided_slice %92 {offsets = [0, 0], sizes = [1, 32], strides = [1, 1]} : vector<1x128xf32> to vector<1x32xf32>
    %94 = arith.negf %93 : vector<1x32xf32>
    %95 = math.exp %94 : vector<1x32xf32>
    %cst_44 = arith.constant 1.000000e+00 : f32
    %96 = vector.broadcast %cst_44 : f32 to vector<1x32xf32>
    %97 = arith.addf %96, %95 : vector<1x32xf32>
    %98 = arith.divf %96, %97 : vector<1x32xf32>
    %99 = vector.extract_strided_slice %92 {offsets = [0, 32], sizes = [1, 32], strides = [1, 1]} : vector<1x128xf32> to vector<1x32xf32>
    %100 = arith.negf %99 : vector<1x32xf32>
    %101 = math.exp %100 : vector<1x32xf32>
    %cst_45 = arith.constant 1.000000e+00 : f32
    %102 = vector.broadcast %cst_45 : f32 to vector<1x32xf32>
    %103 = arith.addf %102, %101 : vector<1x32xf32>
    %104 = arith.divf %102, %103 : vector<1x32xf32>
    %105 = vector.extract_strided_slice %92 {offsets = [0, 64], sizes = [1, 32], strides = [1, 1]} : vector<1x128xf32> to vector<1x32xf32>
    %106 = math.tanh %105 : vector<1x32xf32>
    %107 = vector.extract_strided_slice %92 {offsets = [0, 96], sizes = [1, 32], strides = [1, 1]} : vector<1x128xf32> to vector<1x32xf32>
    %108 = arith.negf %107 : vector<1x32xf32>
    %109 = math.exp %108 : vector<1x32xf32>
    %cst_46 = arith.constant 1.000000e+00 : f32
    %110 = vector.broadcast %cst_46 : f32 to vector<1x32xf32>
    %111 = arith.addf %110, %109 : vector<1x32xf32>
    %112 = arith.divf %110, %111 : vector<1x32xf32>
    %113 = arith.mulf %104, %56 : vector<1x32xf32>
    %114 = arith.mulf %98, %106 : vector<1x32xf32>
    %115 = arith.addf %113, %114 : vector<1x32xf32>
    %116 = math.tanh %115 : vector<1x32xf32>
    %117 = arith.mulf %112, %116 : vector<1x32xf32>
    %118 = arith.index_cast %c0_i32_36 : i32 to index
    %c0_47 = arith.constant 0 : index
    %119 = vector.load %arg21[%118, %c0_47] : memref<8x32xf32, #tpu.memory_space<vmem>>, vector<1x32xf32>
    tpu.vector_store %arg21[%118, %c0_47], %87 {strides = array<i32>} : memref<8x32xf32, #tpu.memory_space<vmem>>, vector<1x32xf32>,
    %120 = arith.index_cast %57 : i32 to index
    %c0_48 = arith.constant 0 : index
    %121 = vector.load %arg22[%120, %c0_48] : memref<8x32xf32, #tpu.memory_space<vmem>>, vector<1x32xf32>
    tpu.vector_store %arg22[%120, %c0_48], %117 {strides = array<i32>} : memref<8x32xf32, #tpu.memory_space<vmem>>, vector<1x32xf32>,
    %c1_i32_49 = arith.constant 1 : i32
    %c7_i32_50 = arith.constant 7 : i32
    %122 = arith.subi %c7_i32_50, %c1_i32_49 : i32
    %123 = arith.index_cast %c1_i32_49 : i32 to index
    %c0_51 = arith.constant 0 : index
    %124 = vector.load %arg20[%123, %c0_51] : memref<8x256xf32, #tpu.memory_space<vmem>>, vector<1x128xf32>
    %125 = arith.truncf %87 : vector<1x32xf32> to vector<1x32xbf16>
    %cst_52 = arith.constant dense<0.000000e+00> : vector<1x128xf32>
    %126 = tpu.matmul %125, %54, %cst_52 {dimension_numbers = #tpu.dot_dimension_numbers<[1], [0], [0], [1], [0, 0, 1, 1], [], []>} : vector<1x32xbf16>, vector<32x128xbf16>, vector<1x128xf32> -> vector<1x128xf32>
    %127 = arith.addf %124, %126 : vector<1x128xf32>
    %128 = vector.extract_strided_slice %127 {offsets = [0, 0], sizes = [1, 32], strides = [1, 1]} : vector<1x128xf32> to vector<1x32xf32>
    %129 = arith.negf %128 : vector<1x32xf32>
    %130 = math.exp %129 : vector<1x32xf32>
    %cst_53 = arith.constant 1.000000e+00 : f32
    %131 = vector.broadcast %cst_53 : f32 to vector<1x32xf32>
    %132 = arith.addf %131, %130 : vector<1x32xf32>
    %133 = arith.divf %131, %132 : vector<1x32xf32>
    %134 = vector.extract_strided_slice %127 {offsets = [0, 32], sizes = [1, 32], strides = [1, 1]} : vector<1x128xf32> to vector<1x32xf32>
    %135 = arith.negf %134 : vector<1x32xf32>
    %136 = math.exp %135 : vector<1x32xf32>
    %cst_54 = arith.constant 1.000000e+00 : f32
    %137 = vector.broadcast %cst_54 : f32 to vector<1x32xf32>
    %138 = arith.addf %137, %136 : vector<1x32xf32>
    %139 = arith.divf %137, %138 : vector<1x32xf32>
    %140 = vector.extract_strided_slice %127 {offsets = [0, 64], sizes = [1, 32], strides = [1, 1]} : vector<1x128xf32> to vector<1x32xf32>
    %141 = math.tanh %140 : vector<1x32xf32>
    %142 = vector.extract_strided_slice %127 {offsets = [0, 96], sizes = [1, 32], strides = [1, 1]} : vector<1x128xf32> to vector<1x32xf32>
    %143 = arith.negf %142 : vector<1x32xf32>
    %144 = math.exp %143 : vector<1x32xf32>
    %cst_55 = arith.constant 1.000000e+00 : f32
    %145 = vector.broadcast %cst_55 : f32 to vector<1x32xf32>
    %146 = arith.addf %145, %144 : vector<1x32xf32>
    %147 = arith.divf %145, %146 : vector<1x32xf32>
    %148 = arith.mulf %139, %85 : vector<1x32xf32>
    %149 = arith.mulf %133, %141 : vector<1x32xf32>
    %150 = arith.addf %148, %149 : vector<1x32xf32>
    %151 = math.tanh %150 : vector<1x32xf32>
    %152 = arith.mulf %147, %151 : vector<1x32xf32>
    %153 = arith.index_cast %122 : i32 to index
    %c128_56 = arith.constant 128 : index
    %154 = vector.load %arg20[%153, %c128_56] : memref<8x256xf32, #tpu.memory_space<vmem>>, vector<1x128xf32>
    %155 = arith.truncf %117 : vector<1x32xf32> to vector<1x32xbf16>
    %cst_57 = arith.constant dense<0.000000e+00> : vector<1x128xf32>
    %156 = tpu.matmul %155, %55, %cst_57 {dimension_numbers = #tpu.dot_dimension_numbers<[1], [0], [0], [1], [0, 0, 1, 1], [], []>} : vector<1x32xbf16>, vector<32x128xbf16>, vector<1x128xf32> -> vector<1x128xf32>
    %157 = arith.addf %154, %156 : vector<1x128xf32>
    %158 = vector.extract_strided_slice %157 {offsets = [0, 0], sizes = [1, 32], strides = [1, 1]} : vector<1x128xf32> to vector<1x32xf32>
    %159 = arith.negf %158 : vector<1x32xf32>
    %160 = math.exp %159 : vector<1x32xf32>
    %cst_58 = arith.constant 1.000000e+00 : f32
    %161 = vector.broadcast %cst_58 : f32 to vector<1x32xf32>
    %162 = arith.addf %161, %160 : vector<1x32xf32>
    %163 = arith.divf %161, %162 : vector<1x32xf32>
    %164 = vector.extract_strided_slice %157 {offsets = [0, 32], sizes = [1, 32], strides = [1, 1]} : vector<1x128xf32> to vector<1x32xf32>
    %165 = arith.negf %164 : vector<1x32xf32>
    %166 = math.exp %165 : vector<1x32xf32>
    %cst_59 = arith.constant 1.000000e+00 : f32
    %167 = vector.broadcast %cst_59 : f32 to vector<1x32xf32>
    %168 = arith.addf %167, %166 : vector<1x32xf32>
    %169 = arith.divf %167, %168 : vector<1x32xf32>
    %170 = vector.extract_strided_slice %157 {offsets = [0, 64], sizes = [1, 32], strides = [1, 1]} : vector<1x128xf32> to vector<1x32xf32>
    %171 = math.tanh %170 : vector<1x32xf32>
    %172 = vector.extract_strided_slice %157 {offsets = [0, 96], sizes = [1, 32], strides = [1, 1]} : vector<1x128xf32> to vector<1x32xf32>
    %173 = arith.negf %172 : vector<1x32xf32>
    %174 = math.exp %173 : vector<1x32xf32>
    %cst_60 = arith.constant 1.000000e+00 : f32
    %175 = vector.broadcast %cst_60 : f32 to vector<1x32xf32>
    %176 = arith.addf %175, %174 : vector<1x32xf32>
    %177 = arith.divf %175, %176 : vector<1x32xf32>
    %178 = arith.mulf %169, %115 : vector<1x32xf32>
    %179 = arith.mulf %163, %171 : vector<1x32xf32>
    %180 = arith.addf %178, %179 : vector<1x32xf32>
    %181 = math.tanh %180 : vector<1x32xf32>
    %182 = arith.mulf %177, %181 : vector<1x32xf32>
    %183 = arith.index_cast %c1_i32_49 : i32 to index
    %c0_61 = arith.constant 0 : index
    %184 = vector.load %arg21[%183, %c0_61] : memref<8x32xf32, #tpu.memory_space<vmem>>, vector<1x32xf32>
    tpu.vector_store %arg21[%183, %c0_61], %152 {strides = array<i32>} : memref<8x32xf32, #tpu.memory_space<vmem>>, vector<1x32xf32>,
    %185 = arith.index_cast %122 : i32 to index
    %c0_62 = arith.constant 0 : index
    %186 = vector.load %arg22[%185, %c0_62] : memref<8x32xf32, #tpu.memory_space<vmem>>, vector<1x32xf32>
    tpu.vector_store %arg22[%185, %c0_62], %182 {strides = array<i32>} : memref<8x32xf32, #tpu.memory_space<vmem>>, vector<1x32xf32>,
    %c2_i32 = arith.constant 2 : i32
    %c7_i32_63 = arith.constant 7 : i32
    %187 = arith.subi %c7_i32_63, %c2_i32 : i32
    %188 = arith.index_cast %c2_i32 : i32 to index
    %c0_64 = arith.constant 0 : index
    %189 = vector.load %arg20[%188, %c0_64] : memref<8x256xf32, #tpu.memory_space<vmem>>, vector<1x128xf32>
    %190 = arith.truncf %152 : vector<1x32xf32> to vector<1x32xbf16>
    %cst_65 = arith.constant dense<0.000000e+00> : vector<1x128xf32>
    %191 = tpu.matmul %190, %54, %cst_65 {dimension_numbers = #tpu.dot_dimension_numbers<[1], [0], [0], [1], [0, 0, 1, 1], [], []>} : vector<1x32xbf16>, vector<32x128xbf16>, vector<1x128xf32> -> vector<1x128xf32>
    %192 = arith.addf %189, %191 : vector<1x128xf32>
    %193 = vector.extract_strided_slice %192 {offsets = [0, 0], sizes = [1, 32], strides = [1, 1]} : vector<1x128xf32> to vector<1x32xf32>
    %194 = arith.negf %193 : vector<1x32xf32>
    %195 = math.exp %194 : vector<1x32xf32>
    %cst_66 = arith.constant 1.000000e+00 : f32
    %196 = vector.broadcast %cst_66 : f32 to vector<1x32xf32>
    %197 = arith.addf %196, %195 : vector<1x32xf32>
    %198 = arith.divf %196, %197 : vector<1x32xf32>
    %199 = vector.extract_strided_slice %192 {offsets = [0, 32], sizes = [1, 32], strides = [1, 1]} : vector<1x128xf32> to vector<1x32xf32>
    %200 = arith.negf %199 : vector<1x32xf32>
    %201 = math.exp %200 : vector<1x32xf32>
    %cst_67 = arith.constant 1.000000e+00 : f32
    %202 = vector.broadcast %cst_67 : f32 to vector<1x32xf32>
    %203 = arith.addf %202, %201 : vector<1x32xf32>
    %204 = arith.divf %202, %203 : vector<1x32xf32>
    %205 = vector.extract_strided_slice %192 {offsets = [0, 64], sizes = [1, 32], strides = [1, 1]} : vector<1x128xf32> to vector<1x32xf32>
    %206 = math.tanh %205 : vector<1x32xf32>
    %207 = vector.extract_strided_slice %192 {offsets = [0, 96], sizes = [1, 32], strides = [1, 1]} : vector<1x128xf32> to vector<1x32xf32>
    %208 = arith.negf %207 : vector<1x32xf32>
    %209 = math.exp %208 : vector<1x32xf32>
    %cst_68 = arith.constant 1.000000e+00 : f32
    %210 = vector.broadcast %cst_68 : f32 to vector<1x32xf32>
    %211 = arith.addf %210, %209 : vector<1x32xf32>
    %212 = arith.divf %210, %211 : vector<1x32xf32>
    %213 = arith.mulf %204, %150 : vector<1x32xf32>
    %214 = arith.mulf %198, %206 : vector<1x32xf32>
    %215 = arith.addf %213, %214 : vector<1x32xf32>
    %216 = math.tanh %215 : vector<1x32xf32>
    %217 = arith.mulf %212, %216 : vector<1x32xf32>
    %218 = arith.index_cast %187 : i32 to index
    %c128_69 = arith.constant 128 : index
    %219 = vector.load %arg20[%218, %c128_69] : memref<8x256xf32, #tpu.memory_space<vmem>>, vector<1x128xf32>
    %220 = arith.truncf %182 : vector<1x32xf32> to vector<1x32xbf16>
    %cst_70 = arith.constant dense<0.000000e+00> : vector<1x128xf32>
    %221 = tpu.matmul %220, %55, %cst_70 {dimension_numbers = #tpu.dot_dimension_numbers<[1], [0], [0], [1], [0, 0, 1, 1], [], []>} : vector<1x32xbf16>, vector<32x128xbf16>, vector<1x128xf32> -> vector<1x128xf32>
    %222 = arith.addf %219, %221 : vector<1x128xf32>
    %223 = vector.extract_strided_slice %222 {offsets = [0, 0], sizes = [1, 32], strides = [1, 1]} : vector<1x128xf32> to vector<1x32xf32>
    %224 = arith.negf %223 : vector<1x32xf32>
    %225 = math.exp %224 : vector<1x32xf32>
    %cst_71 = arith.constant 1.000000e+00 : f32
    %226 = vector.broadcast %cst_71 : f32 to vector<1x32xf32>
    %227 = arith.addf %226, %225 : vector<1x32xf32>
    %228 = arith.divf %226, %227 : vector<1x32xf32>
    %229 = vector.extract_strided_slice %222 {offsets = [0, 32], sizes = [1, 32], strides = [1, 1]} : vector<1x128xf32> to vector<1x32xf32>
    %230 = arith.negf %229 : vector<1x32xf32>
    %231 = math.exp %230 : vector<1x32xf32>
    %cst_72 = arith.constant 1.000000e+00 : f32
    %232 = vector.broadcast %cst_72 : f32 to vector<1x32xf32>
    %233 = arith.addf %232, %231 : vector<1x32xf32>
    %234 = arith.divf %232, %233 : vector<1x32xf32>
    %235 = vector.extract_strided_slice %222 {offsets = [0, 64], sizes = [1, 32], strides = [1, 1]} : vector<1x128xf32> to vector<1x32xf32>
    %236 = math.tanh %235 : vector<1x32xf32>
    %237 = vector.extract_strided_slice %222 {offsets = [0, 96], sizes = [1, 32], strides = [1, 1]} : vector<1x128xf32> to vector<1x32xf32>
    %238 = arith.negf %237 : vector<1x32xf32>
    %239 = math.exp %238 : vector<1x32xf32>
    %cst_73 = arith.constant 1.000000e+00 : f32
    %240 = vector.broadcast %cst_73 : f32 to vector<1x32xf32>
    %241 = arith.addf %240, %239 : vector<1x32xf32>
    %242 = arith.divf %240, %241 : vector<1x32xf32>
    %243 = arith.mulf %234, %180 : vector<1x32xf32>
    %244 = arith.mulf %228, %236 : vector<1x32xf32>
    %245 = arith.addf %243, %244 : vector<1x32xf32>
    %246 = math.tanh %245 : vector<1x32xf32>
    %247 = arith.mulf %242, %246 : vector<1x32xf32>
    %248 = arith.index_cast %c2_i32 : i32 to index
    %c0_74 = arith.constant 0 : index
    %249 = vector.load %arg21[%248, %c0_74] : memref<8x32xf32, #tpu.memory_space<vmem>>, vector<1x32xf32>
    tpu.vector_store %arg21[%248, %c0_74], %217 {strides = array<i32>} : memref<8x32xf32, #tpu.memory_space<vmem>>, vector<1x32xf32>,
    %250 = arith.index_cast %187 : i32 to index
    %c0_75 = arith.constant 0 : index
    %251 = vector.load %arg22[%250, %c0_75] : memref<8x32xf32, #tpu.memory_space<vmem>>, vector<1x32xf32>
    tpu.vector_store %arg22[%250, %c0_75], %247 {strides = array<i32>} : memref<8x32xf32, #tpu.memory_space<vmem>>, vector<1x32xf32>,
    %c3_i32 = arith.constant 3 : i32
    %c7_i32_76 = arith.constant 7 : i32
    %252 = arith.subi %c7_i32_76, %c3_i32 : i32
    %253 = arith.index_cast %c3_i32 : i32 to index
    %c0_77 = arith.constant 0 : index
    %254 = vector.load %arg20[%253, %c0_77] : memref<8x256xf32, #tpu.memory_space<vmem>>, vector<1x128xf32>
    %255 = arith.truncf %217 : vector<1x32xf32> to vector<1x32xbf16>
    %cst_78 = arith.constant dense<0.000000e+00> : vector<1x128xf32>
    %256 = tpu.matmul %255, %54, %cst_78 {dimension_numbers = #tpu.dot_dimension_numbers<[1], [0], [0], [1], [0, 0, 1, 1], [], []>} : vector<1x32xbf16>, vector<32x128xbf16>, vector<1x128xf32> -> vector<1x128xf32>
    %257 = arith.addf %254, %256 : vector<1x128xf32>
    %258 = vector.extract_strided_slice %257 {offsets = [0, 0], sizes = [1, 32], strides = [1, 1]} : vector<1x128xf32> to vector<1x32xf32>
    %259 = arith.negf %258 : vector<1x32xf32>
    %260 = math.exp %259 : vector<1x32xf32>
    %cst_79 = arith.constant 1.000000e+00 : f32
    %261 = vector.broadcast %cst_79 : f32 to vector<1x32xf32>
    %262 = arith.addf %261, %260 : vector<1x32xf32>
    %263 = arith.divf %261, %262 : vector<1x32xf32>
    %264 = vector.extract_strided_slice %257 {offsets = [0, 32], sizes = [1, 32], strides = [1, 1]} : vector<1x128xf32> to vector<1x32xf32>
    %265 = arith.negf %264 : vector<1x32xf32>
    %266 = math.exp %265 : vector<1x32xf32>
    %cst_80 = arith.constant 1.000000e+00 : f32
    %267 = vector.broadcast %cst_80 : f32 to vector<1x32xf32>
    %268 = arith.addf %267, %266 : vector<1x32xf32>
    %269 = arith.divf %267, %268 : vector<1x32xf32>
    %270 = vector.extract_strided_slice %257 {offsets = [0, 64], sizes = [1, 32], strides = [1, 1]} : vector<1x128xf32> to vector<1x32xf32>
    %271 = math.tanh %270 : vector<1x32xf32>
    %272 = vector.extract_strided_slice %257 {offsets = [0, 96], sizes = [1, 32], strides = [1, 1]} : vector<1x128xf32> to vector<1x32xf32>
    %273 = arith.negf %272 : vector<1x32xf32>
    %274 = math.exp %273 : vector<1x32xf32>
    %cst_81 = arith.constant 1.000000e+00 : f32
    %275 = vector.broadcast %cst_81 : f32 to vector<1x32xf32>
    %276 = arith.addf %275, %274 : vector<1x32xf32>
    %277 = arith.divf %275, %276 : vector<1x32xf32>
    %278 = arith.mulf %269, %215 : vector<1x32xf32>
    %279 = arith.mulf %263, %271 : vector<1x32xf32>
    %280 = arith.addf %278, %279 : vector<1x32xf32>
    %281 = math.tanh %280 : vector<1x32xf32>
    %282 = arith.mulf %277, %281 : vector<1x32xf32>
    %283 = arith.index_cast %252 : i32 to index
    %c128_82 = arith.constant 128 : index
    %284 = vector.load %arg20[%283, %c128_82] : memref<8x256xf32, #tpu.memory_space<vmem>>, vector<1x128xf32>
    %285 = arith.truncf %247 : vector<1x32xf32> to vector<1x32xbf16>
    %cst_83 = arith.constant dense<0.000000e+00> : vector<1x128xf32>
    %286 = tpu.matmul %285, %55, %cst_83 {dimension_numbers = #tpu.dot_dimension_numbers<[1], [0], [0], [1], [0, 0, 1, 1], [], []>} : vector<1x32xbf16>, vector<32x128xbf16>, vector<1x128xf32> -> vector<1x128xf32>
    %287 = arith.addf %284, %286 : vector<1x128xf32>
    %288 = vector.extract_strided_slice %287 {offsets = [0, 0], sizes = [1, 32], strides = [1, 1]} : vector<1x128xf32> to vector<1x32xf32>
    %289 = arith.negf %288 : vector<1x32xf32>
    %290 = math.exp %289 : vector<1x32xf32>
    %cst_84 = arith.constant 1.000000e+00 : f32
    %291 = vector.broadcast %cst_84 : f32 to vector<1x32xf32>
    %292 = arith.addf %291, %290 : vector<1x32xf32>
    %293 = arith.divf %291, %292 : vector<1x32xf32>
    %294 = vector.extract_strided_slice %287 {offsets = [0, 32], sizes = [1, 32], strides = [1, 1]} : vector<1x128xf32> to vector<1x32xf32>
    %295 = arith.negf %294 : vector<1x32xf32>
    %296 = math.exp %295 : vector<1x32xf32>
    %cst_85 = arith.constant 1.000000e+00 : f32
    %297 = vector.broadcast %cst_85 : f32 to vector<1x32xf32>
    %298 = arith.addf %297, %296 : vector<1x32xf32>
    %299 = arith.divf %297, %298 : vector<1x32xf32>
    %300 = vector.extract_strided_slice %287 {offsets = [0, 64], sizes = [1, 32], strides = [1, 1]} : vector<1x128xf32> to vector<1x32xf32>
    %301 = math.tanh %300 : vector<1x32xf32>
    %302 = vector.extract_strided_slice %287 {offsets = [0, 96], sizes = [1, 32], strides = [1, 1]} : vector<1x128xf32> to vector<1x32xf32>
    %303 = arith.negf %302 : vector<1x32xf32>
    %304 = math.exp %303 : vector<1x32xf32>
    %cst_86 = arith.constant 1.000000e+00 : f32
    %305 = vector.broadcast %cst_86 : f32 to vector<1x32xf32>
    %306 = arith.addf %305, %304 : vector<1x32xf32>
    %307 = arith.divf %305, %306 : vector<1x32xf32>
    %308 = arith.mulf %299, %245 : vector<1x32xf32>
    %309 = arith.mulf %293, %301 : vector<1x32xf32>
    %310 = arith.addf %308, %309 : vector<1x32xf32>
    %311 = math.tanh %310 : vector<1x32xf32>
    %312 = arith.mulf %307, %311 : vector<1x32xf32>
    %313 = arith.index_cast %c3_i32 : i32 to index
    %c0_87 = arith.constant 0 : index
    %314 = vector.load %arg21[%313, %c0_87] : memref<8x32xf32, #tpu.memory_space<vmem>>, vector<1x32xf32>
    tpu.vector_store %arg21[%313, %c0_87], %282 {strides = array<i32>} : memref<8x32xf32, #tpu.memory_space<vmem>>, vector<1x32xf32>,
    %315 = arith.index_cast %252 : i32 to index
    %c0_88 = arith.constant 0 : index
    %316 = vector.load %arg22[%315, %c0_88] : memref<8x32xf32, #tpu.memory_space<vmem>>, vector<1x32xf32>
    tpu.vector_store %arg22[%315, %c0_88], %312 {strides = array<i32>} : memref<8x32xf32, #tpu.memory_space<vmem>>, vector<1x32xf32>,
    %c4_i32 = arith.constant 4 : i32
    %c7_i32_89 = arith.constant 7 : i32
    %317 = arith.subi %c7_i32_89, %c4_i32 : i32
    %318 = arith.index_cast %c4_i32 : i32 to index
    %c0_90 = arith.constant 0 : index
    %319 = vector.load %arg20[%318, %c0_90] : memref<8x256xf32, #tpu.memory_space<vmem>>, vector<1x128xf32>
    %320 = arith.truncf %282 : vector<1x32xf32> to vector<1x32xbf16>
    %cst_91 = arith.constant dense<0.000000e+00> : vector<1x128xf32>
    %321 = tpu.matmul %320, %54, %cst_91 {dimension_numbers = #tpu.dot_dimension_numbers<[1], [0], [0], [1], [0, 0, 1, 1], [], []>} : vector<1x32xbf16>, vector<32x128xbf16>, vector<1x128xf32> -> vector<1x128xf32>
    %322 = arith.addf %319, %321 : vector<1x128xf32>
    %323 = vector.extract_strided_slice %322 {offsets = [0, 0], sizes = [1, 32], strides = [1, 1]} : vector<1x128xf32> to vector<1x32xf32>
    %324 = arith.negf %323 : vector<1x32xf32>
    %325 = math.exp %324 : vector<1x32xf32>
    %cst_92 = arith.constant 1.000000e+00 : f32
    %326 = vector.broadcast %cst_92 : f32 to vector<1x32xf32>
    %327 = arith.addf %326, %325 : vector<1x32xf32>
    %328 = arith.divf %326, %327 : vector<1x32xf32>
    %329 = vector.extract_strided_slice %322 {offsets = [0, 32], sizes = [1, 32], strides = [1, 1]} : vector<1x128xf32> to vector<1x32xf32>
    %330 = arith.negf %329 : vector<1x32xf32>
    %331 = math.exp %330 : vector<1x32xf32>
    %cst_93 = arith.constant 1.000000e+00 : f32
    %332 = vector.broadcast %cst_93 : f32 to vector<1x32xf32>
    %333 = arith.addf %332, %331 : vector<1x32xf32>
    %334 = arith.divf %332, %333 : vector<1x32xf32>
    %335 = vector.extract_strided_slice %322 {offsets = [0, 64], sizes = [1, 32], strides = [1, 1]} : vector<1x128xf32> to vector<1x32xf32>
    %336 = math.tanh %335 : vector<1x32xf32>
    %337 = vector.extract_strided_slice %322 {offsets = [0, 96], sizes = [1, 32], strides = [1, 1]} : vector<1x128xf32> to vector<1x32xf32>
    %338 = arith.negf %337 : vector<1x32xf32>
    %339 = math.exp %338 : vector<1x32xf32>
    %cst_94 = arith.constant 1.000000e+00 : f32
    %340 = vector.broadcast %cst_94 : f32 to vector<1x32xf32>
    %341 = arith.addf %340, %339 : vector<1x32xf32>
    %342 = arith.divf %340, %341 : vector<1x32xf32>
    %343 = arith.mulf %334, %280 : vector<1x32xf32>
    %344 = arith.mulf %328, %336 : vector<1x32xf32>
    %345 = arith.addf %343, %344 : vector<1x32xf32>
    %346 = math.tanh %345 : vector<1x32xf32>
    %347 = arith.mulf %342, %346 : vector<1x32xf32>
    %348 = arith.index_cast %317 : i32 to index
    %c128_95 = arith.constant 128 : index
    %349 = vector.load %arg20[%348, %c128_95] : memref<8x256xf32, #tpu.memory_space<vmem>>, vector<1x128xf32>
    %350 = arith.truncf %312 : vector<1x32xf32> to vector<1x32xbf16>
    %cst_96 = arith.constant dense<0.000000e+00> : vector<1x128xf32>
    %351 = tpu.matmul %350, %55, %cst_96 {dimension_numbers = #tpu.dot_dimension_numbers<[1], [0], [0], [1], [0, 0, 1, 1], [], []>} : vector<1x32xbf16>, vector<32x128xbf16>, vector<1x128xf32> -> vector<1x128xf32>
    %352 = arith.addf %349, %351 : vector<1x128xf32>
    %353 = vector.extract_strided_slice %352 {offsets = [0, 0], sizes = [1, 32], strides = [1, 1]} : vector<1x128xf32> to vector<1x32xf32>
    %354 = arith.negf %353 : vector<1x32xf32>
    %355 = math.exp %354 : vector<1x32xf32>
    %cst_97 = arith.constant 1.000000e+00 : f32
    %356 = vector.broadcast %cst_97 : f32 to vector<1x32xf32>
    %357 = arith.addf %356, %355 : vector<1x32xf32>
    %358 = arith.divf %356, %357 : vector<1x32xf32>
    %359 = vector.extract_strided_slice %352 {offsets = [0, 32], sizes = [1, 32], strides = [1, 1]} : vector<1x128xf32> to vector<1x32xf32>
    %360 = arith.negf %359 : vector<1x32xf32>
    %361 = math.exp %360 : vector<1x32xf32>
    %cst_98 = arith.constant 1.000000e+00 : f32
    %362 = vector.broadcast %cst_98 : f32 to vector<1x32xf32>
    %363 = arith.addf %362, %361 : vector<1x32xf32>
    %364 = arith.divf %362, %363 : vector<1x32xf32>
    %365 = vector.extract_strided_slice %352 {offsets = [0, 64], sizes = [1, 32], strides = [1, 1]} : vector<1x128xf32> to vector<1x32xf32>
    %366 = math.tanh %365 : vector<1x32xf32>
    %367 = vector.extract_strided_slice %352 {offsets = [0, 96], sizes = [1, 32], strides = [1, 1]} : vector<1x128xf32> to vector<1x32xf32>
    %368 = arith.negf %367 : vector<1x32xf32>
    %369 = math.exp %368 : vector<1x32xf32>
    %cst_99 = arith.constant 1.000000e+00 : f32
    %370 = vector.broadcast %cst_99 : f32 to vector<1x32xf32>
    %371 = arith.addf %370, %369 : vector<1x32xf32>
    %372 = arith.divf %370, %371 : vector<1x32xf32>
    %373 = arith.mulf %364, %310 : vector<1x32xf32>
    %374 = arith.mulf %358, %366 : vector<1x32xf32>
    %375 = arith.addf %373, %374 : vector<1x32xf32>
    %376 = math.tanh %375 : vector<1x32xf32>
    %377 = arith.mulf %372, %376 : vector<1x32xf32>
    %378 = arith.index_cast %c4_i32 : i32 to index
    %c0_100 = arith.constant 0 : index
    %379 = vector.load %arg21[%378, %c0_100] : memref<8x32xf32, #tpu.memory_space<vmem>>, vector<1x32xf32>
    tpu.vector_store %arg21[%378, %c0_100], %347 {strides = array<i32>} : memref<8x32xf32, #tpu.memory_space<vmem>>, vector<1x32xf32>,
    %380 = arith.index_cast %317 : i32 to index
    %c0_101 = arith.constant 0 : index
    %381 = vector.load %arg22[%380, %c0_101] : memref<8x32xf32, #tpu.memory_space<vmem>>, vector<1x32xf32>
    tpu.vector_store %arg22[%380, %c0_101], %377 {strides = array<i32>} : memref<8x32xf32, #tpu.memory_space<vmem>>, vector<1x32xf32>,
    %c5_i32 = arith.constant 5 : i32
    %c7_i32_102 = arith.constant 7 : i32
    %382 = arith.subi %c7_i32_102, %c5_i32 : i32
    %383 = arith.index_cast %c5_i32 : i32 to index
    %c0_103 = arith.constant 0 : index
    %384 = vector.load %arg20[%383, %c0_103] : memref<8x256xf32, #tpu.memory_space<vmem>>, vector<1x128xf32>
    %385 = arith.truncf %347 : vector<1x32xf32> to vector<1x32xbf16>
    %cst_104 = arith.constant dense<0.000000e+00> : vector<1x128xf32>
    %386 = tpu.matmul %385, %54, %cst_104 {dimension_numbers = #tpu.dot_dimension_numbers<[1], [0], [0], [1], [0, 0, 1, 1], [], []>} : vector<1x32xbf16>, vector<32x128xbf16>, vector<1x128xf32> -> vector<1x128xf32>
    %387 = arith.addf %384, %386 : vector<1x128xf32>
    %388 = vector.extract_strided_slice %387 {offsets = [0, 0], sizes = [1, 32], strides = [1, 1]} : vector<1x128xf32> to vector<1x32xf32>
    %389 = arith.negf %388 : vector<1x32xf32>
    %390 = math.exp %389 : vector<1x32xf32>
    %cst_105 = arith.constant 1.000000e+00 : f32
    %391 = vector.broadcast %cst_105 : f32 to vector<1x32xf32>
    %392 = arith.addf %391, %390 : vector<1x32xf32>
    %393 = arith.divf %391, %392 : vector<1x32xf32>
    %394 = vector.extract_strided_slice %387 {offsets = [0, 32], sizes = [1, 32], strides = [1, 1]} : vector<1x128xf32> to vector<1x32xf32>
    %395 = arith.negf %394 : vector<1x32xf32>
    %396 = math.exp %395 : vector<1x32xf32>
    %cst_106 = arith.constant 1.000000e+00 : f32
    %397 = vector.broadcast %cst_106 : f32 to vector<1x32xf32>
    %398 = arith.addf %397, %396 : vector<1x32xf32>
    %399 = arith.divf %397, %398 : vector<1x32xf32>
    %400 = vector.extract_strided_slice %387 {offsets = [0, 64], sizes = [1, 32], strides = [1, 1]} : vector<1x128xf32> to vector<1x32xf32>
    %401 = math.tanh %400 : vector<1x32xf32>
    %402 = vector.extract_strided_slice %387 {offsets = [0, 96], sizes = [1, 32], strides = [1, 1]} : vector<1x128xf32> to vector<1x32xf32>
    %403 = arith.negf %402 : vector<1x32xf32>
    %404 = math.exp %403 : vector<1x32xf32>
    %cst_107 = arith.constant 1.000000e+00 : f32
    %405 = vector.broadcast %cst_107 : f32 to vector<1x32xf32>
    %406 = arith.addf %405, %404 : vector<1x32xf32>
    %407 = arith.divf %405, %406 : vector<1x32xf32>
    %408 = arith.mulf %399, %345 : vector<1x32xf32>
    %409 = arith.mulf %393, %401 : vector<1x32xf32>
    %410 = arith.addf %408, %409 : vector<1x32xf32>
    %411 = math.tanh %410 : vector<1x32xf32>
    %412 = arith.mulf %407, %411 : vector<1x32xf32>
    %413 = arith.index_cast %382 : i32 to index
    %c128_108 = arith.constant 128 : index
    %414 = vector.load %arg20[%413, %c128_108] : memref<8x256xf32, #tpu.memory_space<vmem>>, vector<1x128xf32>
    %415 = arith.truncf %377 : vector<1x32xf32> to vector<1x32xbf16>
    %cst_109 = arith.constant dense<0.000000e+00> : vector<1x128xf32>
    %416 = tpu.matmul %415, %55, %cst_109 {dimension_numbers = #tpu.dot_dimension_numbers<[1], [0], [0], [1], [0, 0, 1, 1], [], []>} : vector<1x32xbf16>, vector<32x128xbf16>, vector<1x128xf32> -> vector<1x128xf32>
    %417 = arith.addf %414, %416 : vector<1x128xf32>
    %418 = vector.extract_strided_slice %417 {offsets = [0, 0], sizes = [1, 32], strides = [1, 1]} : vector<1x128xf32> to vector<1x32xf32>
    %419 = arith.negf %418 : vector<1x32xf32>
    %420 = math.exp %419 : vector<1x32xf32>
    %cst_110 = arith.constant 1.000000e+00 : f32
    %421 = vector.broadcast %cst_110 : f32 to vector<1x32xf32>
    %422 = arith.addf %421, %420 : vector<1x32xf32>
    %423 = arith.divf %421, %422 : vector<1x32xf32>
    %424 = vector.extract_strided_slice %417 {offsets = [0, 32], sizes = [1, 32], strides = [1, 1]} : vector<1x128xf32> to vector<1x32xf32>
    %425 = arith.negf %424 : vector<1x32xf32>
    %426 = math.exp %425 : vector<1x32xf32>
    %cst_111 = arith.constant 1.000000e+00 : f32
    %427 = vector.broadcast %cst_111 : f32 to vector<1x32xf32>
    %428 = arith.addf %427, %426 : vector<1x32xf32>
    %429 = arith.divf %427, %428 : vector<1x32xf32>
    %430 = vector.extract_strided_slice %417 {offsets = [0, 64], sizes = [1, 32], strides = [1, 1]} : vector<1x128xf32> to vector<1x32xf32>
    %431 = math.tanh %430 : vector<1x32xf32>
    %432 = vector.extract_strided_slice %417 {offsets = [0, 96], sizes = [1, 32], strides = [1, 1]} : vector<1x128xf32> to vector<1x32xf32>
    %433 = arith.negf %432 : vector<1x32xf32>
    %434 = math.exp %433 : vector<1x32xf32>
    %cst_112 = arith.constant 1.000000e+00 : f32
    %435 = vector.broadcast %cst_112 : f32 to vector<1x32xf32>
    %436 = arith.addf %435, %434 : vector<1x32xf32>
    %437 = arith.divf %435, %436 : vector<1x32xf32>
    %438 = arith.mulf %429, %375 : vector<1x32xf32>
    %439 = arith.mulf %423, %431 : vector<1x32xf32>
    %440 = arith.addf %438, %439 : vector<1x32xf32>
    %441 = math.tanh %440 : vector<1x32xf32>
    %442 = arith.mulf %437, %441 : vector<1x32xf32>
    %443 = arith.index_cast %c5_i32 : i32 to index
    %c0_113 = arith.constant 0 : index
    %444 = vector.load %arg21[%443, %c0_113] : memref<8x32xf32, #tpu.memory_space<vmem>>, vector<1x32xf32>
    tpu.vector_store %arg21[%443, %c0_113], %412 {strides = array<i32>} : memref<8x32xf32, #tpu.memory_space<vmem>>, vector<1x32xf32>,
    %445 = arith.index_cast %382 : i32 to index
    %c0_114 = arith.constant 0 : index
    %446 = vector.load %arg22[%445, %c0_114] : memref<8x32xf32, #tpu.memory_space<vmem>>, vector<1x32xf32>
    tpu.vector_store %arg22[%445, %c0_114], %442 {strides = array<i32>} : memref<8x32xf32, #tpu.memory_space<vmem>>, vector<1x32xf32>,
    %c6_i32 = arith.constant 6 : i32
    %c7_i32_115 = arith.constant 7 : i32
    %447 = arith.subi %c7_i32_115, %c6_i32 : i32
    %448 = arith.index_cast %c6_i32 : i32 to index
    %c0_116 = arith.constant 0 : index
    %449 = vector.load %arg20[%448, %c0_116] : memref<8x256xf32, #tpu.memory_space<vmem>>, vector<1x128xf32>
    %450 = arith.truncf %412 : vector<1x32xf32> to vector<1x32xbf16>
    %cst_117 = arith.constant dense<0.000000e+00> : vector<1x128xf32>
    %451 = tpu.matmul %450, %54, %cst_117 {dimension_numbers = #tpu.dot_dimension_numbers<[1], [0], [0], [1], [0, 0, 1, 1], [], []>} : vector<1x32xbf16>, vector<32x128xbf16>, vector<1x128xf32> -> vector<1x128xf32>
    %452 = arith.addf %449, %451 : vector<1x128xf32>
    %453 = vector.extract_strided_slice %452 {offsets = [0, 0], sizes = [1, 32], strides = [1, 1]} : vector<1x128xf32> to vector<1x32xf32>
    %454 = arith.negf %453 : vector<1x32xf32>
    %455 = math.exp %454 : vector<1x32xf32>
    %cst_118 = arith.constant 1.000000e+00 : f32
    %456 = vector.broadcast %cst_118 : f32 to vector<1x32xf32>
    %457 = arith.addf %456, %455 : vector<1x32xf32>
    %458 = arith.divf %456, %457 : vector<1x32xf32>
    %459 = vector.extract_strided_slice %452 {offsets = [0, 32], sizes = [1, 32], strides = [1, 1]} : vector<1x128xf32> to vector<1x32xf32>
    %460 = arith.negf %459 : vector<1x32xf32>
    %461 = math.exp %460 : vector<1x32xf32>
    %cst_119 = arith.constant 1.000000e+00 : f32
    %462 = vector.broadcast %cst_119 : f32 to vector<1x32xf32>
    %463 = arith.addf %462, %461 : vector<1x32xf32>
    %464 = arith.divf %462, %463 : vector<1x32xf32>
    %465 = vector.extract_strided_slice %452 {offsets = [0, 64], sizes = [1, 32], strides = [1, 1]} : vector<1x128xf32> to vector<1x32xf32>
    %466 = math.tanh %465 : vector<1x32xf32>
    %467 = vector.extract_strided_slice %452 {offsets = [0, 96], sizes = [1, 32], strides = [1, 1]} : vector<1x128xf32> to vector<1x32xf32>
    %468 = arith.negf %467 : vector<1x32xf32>
    %469 = math.exp %468 : vector<1x32xf32>
    %cst_120 = arith.constant 1.000000e+00 : f32
    %470 = vector.broadcast %cst_120 : f32 to vector<1x32xf32>
    %471 = arith.addf %470, %469 : vector<1x32xf32>
    %472 = arith.divf %470, %471 : vector<1x32xf32>
    %473 = arith.mulf %464, %410 : vector<1x32xf32>
    %474 = arith.mulf %458, %466 : vector<1x32xf32>
    %475 = arith.addf %473, %474 : vector<1x32xf32>
    %476 = math.tanh %475 : vector<1x32xf32>
    %477 = arith.mulf %472, %476 : vector<1x32xf32>
    %478 = arith.index_cast %447 : i32 to index
    %c128_121 = arith.constant 128 : index
    %479 = vector.load %arg20[%478, %c128_121] : memref<8x256xf32, #tpu.memory_space<vmem>>, vector<1x128xf32>
    %480 = arith.truncf %442 : vector<1x32xf32> to vector<1x32xbf16>
    %cst_122 = arith.constant dense<0.000000e+00> : vector<1x128xf32>
    %481 = tpu.matmul %480, %55, %cst_122 {dimension_numbers = #tpu.dot_dimension_numbers<[1], [0], [0], [1], [0, 0, 1, 1], [], []>} : vector<1x32xbf16>, vector<32x128xbf16>, vector<1x128xf32> -> vector<1x128xf32>
    %482 = arith.addf %479, %481 : vector<1x128xf32>
    %483 = vector.extract_strided_slice %482 {offsets = [0, 0], sizes = [1, 32], strides = [1, 1]} : vector<1x128xf32> to vector<1x32xf32>
    %484 = arith.negf %483 : vector<1x32xf32>
    %485 = math.exp %484 : vector<1x32xf32>
    %cst_123 = arith.constant 1.000000e+00 : f32
    %486 = vector.broadcast %cst_123 : f32 to vector<1x32xf32>
    %487 = arith.addf %486, %485 : vector<1x32xf32>
    %488 = arith.divf %486, %487 : vector<1x32xf32>
    %489 = vector.extract_strided_slice %482 {offsets = [0, 32], sizes = [1, 32], strides = [1, 1]} : vector<1x128xf32> to vector<1x32xf32>
    %490 = arith.negf %489 : vector<1x32xf32>
    %491 = math.exp %490 : vector<1x32xf32>
    %cst_124 = arith.constant 1.000000e+00 : f32
    %492 = vector.broadcast %cst_124 : f32 to vector<1x32xf32>
    %493 = arith.addf %492, %491 : vector<1x32xf32>
    %494 = arith.divf %492, %493 : vector<1x32xf32>
    %495 = vector.extract_strided_slice %482 {offsets = [0, 64], sizes = [1, 32], strides = [1, 1]} : vector<1x128xf32> to vector<1x32xf32>
    %496 = math.tanh %495 : vector<1x32xf32>
    %497 = vector.extract_strided_slice %482 {offsets = [0, 96], sizes = [1, 32], strides = [1, 1]} : vector<1x128xf32> to vector<1x32xf32>
    %498 = arith.negf %497 : vector<1x32xf32>
    %499 = math.exp %498 : vector<1x32xf32>
    %cst_125 = arith.constant 1.000000e+00 : f32
    %500 = vector.broadcast %cst_125 : f32 to vector<1x32xf32>
    %501 = arith.addf %500, %499 : vector<1x32xf32>
    %502 = arith.divf %500, %501 : vector<1x32xf32>
    %503 = arith.mulf %494, %440 : vector<1x32xf32>
    %504 = arith.mulf %488, %496 : vector<1x32xf32>
    %505 = arith.addf %503, %504 : vector<1x32xf32>
    %506 = math.tanh %505 : vector<1x32xf32>
    %507 = arith.mulf %502, %506 : vector<1x32xf32>
    %508 = arith.index_cast %c6_i32 : i32 to index
    %c0_126 = arith.constant 0 : index
    %509 = vector.load %arg21[%508, %c0_126] : memref<8x32xf32, #tpu.memory_space<vmem>>, vector<1x32xf32>
    tpu.vector_store %arg21[%508, %c0_126], %477 {strides = array<i32>} : memref<8x32xf32, #tpu.memory_space<vmem>>, vector<1x32xf32>,
    %510 = arith.index_cast %447 : i32 to index
    %c0_127 = arith.constant 0 : index
    %511 = vector.load %arg22[%510, %c0_127] : memref<8x32xf32, #tpu.memory_space<vmem>>, vector<1x32xf32>
    tpu.vector_store %arg22[%510, %c0_127], %507 {strides = array<i32>} : memref<8x32xf32, #tpu.memory_space<vmem>>, vector<1x32xf32>,
    %c7_i32_128 = arith.constant 7 : i32
    %c7_i32_129 = arith.constant 7 : i32
    %512 = arith.subi %c7_i32_129, %c7_i32_128 : i32
    %513 = arith.index_cast %c7_i32_128 : i32 to index
    %c0_130 = arith.constant 0 : index
    %514 = vector.load %arg20[%513, %c0_130] : memref<8x256xf32, #tpu.memory_space<vmem>>, vector<1x128xf32>
    %515 = arith.truncf %477 : vector<1x32xf32> to vector<1x32xbf16>
    %cst_131 = arith.constant dense<0.000000e+00> : vector<1x128xf32>
    %516 = tpu.matmul %515, %54, %cst_131 {dimension_numbers = #tpu.dot_dimension_numbers<[1], [0], [0], [1], [0, 0, 1, 1], [], []>} : vector<1x32xbf16>, vector<32x128xbf16>, vector<1x128xf32> -> vector<1x128xf32>
    %517 = arith.addf %514, %516 : vector<1x128xf32>
    %518 = vector.extract_strided_slice %517 {offsets = [0, 0], sizes = [1, 32], strides = [1, 1]} : vector<1x128xf32> to vector<1x32xf32>
    %519 = arith.negf %518 : vector<1x32xf32>
    %520 = math.exp %519 : vector<1x32xf32>
    %cst_132 = arith.constant 1.000000e+00 : f32
    %521 = vector.broadcast %cst_132 : f32 to vector<1x32xf32>
    %522 = arith.addf %521, %520 : vector<1x32xf32>
    %523 = arith.divf %521, %522 : vector<1x32xf32>
    %524 = vector.extract_strided_slice %517 {offsets = [0, 32], sizes = [1, 32], strides = [1, 1]} : vector<1x128xf32> to vector<1x32xf32>
    %525 = arith.negf %524 : vector<1x32xf32>
    %526 = math.exp %525 : vector<1x32xf32>
    %cst_133 = arith.constant 1.000000e+00 : f32
    %527 = vector.broadcast %cst_133 : f32 to vector<1x32xf32>
    %528 = arith.addf %527, %526 : vector<1x32xf32>
    %529 = arith.divf %527, %528 : vector<1x32xf32>
    %530 = vector.extract_strided_slice %517 {offsets = [0, 64], sizes = [1, 32], strides = [1, 1]} : vector<1x128xf32> to vector<1x32xf32>
    %531 = math.tanh %530 : vector<1x32xf32>
    %532 = vector.extract_strided_slice %517 {offsets = [0, 96], sizes = [1, 32], strides = [1, 1]} : vector<1x128xf32> to vector<1x32xf32>
    %533 = arith.negf %532 : vector<1x32xf32>
    %534 = math.exp %533 : vector<1x32xf32>
    %cst_134 = arith.constant 1.000000e+00 : f32
    %535 = vector.broadcast %cst_134 : f32 to vector<1x32xf32>
    %536 = arith.addf %535, %534 : vector<1x32xf32>
    %537 = arith.divf %535, %536 : vector<1x32xf32>
    %538 = arith.mulf %529, %475 : vector<1x32xf32>
    %539 = arith.mulf %523, %531 : vector<1x32xf32>
    %540 = arith.addf %538, %539 : vector<1x32xf32>
    %541 = math.tanh %540 : vector<1x32xf32>
    %542 = arith.mulf %537, %541 : vector<1x32xf32>
    %543 = arith.index_cast %512 : i32 to index
    %c128_135 = arith.constant 128 : index
    %544 = vector.load %arg20[%543, %c128_135] : memref<8x256xf32, #tpu.memory_space<vmem>>, vector<1x128xf32>
    %545 = arith.truncf %507 : vector<1x32xf32> to vector<1x32xbf16>
    %cst_136 = arith.constant dense<0.000000e+00> : vector<1x128xf32>
    %546 = tpu.matmul %545, %55, %cst_136 {dimension_numbers = #tpu.dot_dimension_numbers<[1], [0], [0], [1], [0, 0, 1, 1], [], []>} : vector<1x32xbf16>, vector<32x128xbf16>, vector<1x128xf32> -> vector<1x128xf32>
    %547 = arith.addf %544, %546 : vector<1x128xf32>
    %548 = vector.extract_strided_slice %547 {offsets = [0, 0], sizes = [1, 32], strides = [1, 1]} : vector<1x128xf32> to vector<1x32xf32>
    %549 = arith.negf %548 : vector<1x32xf32>
    %550 = math.exp %549 : vector<1x32xf32>
    %cst_137 = arith.constant 1.000000e+00 : f32
    %551 = vector.broadcast %cst_137 : f32 to vector<1x32xf32>
    %552 = arith.addf %551, %550 : vector<1x32xf32>
    %553 = arith.divf %551, %552 : vector<1x32xf32>
    %554 = vector.extract_strided_slice %547 {offsets = [0, 32], sizes = [1, 32], strides = [1, 1]} : vector<1x128xf32> to vector<1x32xf32>
    %555 = arith.negf %554 : vector<1x32xf32>
    %556 = math.exp %555 : vector<1x32xf32>
    %cst_138 = arith.constant 1.000000e+00 : f32
    %557 = vector.broadcast %cst_138 : f32 to vector<1x32xf32>
    %558 = arith.addf %557, %556 : vector<1x32xf32>
    %559 = arith.divf %557, %558 : vector<1x32xf32>
    %560 = vector.extract_strided_slice %547 {offsets = [0, 64], sizes = [1, 32], strides = [1, 1]} : vector<1x128xf32> to vector<1x32xf32>
    %561 = math.tanh %560 : vector<1x32xf32>
    %562 = vector.extract_strided_slice %547 {offsets = [0, 96], sizes = [1, 32], strides = [1, 1]} : vector<1x128xf32> to vector<1x32xf32>
    %563 = arith.negf %562 : vector<1x32xf32>
    %564 = math.exp %563 : vector<1x32xf32>
    %cst_139 = arith.constant 1.000000e+00 : f32
    %565 = vector.broadcast %cst_139 : f32 to vector<1x32xf32>
    %566 = arith.addf %565, %564 : vector<1x32xf32>
    %567 = arith.divf %565, %566 : vector<1x32xf32>
    %568 = arith.mulf %559, %505 : vector<1x32xf32>
    %569 = arith.mulf %553, %561 : vector<1x32xf32>
    %570 = arith.addf %568, %569 : vector<1x32xf32>
    %571 = math.tanh %570 : vector<1x32xf32>
    %572 = arith.mulf %567, %571 : vector<1x32xf32>
    %573 = arith.index_cast %c7_i32_128 : i32 to index
    %c0_140 = arith.constant 0 : index
    %574 = vector.load %arg21[%573, %c0_140] : memref<8x32xf32, #tpu.memory_space<vmem>>, vector<1x32xf32>
    tpu.vector_store %arg21[%573, %c0_140], %542 {strides = array<i32>} : memref<8x32xf32, #tpu.memory_space<vmem>>, vector<1x32xf32>,
    %575 = arith.index_cast %512 : i32 to index
    %c0_141 = arith.constant 0 : index
    %576 = vector.load %arg22[%575, %c0_141] : memref<8x32xf32, #tpu.memory_space<vmem>>, vector<1x32xf32>
    tpu.vector_store %arg22[%575, %c0_141], %572 {strides = array<i32>} : memref<8x32xf32, #tpu.memory_space<vmem>>, vector<1x32xf32>,
    %c8_i32 = arith.constant 8 : i32
    %c0_142 = arith.constant 0 : index
    %c0_143 = arith.constant 0 : index
    %577 = vector.load %arg21[%c0_142, %c0_143] : memref<8x32xf32, #tpu.memory_space<vmem>>, vector<8x32xf32>
    %578 = arith.truncf %577 : vector<8x32xf32> to vector<8x32xbf16>
    %c0_144 = arith.constant 0 : index
    %c0_145 = arith.constant 0 : index
    %579 = vector.load %arg13[%c0_144, %c0_145] : memref<32x128xbf16, #tpu.memory_space<vmem>>, vector<32x128xbf16>
    %cst_146 = arith.constant dense<0.000000e+00> : vector<8x128xf32>
    %580 = tpu.matmul %578, %579, %cst_146 {dimension_numbers = #tpu.dot_dimension_numbers<[1], [0], [0], [1], [0, 0, 1, 1], [], []>} : vector<8x32xbf16>, vector<32x128xbf16>, vector<8x128xf32> -> vector<8x128xf32>
    %c0_147 = arith.constant 0 : index
    %c0_148 = arith.constant 0 : index
    %581 = vector.load %arg22[%c0_147, %c0_148] : memref<8x32xf32, #tpu.memory_space<vmem>>, vector<8x32xf32>
    %582 = arith.truncf %581 : vector<8x32xf32> to vector<8x32xbf16>
    %c0_149 = arith.constant 0 : index
    %c0_150 = arith.constant 0 : index
    %583 = vector.load %arg14[%c0_149, %c0_150] : memref<32x128xbf16, #tpu.memory_space<vmem>>, vector<32x128xbf16>
    %cst_151 = arith.constant dense<0.000000e+00> : vector<8x128xf32>
    %584 = tpu.matmul %582, %583, %cst_151 {dimension_numbers = #tpu.dot_dimension_numbers<[1], [0], [0], [1], [0, 0, 1, 1], [], []>} : vector<8x32xbf16>, vector<32x128xbf16>, vector<8x128xf32> -> vector<8x128xf32>
    %585 = arith.addf %580, %584 : vector<8x128xf32>
    %c0_152 = arith.constant 0 : index
    %c0_153 = arith.constant 0 : index
    %586 = vector.load %arg15[%c0_152, %c0_153] : memref<1x128xf32, #tpu.memory_space<vmem>>, vector<1x128xf32>
    %587 = vector.broadcast %586 : vector<1x128xf32> to vector<8x128xf32>
    %588 = arith.addf %585, %587 : vector<8x128xf32>
    %c0_154 = arith.constant 0 : index
    %c0_155 = arith.constant 0 : index
    %589 = vector.load %arg23[%c0_154, %c0_155] : memref<8x128xf32, #tpu.memory_space<vmem>>, vector<8x128xf32>
    tpu.vector_store %arg23[%c0_154, %c0_155], %588 {strides = array<i32>} : memref<8x128xf32, #tpu.memory_space<vmem>>, vector<8x128xf32>,
    %c0_156 = arith.constant 0 : index
    %c0_157 = arith.constant 0 : index
    %590 = vector.load %arg18[%c0_156, %c0_157] : memref<8x128xf32, #tpu.memory_space<vmem>>, vector<8x128xf32>
    %591 = tpu.iota {dimensions = array<i32: 1>} : vector<1x8x128xi32>
    %592 = tpu.iota {dimensions = array<i32: 1>} : vector<1x128xi32>
    %c0_158 = arith.constant 0 : index
    %c0_159 = arith.constant 0 : index
    %593 = vector.load %arg16[%c0_158, %c0_159] : memref<1x128xf32, #tpu.memory_space<vmem>>, vector<1x128xf32>
    %c0_160 = arith.constant 0 : index
    %c0_161 = arith.constant 0 : index
    %594 = vector.load %arg23[%c0_160, %c0_161] : memref<8x128xf32, #tpu.memory_space<vmem>>, vector<1x128xf32>
    %595 = arith.addf %593, %594 : vector<1x128xf32>
    %c1_i32_162 = arith.constant 1 : i32
    %596 = vector.extract_strided_slice %595 {offsets = [0, 0], sizes = [1, 8], strides = [1, 1]} : vector<1x128xf32> to vector<1x8xf32>
    %597 = vector.shape_cast %596 : vector<1x8xf32> to vector<1x8x1xf32>
    %598 = vector.shape_cast %590 : vector<8x128xf32> to vector<1x8x128xf32>
    %599 = vector.broadcast %597 : vector<1x8x1xf32> to vector<1x8x128xf32>
    %600 = arith.addf %599, %598 : vector<1x8x128xf32>
    %cst_163 = arith.constant dense<0xFF800000> : vector<1x128xf32>
    %601 = vector.multi_reduction <maximumf>, %600, %cst_163 [1] : vector<1x8x128xf32> to vector<1x128xf32>
    %602 = vector.shape_cast %601 : vector<1x128xf32> to vector<1x1x128xf32>
    %603 = vector.broadcast %602 : vector<1x1x128xf32> to vector<1x8x128xf32>
    %604 = arith.cmpf oeq, %600, %603 : vector<1x8x128xf32>
    %c8_i32_164 = arith.constant 8 : i32
    %605 = vector.broadcast %c8_i32_164 : i32 to vector<1x8x128xi32>
    %606 = arith.select %604, %591, %605 : vector<1x8x128xi1>, vector<1x8x128xi32>
    %cst_165 = arith.constant dense<2147483647> : vector<1x128xi32>
    %607 = vector.multi_reduction <minsi>, %606, %cst_165 [1] : vector<1x8x128xi32> to vector<1x128xi32>
    %608 = arith.index_cast %c1_i32_162 : i32 to index
    %c0_166 = arith.constant 0 : index
    %609 = vector.load %arg24[%608, %c0_166] : memref<8x128xi32, #tpu.memory_space<vmem>>, vector<1x128xi32>
    tpu.vector_store %arg24[%608, %c0_166], %607 {strides = array<i32>} : memref<8x128xi32, #tpu.memory_space<vmem>>, vector<1x128xi32>,
    %610 = arith.index_cast %arg0 : i32 to index
    %611 = arith.index_cast %c1_i32_162 : i32 to index
    %612 = memref.load %arg1[%610, %611] : memref<2x8xi32, #tpu.memory_space<smem>>
    %c0_i32_167 = arith.constant 0 : i32
    %613 = arith.cmpi sgt, %612, %c0_i32_167 : i32
    %614 = arith.index_cast %c1_i32_162 : i32 to index
    %c0_168 = arith.constant 0 : index
    %615 = vector.load %arg23[%614, %c0_168] : memref<8x128xf32, #tpu.memory_space<vmem>>, vector<1x128xf32>
    %616 = arith.addf %601, %615 : vector<1x128xf32>
    %617 = arith.select %613, %616, %595 : vector<1x128xf32>
    %c2_i32_169 = arith.constant 2 : i32
    %618 = vector.extract_strided_slice %617 {offsets = [0, 0], sizes = [1, 8], strides = [1, 1]} : vector<1x128xf32> to vector<1x8xf32>
    %619 = vector.shape_cast %618 : vector<1x8xf32> to vector<1x8x1xf32>
    %620 = vector.shape_cast %590 : vector<8x128xf32> to vector<1x8x128xf32>
    %621 = vector.broadcast %619 : vector<1x8x1xf32> to vector<1x8x128xf32>
    %622 = arith.addf %621, %620 : vector<1x8x128xf32>
    %cst_170 = arith.constant dense<0xFF800000> : vector<1x128xf32>
    %623 = vector.multi_reduction <maximumf>, %622, %cst_170 [1] : vector<1x8x128xf32> to vector<1x128xf32>
    %624 = vector.shape_cast %623 : vector<1x128xf32> to vector<1x1x128xf32>
    %625 = vector.broadcast %624 : vector<1x1x128xf32> to vector<1x8x128xf32>
    %626 = arith.cmpf oeq, %622, %625 : vector<1x8x128xf32>
    %c8_i32_171 = arith.constant 8 : i32
    %627 = vector.broadcast %c8_i32_171 : i32 to vector<1x8x128xi32>
    %628 = arith.select %626, %591, %627 : vector<1x8x128xi1>, vector<1x8x128xi32>
    %cst_172 = arith.constant dense<2147483647> : vector<1x128xi32>
    %629 = vector.multi_reduction <minsi>, %628, %cst_172 [1] : vector<1x8x128xi32> to vector<1x128xi32>
    %630 = arith.index_cast %c2_i32_169 : i32 to index
    %c0_173 = arith.constant 0 : index
    %631 = vector.load %arg24[%630, %c0_173] : memref<8x128xi32, #tpu.memory_space<vmem>>, vector<1x128xi32>
    tpu.vector_store %arg24[%630, %c0_173], %629 {strides = array<i32>} : memref<8x128xi32, #tpu.memory_space<vmem>>, vector<1x128xi32>,
    %632 = arith.index_cast %arg0 : i32 to index
    %633 = arith.index_cast %c2_i32_169 : i32 to index
    %634 = memref.load %arg1[%632, %633] : memref<2x8xi32, #tpu.memory_space<smem>>
    %c0_i32_174 = arith.constant 0 : i32
    %635 = arith.cmpi sgt, %634, %c0_i32_174 : i32
    %636 = arith.index_cast %c2_i32_169 : i32 to index
    %c0_175 = arith.constant 0 : index
    %637 = vector.load %arg23[%636, %c0_175] : memref<8x128xf32, #tpu.memory_space<vmem>>, vector<1x128xf32>
    %638 = arith.addf %623, %637 : vector<1x128xf32>
    %639 = arith.select %635, %638, %617 : vector<1x128xf32>
    %c3_i32_176 = arith.constant 3 : i32
    %640 = vector.extract_strided_slice %639 {offsets = [0, 0], sizes = [1, 8], strides = [1, 1]} : vector<1x128xf32> to vector<1x8xf32>
    %641 = vector.shape_cast %640 : vector<1x8xf32> to vector<1x8x1xf32>
    %642 = vector.shape_cast %590 : vector<8x128xf32> to vector<1x8x128xf32>
    %643 = vector.broadcast %641 : vector<1x8x1xf32> to vector<1x8x128xf32>
    %644 = arith.addf %643, %642 : vector<1x8x128xf32>
    %cst_177 = arith.constant dense<0xFF800000> : vector<1x128xf32>
    %645 = vector.multi_reduction <maximumf>, %644, %cst_177 [1] : vector<1x8x128xf32> to vector<1x128xf32>
    %646 = vector.shape_cast %645 : vector<1x128xf32> to vector<1x1x128xf32>
    %647 = vector.broadcast %646 : vector<1x1x128xf32> to vector<1x8x128xf32>
    %648 = arith.cmpf oeq, %644, %647 : vector<1x8x128xf32>
    %c8_i32_178 = arith.constant 8 : i32
    %649 = vector.broadcast %c8_i32_178 : i32 to vector<1x8x128xi32>
    %650 = arith.select %648, %591, %649 : vector<1x8x128xi1>, vector<1x8x128xi32>
    %cst_179 = arith.constant dense<2147483647> : vector<1x128xi32>
    %651 = vector.multi_reduction <minsi>, %650, %cst_179 [1] : vector<1x8x128xi32> to vector<1x128xi32>
    %652 = arith.index_cast %c3_i32_176 : i32 to index
    %c0_180 = arith.constant 0 : index
    %653 = vector.load %arg24[%652, %c0_180] : memref<8x128xi32, #tpu.memory_space<vmem>>, vector<1x128xi32>
    tpu.vector_store %arg24[%652, %c0_180], %651 {strides = array<i32>} : memref<8x128xi32, #tpu.memory_space<vmem>>, vector<1x128xi32>,
    %654 = arith.index_cast %arg0 : i32 to index
    %655 = arith.index_cast %c3_i32_176 : i32 to index
    %656 = memref.load %arg1[%654, %655] : memref<2x8xi32, #tpu.memory_space<smem>>
    %c0_i32_181 = arith.constant 0 : i32
    %657 = arith.cmpi sgt, %656, %c0_i32_181 : i32
    %658 = arith.index_cast %c3_i32_176 : i32 to index
    %c0_182 = arith.constant 0 : index
    %659 = vector.load %arg23[%658, %c0_182] : memref<8x128xf32, #tpu.memory_space<vmem>>, vector<1x128xf32>
    %660 = arith.addf %645, %659 : vector<1x128xf32>
    %661 = arith.select %657, %660, %639 : vector<1x128xf32>
    %c4_i32_183 = arith.constant 4 : i32
    %662 = vector.extract_strided_slice %661 {offsets = [0, 0], sizes = [1, 8], strides = [1, 1]} : vector<1x128xf32> to vector<1x8xf32>
    %663 = vector.shape_cast %662 : vector<1x8xf32> to vector<1x8x1xf32>
    %664 = vector.shape_cast %590 : vector<8x128xf32> to vector<1x8x128xf32>
    %665 = vector.broadcast %663 : vector<1x8x1xf32> to vector<1x8x128xf32>
    %666 = arith.addf %665, %664 : vector<1x8x128xf32>
    %cst_184 = arith.constant dense<0xFF800000> : vector<1x128xf32>
    %667 = vector.multi_reduction <maximumf>, %666, %cst_184 [1] : vector<1x8x128xf32> to vector<1x128xf32>
    %668 = vector.shape_cast %667 : vector<1x128xf32> to vector<1x1x128xf32>
    %669 = vector.broadcast %668 : vector<1x1x128xf32> to vector<1x8x128xf32>
    %670 = arith.cmpf oeq, %666, %669 : vector<1x8x128xf32>
    %c8_i32_185 = arith.constant 8 : i32
    %671 = vector.broadcast %c8_i32_185 : i32 to vector<1x8x128xi32>
    %672 = arith.select %670, %591, %671 : vector<1x8x128xi1>, vector<1x8x128xi32>
    %cst_186 = arith.constant dense<2147483647> : vector<1x128xi32>
    %673 = vector.multi_reduction <minsi>, %672, %cst_186 [1] : vector<1x8x128xi32> to vector<1x128xi32>
    %674 = arith.index_cast %c4_i32_183 : i32 to index
    %c0_187 = arith.constant 0 : index
    %675 = vector.load %arg24[%674, %c0_187] : memref<8x128xi32, #tpu.memory_space<vmem>>, vector<1x128xi32>
    tpu.vector_store %arg24[%674, %c0_187], %673 {strides = array<i32>} : memref<8x128xi32, #tpu.memory_space<vmem>>, vector<1x128xi32>,
    %676 = arith.index_cast %arg0 : i32 to index
    %677 = arith.index_cast %c4_i32_183 : i32 to index
    %678 = memref.load %arg1[%676, %677] : memref<2x8xi32, #tpu.memory_space<smem>>
    %c0_i32_188 = arith.constant 0 : i32
    %679 = arith.cmpi sgt, %678, %c0_i32_188 : i32
    %680 = arith.index_cast %c4_i32_183 : i32 to index
    %c0_189 = arith.constant 0 : index
    %681 = vector.load %arg23[%680, %c0_189] : memref<8x128xf32, #tpu.memory_space<vmem>>, vector<1x128xf32>
    %682 = arith.addf %667, %681 : vector<1x128xf32>
    %683 = arith.select %679, %682, %661 : vector<1x128xf32>
    %c5_i32_190 = arith.constant 5 : i32
    %684 = vector.extract_strided_slice %683 {offsets = [0, 0], sizes = [1, 8], strides = [1, 1]} : vector<1x128xf32> to vector<1x8xf32>
    %685 = vector.shape_cast %684 : vector<1x8xf32> to vector<1x8x1xf32>
    %686 = vector.shape_cast %590 : vector<8x128xf32> to vector<1x8x128xf32>
    %687 = vector.broadcast %685 : vector<1x8x1xf32> to vector<1x8x128xf32>
    %688 = arith.addf %687, %686 : vector<1x8x128xf32>
    %cst_191 = arith.constant dense<0xFF800000> : vector<1x128xf32>
    %689 = vector.multi_reduction <maximumf>, %688, %cst_191 [1] : vector<1x8x128xf32> to vector<1x128xf32>
    %690 = vector.shape_cast %689 : vector<1x128xf32> to vector<1x1x128xf32>
    %691 = vector.broadcast %690 : vector<1x1x128xf32> to vector<1x8x128xf32>
    %692 = arith.cmpf oeq, %688, %691 : vector<1x8x128xf32>
    %c8_i32_192 = arith.constant 8 : i32
    %693 = vector.broadcast %c8_i32_192 : i32 to vector<1x8x128xi32>
    %694 = arith.select %692, %591, %693 : vector<1x8x128xi1>, vector<1x8x128xi32>
    %cst_193 = arith.constant dense<2147483647> : vector<1x128xi32>
    %695 = vector.multi_reduction <minsi>, %694, %cst_193 [1] : vector<1x8x128xi32> to vector<1x128xi32>
    %696 = arith.index_cast %c5_i32_190 : i32 to index
    %c0_194 = arith.constant 0 : index
    %697 = vector.load %arg24[%696, %c0_194] : memref<8x128xi32, #tpu.memory_space<vmem>>, vector<1x128xi32>
    tpu.vector_store %arg24[%696, %c0_194], %695 {strides = array<i32>} : memref<8x128xi32, #tpu.memory_space<vmem>>, vector<1x128xi32>,
    %698 = arith.index_cast %arg0 : i32 to index
    %699 = arith.index_cast %c5_i32_190 : i32 to index
    %700 = memref.load %arg1[%698, %699] : memref<2x8xi32, #tpu.memory_space<smem>>
    %c0_i32_195 = arith.constant 0 : i32
    %701 = arith.cmpi sgt, %700, %c0_i32_195 : i32
    %702 = arith.index_cast %c5_i32_190 : i32 to index
    %c0_196 = arith.constant 0 : index
    %703 = vector.load %arg23[%702, %c0_196] : memref<8x128xf32, #tpu.memory_space<vmem>>, vector<1x128xf32>
    %704 = arith.addf %689, %703 : vector<1x128xf32>
    %705 = arith.select %701, %704, %683 : vector<1x128xf32>
    %c6_i32_197 = arith.constant 6 : i32
    %706 = vector.extract_strided_slice %705 {offsets = [0, 0], sizes = [1, 8], strides = [1, 1]} : vector<1x128xf32> to vector<1x8xf32>
    %707 = vector.shape_cast %706 : vector<1x8xf32> to vector<1x8x1xf32>
    %708 = vector.shape_cast %590 : vector<8x128xf32> to vector<1x8x128xf32>
    %709 = vector.broadcast %707 : vector<1x8x1xf32> to vector<1x8x128xf32>
    %710 = arith.addf %709, %708 : vector<1x8x128xf32>
    %cst_198 = arith.constant dense<0xFF800000> : vector<1x128xf32>
    %711 = vector.multi_reduction <maximumf>, %710, %cst_198 [1] : vector<1x8x128xf32> to vector<1x128xf32>
    %712 = vector.shape_cast %711 : vector<1x128xf32> to vector<1x1x128xf32>
    %713 = vector.broadcast %712 : vector<1x1x128xf32> to vector<1x8x128xf32>
    %714 = arith.cmpf oeq, %710, %713 : vector<1x8x128xf32>
    %c8_i32_199 = arith.constant 8 : i32
    %715 = vector.broadcast %c8_i32_199 : i32 to vector<1x8x128xi32>
    %716 = arith.select %714, %591, %715 : vector<1x8x128xi1>, vector<1x8x128xi32>
    %cst_200 = arith.constant dense<2147483647> : vector<1x128xi32>
    %717 = vector.multi_reduction <minsi>, %716, %cst_200 [1] : vector<1x8x128xi32> to vector<1x128xi32>
    %718 = arith.index_cast %c6_i32_197 : i32 to index
    %c0_201 = arith.constant 0 : index
    %719 = vector.load %arg24[%718, %c0_201] : memref<8x128xi32, #tpu.memory_space<vmem>>, vector<1x128xi32>
    tpu.vector_store %arg24[%718, %c0_201], %717 {strides = array<i32>} : memref<8x128xi32, #tpu.memory_space<vmem>>, vector<1x128xi32>,
    %720 = arith.index_cast %arg0 : i32 to index
    %721 = arith.index_cast %c6_i32_197 : i32 to index
    %722 = memref.load %arg1[%720, %721] : memref<2x8xi32, #tpu.memory_space<smem>>
    %c0_i32_202 = arith.constant 0 : i32
    %723 = arith.cmpi sgt, %722, %c0_i32_202 : i32
    %724 = arith.index_cast %c6_i32_197 : i32 to index
    %c0_203 = arith.constant 0 : index
    %725 = vector.load %arg23[%724, %c0_203] : memref<8x128xf32, #tpu.memory_space<vmem>>, vector<1x128xf32>
    %726 = arith.addf %711, %725 : vector<1x128xf32>
    %727 = arith.select %723, %726, %705 : vector<1x128xf32>
    %c7_i32_204 = arith.constant 7 : i32
    %728 = vector.extract_strided_slice %727 {offsets = [0, 0], sizes = [1, 8], strides = [1, 1]} : vector<1x128xf32> to vector<1x8xf32>
    %729 = vector.shape_cast %728 : vector<1x8xf32> to vector<1x8x1xf32>
    %730 = vector.shape_cast %590 : vector<8x128xf32> to vector<1x8x128xf32>
    %731 = vector.broadcast %729 : vector<1x8x1xf32> to vector<1x8x128xf32>
    %732 = arith.addf %731, %730 : vector<1x8x128xf32>
    %cst_205 = arith.constant dense<0xFF800000> : vector<1x128xf32>
    %733 = vector.multi_reduction <maximumf>, %732, %cst_205 [1] : vector<1x8x128xf32> to vector<1x128xf32>
    %734 = vector.shape_cast %733 : vector<1x128xf32> to vector<1x1x128xf32>
    %735 = vector.broadcast %734 : vector<1x1x128xf32> to vector<1x8x128xf32>
    %736 = arith.cmpf oeq, %732, %735 : vector<1x8x128xf32>
    %c8_i32_206 = arith.constant 8 : i32
    %737 = vector.broadcast %c8_i32_206 : i32 to vector<1x8x128xi32>
    %738 = arith.select %736, %591, %737 : vector<1x8x128xi1>, vector<1x8x128xi32>
    %cst_207 = arith.constant dense<2147483647> : vector<1x128xi32>
    %739 = vector.multi_reduction <minsi>, %738, %cst_207 [1] : vector<1x8x128xi32> to vector<1x128xi32>
    %740 = arith.index_cast %c7_i32_204 : i32 to index
    %c0_208 = arith.constant 0 : index
    %741 = vector.load %arg24[%740, %c0_208] : memref<8x128xi32, #tpu.memory_space<vmem>>, vector<1x128xi32>
    tpu.vector_store %arg24[%740, %c0_208], %739 {strides = array<i32>} : memref<8x128xi32, #tpu.memory_space<vmem>>, vector<1x128xi32>,
    %742 = arith.index_cast %arg0 : i32 to index
    %743 = arith.index_cast %c7_i32_204 : i32 to index
    %744 = memref.load %arg1[%742, %743] : memref<2x8xi32, #tpu.memory_space<smem>>
    %c0_i32_209 = arith.constant 0 : i32
    %745 = arith.cmpi sgt, %744, %c0_i32_209 : i32
    %746 = arith.index_cast %c7_i32_204 : i32 to index
    %c0_210 = arith.constant 0 : index
    %747 = vector.load %arg23[%746, %c0_210] : memref<8x128xf32, #tpu.memory_space<vmem>>, vector<1x128xf32>
    %748 = arith.addf %733, %747 : vector<1x128xf32>
    %749 = arith.select %745, %748, %727 : vector<1x128xf32>
    %c7_i32_211 = arith.constant 7 : i32
    %c0_212 = arith.constant 0 : index
    %c0_213 = arith.constant 0 : index
    %750 = vector.load %arg17[%c0_212, %c0_213] : memref<1x128xf32, #tpu.memory_space<vmem>>, vector<1x128xf32>
    %751 = arith.addf %749, %750 : vector<1x128xf32>
    %cst_214 = arith.constant dense<0xFF800000> : vector<1xf32>
    %752 = vector.multi_reduction <maximumf>, %751, %cst_214 [1] : vector<1x128xf32> to vector<1xf32>
    %753 = vector.shape_cast %752 : vector<1xf32> to vector<1x1xf32>
    %754 = vector.broadcast %753 : vector<1x1xf32> to vector<1x128xf32>
    %755 = arith.cmpf oeq, %751, %754 : vector<1x128xf32>
    %c128_i32 = arith.constant 128 : i32
    %756 = vector.broadcast %c128_i32 : i32 to vector<1x128xi32>
    %757 = arith.select %755, %592, %756 : vector<1x128xi1>, vector<1x128xi32>
    %cst_215 = arith.constant dense<2147483647> : vector<1xi32>
    %758 = vector.multi_reduction <minsi>, %757, %cst_215 [1] : vector<1x128xi32> to vector<1xi32>
    %759 = vector.shape_cast %758 : vector<1xi32> to vector<1x1xi32>
    %760 = tpu.iota {dimensions = array<i32: 1>} : vector<1x128xi32>
    %c0_i32_216 = arith.constant 0 : i32
    %761 = vector.broadcast %c0_i32_216 : i32 to vector<1x128xi32>
    %c0_i32_217 = arith.constant 0 : i32
    %c7_i32_218 = arith.constant 7 : i32
    %762 = arith.subi %c7_i32_218, %c0_i32_217 : i32
    %763 = arith.index_cast %arg0 : i32 to index
    %764 = arith.index_cast %762 : i32 to index
    %765 = memref.load %arg1[%763, %764] : memref<2x8xi32, #tpu.memory_space<smem>>
    %c0_i32_219 = arith.constant 0 : i32
    %766 = arith.cmpi sgt, %765, %c0_i32_219 : i32
    %767 = vector.broadcast %762 : i32 to vector<1x128xi32>
    %768 = arith.cmpi eq, %760, %767 : vector<1x128xi32>
    %c0_i32_220 = arith.constant 0 : i32
    %769 = vector.broadcast %c0_i32_220 : i32 to vector<1x1xi32>
    %770 = arith.select %766, %759, %769 : vector<1x1xi32>
    %771 = vector.shape_cast %770 : vector<1x1xi32> to vector<1x1xi32>
    %772 = vector.broadcast %771 : vector<1x1xi32> to vector<1x128xi32>
    %773 = arith.select %768, %772, %761 : vector<1x128xi1>, vector<1x128xi32>
    %774 = vector.broadcast %759 : vector<1x1xi32> to vector<1x128xi32>
    %775 = arith.cmpi eq, %592, %774 : vector<1x128xi32>
    %776 = arith.index_cast %762 : i32 to index
    %c0_221 = arith.constant 0 : index
    %777 = vector.load %arg24[%776, %c0_221] : memref<8x128xi32, #tpu.memory_space<vmem>>, vector<1x128xi32>
    %c0_i32_222 = arith.constant 0 : i32
    %778 = vector.broadcast %c0_i32_222 : i32 to vector<1x128xi32>
    %779 = arith.select %775, %777, %778 : vector<1x128xi1>, vector<1x128xi32>
    %cst_223 = arith.constant dense<0> : vector<1xi32>
    %780 = vector.multi_reduction <add>, %779, %cst_223 [1] : vector<1x128xi32> to vector<1xi32>
    %781 = vector.shape_cast %780 : vector<1xi32> to vector<1x1xi32>
    %782 = arith.select %766, %781, %759 : vector<1x1xi32>
    %c1_i32_224 = arith.constant 1 : i32
    %c7_i32_225 = arith.constant 7 : i32
    %783 = arith.subi %c7_i32_225, %c1_i32_224 : i32
    %784 = arith.index_cast %arg0 : i32 to index
    %785 = arith.index_cast %783 : i32 to index
    %786 = memref.load %arg1[%784, %785] : memref<2x8xi32, #tpu.memory_space<smem>>
    %c0_i32_226 = arith.constant 0 : i32
    %787 = arith.cmpi sgt, %786, %c0_i32_226 : i32
    %788 = vector.broadcast %783 : i32 to vector<1x128xi32>
    %789 = arith.cmpi eq, %760, %788 : vector<1x128xi32>
    %c0_i32_227 = arith.constant 0 : i32
    %790 = vector.broadcast %c0_i32_227 : i32 to vector<1x1xi32>
    %791 = arith.select %787, %782, %790 : vector<1x1xi32>
    %792 = vector.shape_cast %791 : vector<1x1xi32> to vector<1x1xi32>
    %793 = vector.broadcast %792 : vector<1x1xi32> to vector<1x128xi32>
    %794 = arith.select %789, %793, %773 : vector<1x128xi1>, vector<1x128xi32>
    %795 = vector.broadcast %782 : vector<1x1xi32> to vector<1x128xi32>
    %796 = arith.cmpi eq, %592, %795 : vector<1x128xi32>
    %797 = arith.index_cast %783 : i32 to index
    %c0_228 = arith.constant 0 : index
    %798 = vector.load %arg24[%797, %c0_228] : memref<8x128xi32, #tpu.memory_space<vmem>>, vector<1x128xi32>
    %c0_i32_229 = arith.constant 0 : i32
    %799 = vector.broadcast %c0_i32_229 : i32 to vector<1x128xi32>
    %800 = arith.select %796, %798, %799 : vector<1x128xi1>, vector<1x128xi32>
    %cst_230 = arith.constant dense<0> : vector<1xi32>
    %801 = vector.multi_reduction <add>, %800, %cst_230 [1] : vector<1x128xi32> to vector<1xi32>
    %802 = vector.shape_cast %801 : vector<1xi32> to vector<1x1xi32>
    %803 = arith.select %787, %802, %782 : vector<1x1xi32>
    %c2_i32_231 = arith.constant 2 : i32
    %c7_i32_232 = arith.constant 7 : i32
    %804 = arith.subi %c7_i32_232, %c2_i32_231 : i32
    %805 = arith.index_cast %arg0 : i32 to index
    %806 = arith.index_cast %804 : i32 to index
    %807 = memref.load %arg1[%805, %806] : memref<2x8xi32, #tpu.memory_space<smem>>
    %c0_i32_233 = arith.constant 0 : i32
    %808 = arith.cmpi sgt, %807, %c0_i32_233 : i32
    %809 = vector.broadcast %804 : i32 to vector<1x128xi32>
    %810 = arith.cmpi eq, %760, %809 : vector<1x128xi32>
    %c0_i32_234 = arith.constant 0 : i32
    %811 = vector.broadcast %c0_i32_234 : i32 to vector<1x1xi32>
    %812 = arith.select %808, %803, %811 : vector<1x1xi32>
    %813 = vector.shape_cast %812 : vector<1x1xi32> to vector<1x1xi32>
    %814 = vector.broadcast %813 : vector<1x1xi32> to vector<1x128xi32>
    %815 = arith.select %810, %814, %794 : vector<1x128xi1>, vector<1x128xi32>
    %816 = vector.broadcast %803 : vector<1x1xi32> to vector<1x128xi32>
    %817 = arith.cmpi eq, %592, %816 : vector<1x128xi32>
    %818 = arith.index_cast %804 : i32 to index
    %c0_235 = arith.constant 0 : index
    %819 = vector.load %arg24[%818, %c0_235] : memref<8x128xi32, #tpu.memory_space<vmem>>, vector<1x128xi32>
    %c0_i32_236 = arith.constant 0 : i32
    %820 = vector.broadcast %c0_i32_236 : i32 to vector<1x128xi32>
    %821 = arith.select %817, %819, %820 : vector<1x128xi1>, vector<1x128xi32>
    %cst_237 = arith.constant dense<0> : vector<1xi32>
    %822 = vector.multi_reduction <add>, %821, %cst_237 [1] : vector<1x128xi32> to vector<1xi32>
    %823 = vector.shape_cast %822 : vector<1xi32> to vector<1x1xi32>
    %824 = arith.select %808, %823, %803 : vector<1x1xi32>
    %c3_i32_238 = arith.constant 3 : i32
    %c7_i32_239 = arith.constant 7 : i32
    %825 = arith.subi %c7_i32_239, %c3_i32_238 : i32
    %826 = arith.index_cast %arg0 : i32 to index
    %827 = arith.index_cast %825 : i32 to index
    %828 = memref.load %arg1[%826, %827] : memref<2x8xi32, #tpu.memory_space<smem>>
    %c0_i32_240 = arith.constant 0 : i32
    %829 = arith.cmpi sgt, %828, %c0_i32_240 : i32
    %830 = vector.broadcast %825 : i32 to vector<1x128xi32>
    %831 = arith.cmpi eq, %760, %830 : vector<1x128xi32>
    %c0_i32_241 = arith.constant 0 : i32
    %832 = vector.broadcast %c0_i32_241 : i32 to vector<1x1xi32>
    %833 = arith.select %829, %824, %832 : vector<1x1xi32>
    %834 = vector.shape_cast %833 : vector<1x1xi32> to vector<1x1xi32>
    %835 = vector.broadcast %834 : vector<1x1xi32> to vector<1x128xi32>
    %836 = arith.select %831, %835, %815 : vector<1x128xi1>, vector<1x128xi32>
    %837 = vector.broadcast %824 : vector<1x1xi32> to vector<1x128xi32>
    %838 = arith.cmpi eq, %592, %837 : vector<1x128xi32>
    %839 = arith.index_cast %825 : i32 to index
    %c0_242 = arith.constant 0 : index
    %840 = vector.load %arg24[%839, %c0_242] : memref<8x128xi32, #tpu.memory_space<vmem>>, vector<1x128xi32>
    %c0_i32_243 = arith.constant 0 : i32
    %841 = vector.broadcast %c0_i32_243 : i32 to vector<1x128xi32>
    %842 = arith.select %838, %840, %841 : vector<1x128xi1>, vector<1x128xi32>
    %cst_244 = arith.constant dense<0> : vector<1xi32>
    %843 = vector.multi_reduction <add>, %842, %cst_244 [1] : vector<1x128xi32> to vector<1xi32>
    %844 = vector.shape_cast %843 : vector<1xi32> to vector<1x1xi32>
    %845 = arith.select %829, %844, %824 : vector<1x1xi32>
    %c4_i32_245 = arith.constant 4 : i32
    %c7_i32_246 = arith.constant 7 : i32
    %846 = arith.subi %c7_i32_246, %c4_i32_245 : i32
    %847 = arith.index_cast %arg0 : i32 to index
    %848 = arith.index_cast %846 : i32 to index
    %849 = memref.load %arg1[%847, %848] : memref<2x8xi32, #tpu.memory_space<smem>>
    %c0_i32_247 = arith.constant 0 : i32
    %850 = arith.cmpi sgt, %849, %c0_i32_247 : i32
    %851 = vector.broadcast %846 : i32 to vector<1x128xi32>
    %852 = arith.cmpi eq, %760, %851 : vector<1x128xi32>
    %c0_i32_248 = arith.constant 0 : i32
    %853 = vector.broadcast %c0_i32_248 : i32 to vector<1x1xi32>
    %854 = arith.select %850, %845, %853 : vector<1x1xi32>
    %855 = vector.shape_cast %854 : vector<1x1xi32> to vector<1x1xi32>
    %856 = vector.broadcast %855 : vector<1x1xi32> to vector<1x128xi32>
    %857 = arith.select %852, %856, %836 : vector<1x128xi1>, vector<1x128xi32>
    %858 = vector.broadcast %845 : vector<1x1xi32> to vector<1x128xi32>
    %859 = arith.cmpi eq, %592, %858 : vector<1x128xi32>
    %860 = arith.index_cast %846 : i32 to index
    %c0_249 = arith.constant 0 : index
    %861 = vector.load %arg24[%860, %c0_249] : memref<8x128xi32, #tpu.memory_space<vmem>>, vector<1x128xi32>
    %c0_i32_250 = arith.constant 0 : i32
    %862 = vector.broadcast %c0_i32_250 : i32 to vector<1x128xi32>
    %863 = arith.select %859, %861, %862 : vector<1x128xi1>, vector<1x128xi32>
    %cst_251 = arith.constant dense<0> : vector<1xi32>
    %864 = vector.multi_reduction <add>, %863, %cst_251 [1] : vector<1x128xi32> to vector<1xi32>
    %865 = vector.shape_cast %864 : vector<1xi32> to vector<1x1xi32>
    %866 = arith.select %850, %865, %845 : vector<1x1xi32>
    %c5_i32_252 = arith.constant 5 : i32
    %c7_i32_253 = arith.constant 7 : i32
    %867 = arith.subi %c7_i32_253, %c5_i32_252 : i32
    %868 = arith.index_cast %arg0 : i32 to index
    %869 = arith.index_cast %867 : i32 to index
    %870 = memref.load %arg1[%868, %869] : memref<2x8xi32, #tpu.memory_space<smem>>
    %c0_i32_254 = arith.constant 0 : i32
    %871 = arith.cmpi sgt, %870, %c0_i32_254 : i32
    %872 = vector.broadcast %867 : i32 to vector<1x128xi32>
    %873 = arith.cmpi eq, %760, %872 : vector<1x128xi32>
    %c0_i32_255 = arith.constant 0 : i32
    %874 = vector.broadcast %c0_i32_255 : i32 to vector<1x1xi32>
    %875 = arith.select %871, %866, %874 : vector<1x1xi32>
    %876 = vector.shape_cast %875 : vector<1x1xi32> to vector<1x1xi32>
    %877 = vector.broadcast %876 : vector<1x1xi32> to vector<1x128xi32>
    %878 = arith.select %873, %877, %857 : vector<1x128xi1>, vector<1x128xi32>
    %879 = vector.broadcast %866 : vector<1x1xi32> to vector<1x128xi32>
    %880 = arith.cmpi eq, %592, %879 : vector<1x128xi32>
    %881 = arith.index_cast %867 : i32 to index
    %c0_256 = arith.constant 0 : index
    %882 = vector.load %arg24[%881, %c0_256] : memref<8x128xi32, #tpu.memory_space<vmem>>, vector<1x128xi32>
    %c0_i32_257 = arith.constant 0 : i32
    %883 = vector.broadcast %c0_i32_257 : i32 to vector<1x128xi32>
    %884 = arith.select %880, %882, %883 : vector<1x128xi1>, vector<1x128xi32>
    %cst_258 = arith.constant dense<0> : vector<1xi32>
    %885 = vector.multi_reduction <add>, %884, %cst_258 [1] : vector<1x128xi32> to vector<1xi32>
    %886 = vector.shape_cast %885 : vector<1xi32> to vector<1x1xi32>
    %887 = arith.select %871, %886, %866 : vector<1x1xi32>
    %c6_i32_259 = arith.constant 6 : i32
    %c7_i32_260 = arith.constant 7 : i32
    %888 = arith.subi %c7_i32_260, %c6_i32_259 : i32
    %889 = arith.index_cast %arg0 : i32 to index
    %890 = arith.index_cast %888 : i32 to index
    %891 = memref.load %arg1[%889, %890] : memref<2x8xi32, #tpu.memory_space<smem>>
    %c0_i32_261 = arith.constant 0 : i32
    %892 = arith.cmpi sgt, %891, %c0_i32_261 : i32
    %893 = vector.broadcast %888 : i32 to vector<1x128xi32>
    %894 = arith.cmpi eq, %760, %893 : vector<1x128xi32>
    %c0_i32_262 = arith.constant 0 : i32
    %895 = vector.broadcast %c0_i32_262 : i32 to vector<1x1xi32>
    %896 = arith.select %892, %887, %895 : vector<1x1xi32>
    %897 = vector.shape_cast %896 : vector<1x1xi32> to vector<1x1xi32>
    %898 = vector.broadcast %897 : vector<1x1xi32> to vector<1x128xi32>
    %899 = arith.select %894, %898, %878 : vector<1x128xi1>, vector<1x128xi32>
    %900 = vector.broadcast %887 : vector<1x1xi32> to vector<1x128xi32>
    %901 = arith.cmpi eq, %592, %900 : vector<1x128xi32>
    %902 = arith.index_cast %888 : i32 to index
    %c0_263 = arith.constant 0 : index
    %903 = vector.load %arg24[%902, %c0_263] : memref<8x128xi32, #tpu.memory_space<vmem>>, vector<1x128xi32>
    %c0_i32_264 = arith.constant 0 : i32
    %904 = vector.broadcast %c0_i32_264 : i32 to vector<1x128xi32>
    %905 = arith.select %901, %903, %904 : vector<1x128xi1>, vector<1x128xi32>
    %cst_265 = arith.constant dense<0> : vector<1xi32>
    %906 = vector.multi_reduction <add>, %905, %cst_265 [1] : vector<1x128xi32> to vector<1xi32>
    %907 = vector.shape_cast %906 : vector<1xi32> to vector<1x1xi32>
    %908 = arith.select %892, %907, %887 : vector<1x1xi32>
    %c7_i32_266 = arith.constant 7 : i32
    %c0_i32_267 = arith.constant 0 : i32
    %909 = vector.broadcast %c0_i32_267 : i32 to vector<1x128xi32>
    %910 = arith.cmpi eq, %760, %909 : vector<1x128xi32>
    %911 = arith.index_cast %arg0 : i32 to index
    %c0_268 = arith.constant 0 : index
    %912 = memref.load %arg1[%911, %c0_268] : memref<2x8xi32, #tpu.memory_space<smem>>
    %c0_i32_269 = arith.constant 0 : i32
    %913 = arith.cmpi sgt, %912, %c0_i32_269 : i32
    %c0_i32_270 = arith.constant 0 : i32
    %914 = vector.broadcast %c0_i32_270 : i32 to vector<1x1xi32>
    %915 = arith.select %913, %908, %914 : vector<1x1xi32>
    %916 = vector.shape_cast %915 : vector<1x1xi32> to vector<1x1xi32>
    %917 = vector.broadcast %916 : vector<1x1xi32> to vector<1x128xi32>
    %918 = arith.select %910, %917, %899 : vector<1x128xi1>, vector<1x128xi32>
    %919 = vector.shape_cast %918 : vector<1x128xi32> to vector<1x1x128xi32>
    %c0_271 = arith.constant 0 : index
    %c0_272 = arith.constant 0 : index
    %c0_273 = arith.constant 0 : index
    %920 = vector.load %arg19[%c0_271, %c0_272, %c0_273] : memref<1x1x128xi32, #tpu.memory_space<vmem>>, vector<1x1x128xi32>
    tpu.vector_store %arg19[%c0_271, %c0_272, %c0_273], %919 {strides = array<i32>} : memref<1x1x128xi32, #tpu.memory_space<vmem>>, vector<1x1x128xi32>,
    return
  }
  func.func @transform_0(%arg0: i32, %arg1: memref<2x8xi32, #tpu.memory_space<smem>>) -> (i32, i32, i32) {
    %c0_i32 = arith.constant 0 : i32
    %c0_i32_0 = arith.constant 0 : i32
    %c0_i32_1 = arith.constant 0 : i32
    return %arg0, %c0_i32, %c0_i32_0 : i32, i32, i32
  }
  func.func @transform_1(%arg0: i32, %arg1: memref<2x8xi32, #tpu.memory_space<smem>>) -> (i32, i32) {
    %c0_i32 = arith.constant 0 : i32
    %c0_i32_0 = arith.constant 0 : i32
    %c0_i32_1 = arith.constant 0 : i32
    return %c0_i32, %c0_i32_0 : i32, i32
  }
  func.func @transform_2(%arg0: i32, %arg1: memref<2x8xi32, #tpu.memory_space<smem>>) -> (i32, i32) {
    %c0_i32 = arith.constant 0 : i32
    %c0_i32_0 = arith.constant 0 : i32
    %c0_i32_1 = arith.constant 0 : i32
    return %c0_i32, %c0_i32_0 : i32, i32
  }
  func.func @transform_3(%arg0: i32, %arg1: memref<2x8xi32, #tpu.memory_space<smem>>) -> (i32, i32) {
    %c0_i32 = arith.constant 0 : i32
    %c0_i32_0 = arith.constant 0 : i32
    %c0_i32_1 = arith.constant 0 : i32
    return %c0_i32, %c0_i32_0 : i32, i32
  }
  func.func @transform_4(%arg0: i32, %arg1: memref<2x8xi32, #tpu.memory_space<smem>>) -> (i32, i32) {
    %c0_i32 = arith.constant 0 : i32
    %c0_i32_0 = arith.constant 0 : i32
    %c0_i32_1 = arith.constant 0 : i32
    return %c0_i32, %c0_i32_0 : i32, i32
  }
  func.func @transform_5(%arg0: i32, %arg1: memref<2x8xi32, #tpu.memory_space<smem>>) -> (i32, i32) {
    %c0_i32 = arith.constant 0 : i32
    %c0_i32_0 = arith.constant 0 : i32
    %c0_i32_1 = arith.constant 0 : i32
    return %c0_i32, %c0_i32_0 : i32, i32
  }
  func.func @transform_6(%arg0: i32, %arg1: memref<2x8xi32, #tpu.memory_space<smem>>) -> (i32, i32) {
    %c0_i32 = arith.constant 0 : i32
    %c0_i32_0 = arith.constant 0 : i32
    %c0_i32_1 = arith.constant 0 : i32
    return %c0_i32, %c0_i32_0 : i32, i32
  }
  func.func @transform_7(%arg0: i32, %arg1: memref<2x8xi32, #tpu.memory_space<smem>>) -> (i32, i32) {
    %c0_i32 = arith.constant 0 : i32
    %c0_i32_0 = arith.constant 0 : i32
    %c0_i32_1 = arith.constant 0 : i32
    return %c0_i32, %c0_i32_0 : i32, i32
  }
  func.func @transform_8(%arg0: i32, %arg1: memref<2x8xi32, #tpu.memory_space<smem>>) -> (i32, i32) {
    %c0_i32 = arith.constant 0 : i32
    %c0_i32_0 = arith.constant 0 : i32
    %c0_i32_1 = arith.constant 0 : i32
    return %c0_i32, %c0_i32_0 : i32, i32
  }
  func.func @transform_9(%arg0: i32, %arg1: memref<2x8xi32, #tpu.memory_space<smem>>) -> (i32, i32) {
    %c0_i32 = arith.constant 0 : i32
    %c0_i32_0 = arith.constant 0 : i32
    %c0_i32_1 = arith.constant 0 : i32
    return %c0_i32, %c0_i32_0 : i32, i32
  }
  func.func @transform_10(%arg0: i32, %arg1: memref<2x8xi32, #tpu.memory_space<smem>>) -> (i32, i32) {
    %c0_i32 = arith.constant 0 : i32
    %c0_i32_0 = arith.constant 0 : i32
    %c0_i32_1 = arith.constant 0 : i32
    return %c0_i32, %c0_i32_0 : i32, i32
  }
  func.func @transform_11(%arg0: i32, %arg1: memref<2x8xi32, #tpu.memory_space<smem>>) -> (i32, i32) {
    %c0_i32 = arith.constant 0 : i32
    %c0_i32_0 = arith.constant 0 : i32
    %c0_i32_1 = arith.constant 0 : i32
    return %c0_i32, %c0_i32_0 : i32, i32
  }
  func.func @transform_12(%arg0: i32, %arg1: memref<2x8xi32, #tpu.memory_space<smem>>) -> (i32, i32) {
    %c0_i32 = arith.constant 0 : i32
    %c0_i32_0 = arith.constant 0 : i32
    %c0_i32_1 = arith.constant 0 : i32
    return %c0_i32, %c0_i32_0 : i32, i32
  }
  func.func @transform_13(%arg0: i32, %arg1: memref<2x8xi32, #tpu.memory_space<smem>>) -> (i32, i32) {
    %c0_i32 = arith.constant 0 : i32
    %c0_i32_0 = arith.constant 0 : i32
    %c0_i32_1 = arith.constant 0 : i32
    return %c0_i32, %c0_i32_0 : i32, i32
  }
  func.func @transform_14(%arg0: i32, %arg1: memref<2x8xi32, #tpu.memory_space<smem>>) -> (i32, i32) {
    %c0_i32 = arith.constant 0 : i32
    %c0_i32_0 = arith.constant 0 : i32
    %c0_i32_1 = arith.constant 0 : i32
    return %c0_i32, %c0_i32_0 : i32, i32
  }
  func.func @transform_15(%arg0: i32, %arg1: memref<2x8xi32, #tpu.memory_space<smem>>) -> (i32, i32) {
    %c0_i32 = arith.constant 0 : i32
    %c0_i32_0 = arith.constant 0 : i32
    %c0_i32_1 = arith.constant 0 : i32
    return %c0_i32, %c0_i32_0 : i32, i32
  }
  func.func @transform_16(%arg0: i32, %arg1: memref<2x8xi32, #tpu.memory_space<smem>>) -> (i32, i32) {
    %c0_i32 = arith.constant 0 : i32
    %c0_i32_0 = arith.constant 0 : i32
    %c0_i32_1 = arith.constant 0 : i32
    return %c0_i32, %c0_i32_0 : i32, i32
  }
  func.func @transform_17(%arg0: i32, %arg1: memref<2x8xi32, #tpu.memory_space<smem>>) -> (i32, i32, i32) {
    %c0_i32 = arith.constant 0 : i32
    %c0_i32_0 = arith.constant 0 : i32
    %c0_i32_1 = arith.constant 0 : i32
    return %arg0, %c0_i32, %c0_i32_0 : i32, i32, i32
  }
}

</mosaic_0001>

<bundles_post_ra>
// kernel: sentiment_forward.1
= control target key start
LH: loop header
LB: loop body
LE: loop exit
PB: predicated region body
PF: predicated region fallthrough
CT: control target
= control target key end

     0   :  { %s5751_s30 = smov [#allocation8]   ;;  %s7057_s0 = inlined_call_operand.hbm [shape: s32[2,8], index: 0, kind: input, shape index: {}]   ;;  %s7058_s1 = inlined_call_operand.vmem [shape: f32[2,8,768], index: 1, kind: input, shape index: {}]   ;;  %s7059_s2 = inlined_call_operand.hbm [shape: f32[1,768], index: 2, kind: input, shape index: {}]   ;;  %s7060_s3 = inlined_call_operand.hbm [shape: f32[1,768], index: 3, kind: input, shape index: {}]   ;;  %s7061_s4 = inlined_call_operand.vmem [shape: bf16[768,32], index: 4, kind: input, shape index: {}]   ;;  %s7062_s5 = inlined_call_operand.vmem [shape: bf16[768,32], index: 5, kind: input, shape index: {}]   ;;  %s7063_s6 = inlined_call_operand.vmem [shape: bf16[768,32], index: 6, kind: input, shape index: {}]   ;;  %s7064_s7 = inlined_call_operand.hbm [shape: f32[1,32], index: 7, kind: input, shape index: {}]   ;;  %s7065_s8 = inlined_call_operand.hbm [shape: bf16[32,256], index: 8, kind: input, shape index: {}]   ;;  %s7066_s9 = inlined_call_operand.hbm [shape: f32[1,256], index: 9, kind: input, shape index: {}]   ;;  %s7067_s10 = inlined_call_operand.hbm [shape: bf16[32,128], index: 10, kind: input, shape index: {}]   ;;  %s7068_s11 = inlined_call_operand.hbm [shape: bf16[32,128], index: 11, kind: input, shape index: {}]   ;;  %s7069_s12 = inlined_call_operand.hbm [shape: bf16[32,128], index: 12, kind: input, shape index: {}]   ;;  %s7070_s13 = inlined_call_operand.hbm [shape: bf16[32,128], index: 13, kind: input, shape index: {}]   ;;  %s7071_s14 = inlined_call_operand.hbm [shape: f32[1,128], index: 14, kind: input, shape index: {}]   ;;  %s7072_s15 = inlined_call_operand.hbm [shape: f32[1,128], index: 15, kind: input, shape index: {}]   ;;  %s7073_s16 = inlined_call_operand.hbm [shape: f32[1,128], index: 16, kind: input, shape index: {}]   ;;  %s7074_s17 = inlined_call_operand.hbm [shape: f32[8,128], index: 17, kind: input, shape index: {}]   ;;  %s7075_s18 = inlined_call_operand.hbm [shape: s32[2,1,128], index: 18, kind: output, shape index: {}]  }
   0x1   :  { %7085 = sst [smem:[#allocation47_spill]] %s7057_s0 }
   0x2   :  { %7086 = sst [smem:[#allocation48_spill]] %s7058_s1 }
   0x3   :  { %7087 = sst [smem:[#allocation49_spill]] %s7059_s2 }
   0x4   :  { %7088 = sst [smem:[#allocation50_spill]] %s7060_s3 }
   0x5   :  { %7089 = sst [smem:[#allocation51_spill]] %s7062_s5 }
   0x6   :  { %7090 = sst [smem:[#allocation52_spill]] %s7065_s8 }
   0x7   :  { %7091 = sst [smem:[#allocation53_spill]] %s7067_s10 }
   0x8   :  { %7092 = sst [smem:[#allocation54_spill]] %s7069_s12 }
   0x9   :  { %s7093_s29 = sld [smem:[#allocation47_spill]] }
   0xf   :  { %s24_s5 = sshll.u32 %s7093_s29, 4  ;;  %s25_s5 = int_to_ptr.hbm [resolvable:$true] %s24_s5 }
  0x10   :  { %27 = dma.hbm_to_smem %s25_s5, 32, %s5751_s30, [#allocation7] }
  0x11   :  { %5701 = dma.done.wait [#allocation7], 32 }
  0x12   :  { %5702 = vsyncadd [#allocation7], 4294967264 }
  0x13   :  { %30 = sfence }
  0x14   :  { %31 = vsyncpa [#allocation10], 0 }
  0x15   :  { %32 = vsyncpa [#allocation13], 0 }
  0x16   :  { %33 = vsyncpa [#allocation16], 0 }
  0x17   :  { %34 = vsyncpa [#allocation19], 0 }
  0x18   :  { %35 = vsyncpa [#allocation22], 0 }
  0x19   :  { %36 = vsyncpa [#allocation25], 0 }
  0x1a   :  { %37 = vsyncpa [#allocation28], 0 }
  0x1b   :  { %38 = vsyncpa [#allocation11], 0 }
  0x1c   :  { %40 = vsyncpa [#allocation11 + $0x1], 0  ;;  %s5871_s0 = smov 0   ;;  %s5873_s19 = smov 0  }
  0x1d   :  { %s5875_s1 = smov 0   ;;  %s5877_s20 = smov 0  }
  0x1e LB: > { %7094 = sst [smem:[#allocation40_spill]] %s5737_s0  ;;  %s5892_s5 = sadd.s32 4294967295, %s5749_s20   ;;  %s5749_s20 = sphi %s5877_s20, %s7130_s20   ;;  %s5745_s1 = sphi %s5875_s1, %s7132_s1   ;;  %s5741_s19 = sphi %s5873_s19, %s7134_s19   ;;  %s5737_s0 = sphi %s5871_s0, %s7133_s0  }
  0x1f   : > { %7095 = sst [smem:[#allocation41_spill]] %s5745_s1  ;;  %s4090_s21 = sadd.s32 4294967294, %s5749_s20  }
  0x20   : > { %7096 = sst [smem:[#allocation42_spill]] %s5749_s20  ;;  %s5896_s22 = sadd.s32 1, %s5749_s20  }
  0x21   : > { %7097 = sst [smem:[#allocation43_spill]] %s5896_s22  ;;  %s415_s2 = sadd.s32 1, %s5745_s1 }
  0x22   : > { %s412_s23 = ssub.s32 %s5749_s20, %s5896_s22  ;;  %p425_p0 = scmp.ne.s32.totalorder %s5745_s1, %s5741_s19 }
  0x23   : > { %p413_p1 = scmp.eq.s32.totalorder %s412_s23, 0  ;;  %p426_p2 = scmp.eq.s32.totalorder %s5892_s5, 1 }
  0x24   : > { %p431_p3 = scmp.ne.s32.totalorder %s5741_s19, %s5737_s0  ;;  %p432_p4 = scmp.eq.s32.totalorder %s4090_s21, 1 }
  0x25   : > { %s5907_s24 = scalar_select %p413_p1, %s5745_s1, %s415_s2  }
  0x26   : > { %p5909_p5 = por %p426_p2, %p425_p0  ;;  %p5913_p6 = por %p432_p4, %p431_p3 }
  0x27   : > { %7098 = sst [smem:[#allocation44_spill]] %s5907_s24  ;;  %p4091_p7 = scmp.ge.s32.totalorder %s5749_s20, 1 }
  0x28   : > { %s7099_s25 = scalar_select %p5909_p5, 1, 0 }
  0x29   : > { %s7101_s26 = scalar_select %p5913_p6, 1, 0 }
  0x2a   : > { %7100 = sst [smem:[#allocation45_spill]] %s7099_s25  ;;  %p439_p8 = scmp.lt.s32.totalorder %s5749_s20, 3 }
  0x2b   : > { %7102 = sst [smem:[#allocation46_spill]] %s7101_s26  ;;  %p5037_p9 = scmp.eq.s32.totalorder %s5892_s5, 0 }
  0x2c   : > { %p5920_p10 = pnand %p4091_p7, %p439_p8  ;;  %s7104_s3 = sld [smem:[#allocation50_spill]] }
  0x2d   : > { %s5752_s21 = smov [#allocation12]   ;;  %s7105_s8 = sld [smem:[#allocation52_spill]] }
  0x2e   : > { %p4993_p11 = pneg %p5920_p10  ;;  %s465_s2 = sshll.u32 %s5752_s21, 4  ;;  %s466_s2 = int_to_ptr.vmem [resolvable:$true] %s465_s2 }
  0x2f   : > { %s5753_s28 = smov [#allocation15]   ;;  %s5754_s21 = smov 128  }
  0x30   : > { %p5934_p12 = pnand %p5037_p9, %p4993_p11  ;;  %s497_s29 = sshll.u32 %s5753_s28, 4  ;;  %s498_s29 = int_to_ptr.vmem [resolvable:$true] %s497_s29 }
  0x31   : > { %s7107_s10 = sld [smem:[#allocation53_spill]]  ;;  %s5756_s26 = smov [#allocation18]  }
  0x32   : > { %s463_s30 = sshll.u32 %s7104_s3, 4  ;;  %s5755_s3 = smov 8   ;;  %s464_s30 = int_to_ptr.hbm [resolvable:$true] %s463_s30 }
  0x33   : > { %s495_s1 = sshll.u32 %s7105_s8, 4  ;;  %s523_s0 = sshll.u32 %s5756_s26, 4  ;;  %s496_s1 = int_to_ptr.hbm [resolvable:$true] %s495_s1  ;;  %s524_s0 = int_to_ptr.vmem [resolvable:$true] %s523_s0 }
  0x34   : > { %4999 = dma.hbm_to_vmem [thread:$0]  (!%p5934_p12), %s464_s30, 96, %s466_s2, [#allocation13]  }
  0x35   : > { %5005 = dma.hbm_to_vmem [thread:$0]  (!%p5934_p12), %s496_s1, 512, %s498_s29, [#allocation16], %s5754_s21, %s5754_s21, %s5755_s3  }
  0x36   : > { %s7108_s12 = sld [smem:[#allocation54_spill]]  ;;  %s5757_s30 = smov 64  }
  0x37   : > { %s521_s8 = sshll.u32 %s7107_s10, 4  ;;  %s5758_s2 = smov 4   ;;  %s522_s8 = int_to_ptr.hbm [resolvable:$true] %s521_s8 }
  0x38   : > { %5011 = dma.hbm_to_vmem [thread:$0]  (!%p5934_p12), %s522_s8, 256, %s524_s0, [#allocation19], %s5757_s30, %s5757_s30, %s5758_s2  }
  0x39   : > { %s5759_s3 = smov [#allocation21]   ;;  %s578_s26 = sshll.u32 %s7071_s14, 4  ;;  %s579_s26 = int_to_ptr.hbm [resolvable:$true] %s578_s26 }
  0x3a   : > { %s551_s1 = sshll.u32 %s5759_s3, 4  ;;  %s602_s24 = sshll.u32 %s7073_s16, 4  ;;  %s552_s1 = int_to_ptr.vmem [resolvable:$true] %s551_s1  ;;  %s603_s24 = int_to_ptr.hbm [resolvable:$true] %s602_s24 }
  0x3b   : > { %s5760_s8 = smov [#allocation24]   ;;  %s5761_s23 = smov [#allocation27]  }
  0x3c   : > { %s549_s28 = sshll.u32 %s7108_s12, 4  ;;  %s580_s0 = sshll.u32 %s5760_s8, 4  ;;  %s550_s28 = int_to_ptr.hbm [resolvable:$true] %s549_s28  ;;  %s581_s0 = int_to_ptr.vmem [resolvable:$true] %s580_s0 }
  0x3d   : > { %5017 = dma.hbm_to_vmem [thread:$0]  (!%p5934_p12), %s550_s28, 256, %s552_s1, [#allocation22], %s5757_s30, %s5757_s30, %s5758_s2  }
  0x3e   : > { %5023 = dma.hbm_to_vmem [thread:$0]  (!%p5934_p12), %s579_s26, 16, %s581_s0, [#allocation25]  }
  0x3f   : > { %s604_s3 = sshll.u32 %s5761_s23, 4  ;;  %s7109_s10 = sld [smem:[#allocation49_spill]]  ;;  %s605_s3 = int_to_ptr.vmem [resolvable:$true] %s604_s3 }
  0x40   : > { %5029 = dma.hbm_to_vmem [thread:$0]  (!%p5934_p12), %s603_s24, 16, %s605_s3, [#allocation28]  }
  0x41   : > { %s484_s20 = sshll.u32 %s7064_s7, 4  ;;  %s5762_s25 = smov [#allocation9]   ;;  %s485_s20 = int_to_ptr.hbm [resolvable:$true] %s484_s20 }
  0x42   : > { %s453_s8 = sshll.u32 %s5762_s25, 4  ;;  %s5763_s26 = smov [#allocation14]   ;;  %s454_s8 = int_to_ptr.vmem [resolvable:$true] %s453_s8 }
  0x43   : > { %s486_s0 = sshll.u32 %s5763_s26, 4  ;;  %s535_s21 = sshll.u32 %s7068_s11, 4  ;;  %s487_s0 = int_to_ptr.vmem [resolvable:$true] %s486_s0  ;;  %s536_s21 = int_to_ptr.hbm [resolvable:$true] %s535_s21 }
  0x44   : > { %5002 = dma.hbm_to_vmem [thread:$0]  (!%p5934_p12), %s485_s20, 16, %s487_s0, [#allocation13]  }
  0x45   : > { %s451_s12 = sshll.u32 %s7109_s10, 4  ;;  %s510_s10 = sshll.u32 %s7066_s9, 4  ;;  %s452_s12 = int_to_ptr.hbm [resolvable:$true] %s451_s12  ;;  %s511_s10 = int_to_ptr.hbm [resolvable:$true] %s510_s10 }
  0x46   : > { %4996 = dma.hbm_to_vmem [thread:$0]  (!%p5934_p12), %s452_s12, 96, %s454_s8, [#allocation10]  }
  0x47   : > { %s5764_s28 = smov [#allocation17]   ;;  %s5765_s12 = smov [#allocation20]  }
  0x48   : > { %s512_s1 = sshll.u32 %s5764_s28, 4  ;;  %s537_s25 = sshll.u32 %s5765_s12, 4  ;;  %s513_s1 = int_to_ptr.vmem [resolvable:$true] %s512_s1  ;;  %s538_s25 = int_to_ptr.vmem [resolvable:$true] %s537_s25 }
  0x49   : > { %5008 = dma.hbm_to_vmem [thread:$0]  (!%p5934_p12), %s511_s10, 32, %s513_s1, [#allocation16]  }
  0x4a   : > { %s563_s23 = sshll.u32 %s7070_s13, 4  ;;  %s590_s29 = sshll.u32 %s7072_s15, 4  ;;  %s564_s23 = int_to_ptr.hbm [resolvable:$true] %s563_s23  ;;  %s591_s29 = int_to_ptr.hbm [resolvable:$true] %s590_s29 }
  0x4b   : > { %5014 = dma.hbm_to_vmem [thread:$0]  (!%p5934_p12), %s536_s21, 256, %s538_s25, [#allocation19], %s5757_s30, %s5757_s30, %s5758_s2  }
  0x4c   : > { %s5766_s10 = smov [#allocation23]   ;;  %s5767_s3 = smov [#allocation26]  }
  0x4d   : > { %s565_s24 = sshll.u32 %s5766_s10, 4  ;;  %s592_s28 = sshll.u32 %s5767_s3, 4  ;;  %s566_s24 = int_to_ptr.vmem [resolvable:$true] %s565_s24  ;;  %s593_s28 = int_to_ptr.vmem [resolvable:$true] %s592_s28 }
  0x4e   : > { %5020 = dma.hbm_to_vmem [thread:$0]  (!%p5934_p12), %s564_s23, 256, %s566_s24, [#allocation22], %s5757_s30, %s5757_s30, %s5758_s2  }
  0x4f   : > { %s614_s21 = sshll.u32 %s7074_s17, 4  ;;  %s5768_s25 = smov [#allocation29]   ;;  %s615_s21 = int_to_ptr.hbm [resolvable:$true] %s614_s21 }
  0x50   : > { %5026 = dma.hbm_to_vmem [thread:$0]  (!%p5934_p12), %s591_s29, 16, %s593_s28, [#allocation25]  }
  0x51   : > { %s616_s8 = sshll.u32 %s5768_s25, 4  ;;  %637 = sbr.rel (%p5920_p10) target bundleno = 7615 (0x1dbf), region = 88  ;;  %s617_s8 = int_to_ptr.vmem [resolvable:$true] %s616_s8 }
  0x52   : > { %5032 = dma.hbm_to_vmem [thread:$0]  (!%p5934_p12), %s615_s21, 128, %s617_s8, [#allocation28]  }
  0x56   : > { %5704 = dma.done.wait (%p5037_p9), [#allocation10], 96  }
  0x57   : > { %5706 = vsyncadd (%p5037_p9), [#allocation10], 4294967200 }
  0x58   : > { %5708 = dma.done.wait (%p5037_p9), [#allocation13], 112  }
  0x59   : > { %5710 = vsyncadd (%p5037_p9), [#allocation13], 4294967184 }
  0x5a   : > { %5712 = dma.done.wait (%p5037_p9), [#allocation16], 544  }
  0x5b   : > { %5714 = vsyncadd (%p5037_p9), [#allocation16], 4294966752 }
  0x5c   : > { %5716 = dma.done.wait (%p5037_p9), [#allocation19], 512  }
  0x5d   : > { %5718 = vsyncadd (%p5037_p9), [#allocation19], 4294966784 }
  0x5e   : > { %5720 = dma.done.wait (%p5037_p9), [#allocation22], 512  }
  0x5f   : > { %5722 = vsyncadd (%p5037_p9), [#allocation22], 4294966784 }
  0x60   : > { %5724 = dma.done.wait (%p5037_p9), [#allocation25], 32  }
  0x61   : > { %5726 = vsyncadd (%p5037_p9), [#allocation25], 4294967264 }
  0x62   : > { %5728 = dma.done.wait (%p5037_p9), [#allocation28], 144  }
  0x63   : > { %5730 = vsyncadd (%p5037_p9), [#allocation28], 4294967152  ;;  %p749_p13 = scmp.lt.s32.totalorder %s5892_s5, 1  ;;  %s7110_s26 = sld [smem:[#allocation48_spill]]  ;;  %v5769_v11 = vmov 768.0   ;;  %v4789_v14 = vld [vmem:[%s7061_s4 + $0x38] sm:$0xff] }
  0x64   : > { %5123 = vrcp.f32 %v5769_v11  ;;  %v4797_v15 = vld [vmem:[%s7061_s4 + $0x78] sm:$0xff]  ;;  %1243 = vmatpush.bf16.msra.mxu0 %v4789_v14  ;;  %v4788_v19 = vld [vmem:[%s7061_s4 + $0x30] sm:$0xff]  ;;  %v4787_v24 = vld [vmem:[%s7061_s4 + $0x28] sm:$0xff]  ;;  %s7111_s30 = sld [smem:[#allocation51_spill]]  ;;  %vm2290_vm6 = vcmask 261120   ;;  %s5771_s28 = smov 64  }
  0x65   : > { %s750_s22 = scalar_select %p749_p13, %s5892_s5, 1  ;;  %v4805_v16 = vld [vmem:[%s7061_s4 + $0xb8] sm:$0xff]  ;;  %1256 = vmatpush.bf16.msra.mxu1 %v4797_v15  ;;  %v4796_v20 = vld [vmem:[%s7061_s4 + $0x70] sm:$0xff]  ;;  %v4795_v25 = vld [vmem:[%s7061_s4 + $0x68] sm:$0xff] }
  0x66   : > { %v4813_v18 = vld [vmem:[%s7061_s4 + $0xf8] sm:$0xff]  ;;  %1269 = vmatpush.bf16.msra.mxu2 %v4805_v16  ;;  %v4804_v21 = vld [vmem:[%s7061_s4 + $0xb0] sm:$0xff]  ;;  %v4803_v26 = vld [vmem:[%s7061_s4 + $0xa8] sm:$0xff]  ;;  %s5772_s1 = smov 32   ;;  %s6855_s12 = sshll.u32 %s5892_s5, 7 }
  0x67   : > { %s4938_s27 = smul.u32 48, %s750_s22  ;;  %1282 = vmatpush.bf16.msra.mxu3 %v4813_v18  ;;  %v4812_v22 = vld [vmem:[%s7061_s4 + $0xf0] sm:$0xff]  ;;  %v4811_v27 = vld [vmem:[%s7061_s4 + $0xe8] sm:$0xff]  ;;  %v4786_v29 = vld [vmem:[%s7061_s4 + $0x20] sm:$0xff]  ;;  %s3475_s21 = sadd.s32 1, %s6855_s12 }
  0x68   : > { %1244 = vmatpush.bf16.msra.mxu0 %v4788_v19  ;;  %v4794_v30 = vld [vmem:[%s7061_s4 + $0x60] sm:$0xff]  ;;  %v4785_v34 = vld [vmem:[%s7061_s4 + $0x18] sm:$0xff]  ;;  %v4784_v43 = vld [vmem:[%s7061_s4 + $0x10] sm:$0xff]  ;;  %s3476_s25 = sld [smem:[#allocation8 + %s3475_s21]]  ;;  %s3510_s22 = sadd.s32 2, %s6855_s12 }
  0x69   : > { %s753_s23 = scalar_lea.vmem %s7110_s26, %s4938_s27  ;;  %1257 = vmatpush.bf16.msra.mxu1 %v4796_v20  ;;  %v4802_v31 = vld [vmem:[%s7061_s4 + $0xa0] sm:$0xff]  ;;  %v4793_v36 = vld [vmem:[%s7061_s4 + $0x58] sm:$0xff]  ;;  %v4792_v44 = vld [vmem:[%s7061_s4 + $0x50] sm:$0xff]  ;;  %s3511_s27 = sld [smem:[#allocation8 + %s3510_s22]] }
  0x6a   : > { %v755_v0 = vld [vmem:[%s753_s23] sm:$0xff]  ;;  %v756_v1 = vld [vmem:[%s753_s23 + $0x8] sm:$0xff]  ;;  %v757_v2 = vld [vmem:[%s753_s23 + $0x10] sm:$0xff]  ;;  %v5124_v12 = vpop.eup %5123  ;;  %1270 = vmatpush.bf16.msra.mxu2 %v4804_v21  ;;  %s3545_s26 = sadd.s32 3, %s6855_s12  ;;  %s3580_s0 = sadd.s32 4, %s6855_s12 }
  0x6b   : > { %v761_v3 = vadd.f32 %v756_v1, %v755_v0  ;;  %v6044_v4 = vld [vmem:[%s753_s23 + $0x18] sm:$0xff]  ;;  %v6046_v6 = vld [vmem:[%s753_s23 + $0x20] sm:$0xff]  ;;  %v6049_v8 = vld [vmem:[%s753_s23 + $0x28] sm:$0xff]  ;;  %v769_v13 = vmul.f32 768.0, %v5124_v12  ;;  %1283 = vmatpush.bf16.msra.mxu3 %v4812_v22  ;;  %vm773_vm0 = vweird.f32 %v5124_v12  ;;  %s3546_s23 = sld [smem:[#allocation8 + %s3545_s26]]  ;;  %s3615_s24 = sadd.s32 5, %s6855_s12 }
  0x6c   : > { %1245 = vmatpush.bf16.msra.mxu0 %v4787_v24  ;;  %v4810_v32 = vld [vmem:[%s7061_s4 + $0xe0] sm:$0xff]  ;;  %v4801_v37 = vld [vmem:[%s7061_s4 + $0x98] sm:$0xff]  ;;  %v4800_v45 = vld [vmem:[%s7061_s4 + $0x90] sm:$0xff]  ;;  %s3581_s29 = sld [smem:[#allocation8 + %s3580_s0]] }
  0x6d   : > { %v762_v5 = vadd.f32 %v761_v3, %v757_v2  ;;  %v770_v17 = vsub.f32 1.0, %v769_v13  ;;  %1258 = vmatpush.bf16.msra.mxu1 %v4795_v25  ;;  %v4809_v39 = vld [vmem:[%s7061_s4 + $0xd8] sm:$0xff]  ;;  %v4808_v49 = vld [vmem:[%s7061_s4 + $0xd0] sm:$0xff]  ;;  %v4783_v53 = vld [vmem:[%s7061_s4 + $0x8] sm:$0xff]  ;;  %s3616_s3 = sld [smem:[#allocation8 + %s3615_s24]] }
  0x6e   : > { %1271 = vmatpush.bf16.msra.mxu2 %v4803_v26  ;;  %v4791_v54 = vld [vmem:[%s7061_s4 + $0x48] sm:$0xff]  ;;  %v4798_v3 = vld [vmem:[%s7061_s4 + $0x80] sm:$0xff]  ;;  %v4884_v11 = vld [vmem:[%s7063_s6 + $0x30] sm:$0xff]  ;;  %p3477_p0 = scmp.gt.s32.totalorder %s3476_s25, 0 }
  0x6f   : > { %v763_v7 = vadd.f32 %v762_v5, %v6044_v4  ;;  %v771_v23 = vmul.f32 %v5124_v12, %v770_v17  ;;  %1284 = vmatpush.bf16.msra.mxu3 %v4811_v27  ;;  %v4799_v55 = vld [vmem:[%s7061_s4 + $0x88] sm:$0xff]  ;;  %v4821_v5 = vld [vmem:[%s7061_s4 + $0x138] sm:$0xff]  ;;  %v4818_v17 = vld [vmem:[%s7061_s4 + $0x120] sm:$0xff]  ;;  %p3512_p1 = scmp.gt.s32.totalorder %s3511_s27, 0  ;;  %s3685_s27 = sadd.s32 7, %s6855_s12 }
  0x70   : > { %1246 = vmatpush.bf16.msra.mxu0 %v4786_v29  ;;  %v4807_v59 = vld [vmem:[%s7061_s4 + $0xc8] sm:$0xff]  ;;  %v4826_v18 = vld [vmem:[%s7061_s4 + $0x160] sm:$0xff]  ;;  %v4817_v21 = vld [vmem:[%s7061_s4 + $0x118] sm:$0xff]  ;;  %s3480_s8 = scalar_select %p3477_p0, 1, 0 }
  0x71   : > { %v764_v9 = vadd.f32 %v763_v7, %v6046_v6  ;;  %v772_v28 = vadd.f32 %v5124_v12, %v771_v23  ;;  %1259 = vmatpush.bf16.msra.mxu1 %v4794_v30  ;;  %v4885_v7 = vld [vmem:[%s7063_s6 + $0x38] sm:$0xff]  ;;  %v4819_v13 = vld [vmem:[%s7061_s4 + $0x128] sm:$0xff]  ;;  %v4882_v19 = vld [vmem:[%s7063_s6 + $0x20] sm:$0xff]  ;;  %s3515_s2 = scalar_select %p3512_p1, 1, 0 }
  0x72   : > { %1272 = vmatpush.bf16.msra.mxu2 %v4802_v31  ;;  %v4827_v14 = vld [vmem:[%s7061_s4 + $0x168] sm:$0xff]  ;;  %v4890_v20 = vld [vmem:[%s7063_s6 + $0x60] sm:$0xff]  ;;  %v4825_v22 = vld [vmem:[%s7061_s4 + $0x158] sm:$0xff]  ;;  %p3547_p2 = scmp.gt.s32.totalorder %s3546_s23, 0  ;;  %p3582_p3 = scmp.gt.s32.totalorder %s3581_s29, 0 }
  0x73   : > { %v765_v10 = vadd.f32 %v764_v9, %v6049_v8  ;;  %v6101_v33 = vsel %vm773_vm0, %v5124_v12, %v772_v28  ;;  %1285 = vmatpush.bf16.msra.mxu3 %v4810_v32  ;;  %v4820_v9 = vld [vmem:[%s7061_s4 + $0x130] sm:$0xff]  ;;  %v4883_v15 = vld [vmem:[%s7063_s6 + $0x28] sm:$0xff]  ;;  %v4881_v23 = vld [vmem:[%s7063_s6 + $0x18] sm:$0xff]  ;;  %p3617_p4 = scmp.gt.s32.totalorder %s3616_s3, 0 }
  0x74   : > { %1247 = vmatpush.bf16.msra.mxu0 %v4785_v34  ;;  %v4892_v12 = vld [vmem:[%s7063_s6 + $0x70] sm:$0xff]  ;;  %v4891_v16 = vld [vmem:[%s7063_s6 + $0x68] sm:$0xff]  ;;  %v4889_v24 = vld [vmem:[%s7063_s6 + $0x58] sm:$0xff]  ;;  %s3550_s20 = scalar_select %p3547_p2, 1, 0 }
  0x75   : > { %766 = vadd.xlane.f32.xlu0 %v765_v10  ;;  %1260 = vmatpush.bf16.msra.mxu1 %v4793_v36  ;;  %v4828_v10 = vld [vmem:[%s7061_s4 + $0x170] sm:$0xff]  ;;  %v4815_v29 = vld [vmem:[%s7061_s4 + $0x108] sm:$0xff]  ;;  %v4814_v34 = vld [vmem:[%s7061_s4 + $0x100] sm:$0xff]  ;;  %s3585_s10 = scalar_select %p3582_p3, 1, 0 }
  0x76   : > { %1273 = vmatpush.bf16.msra.mxu2 %v4801_v37  ;;  %v4816_v25 = vld [vmem:[%s7061_s4 + $0x110] sm:$0xff]  ;;  %v4823_v30 = vld [vmem:[%s7061_s4 + $0x148] sm:$0xff]  ;;  %v4878_v36 = vld [vmem:[%s7063_s6] sm:$0xff] }
  0x77   : > { %1286 = vmatpush.bf16.msra.mxu3 %v4809_v39  ;;  %v4824_v26 = vld [vmem:[%s7061_s4 + $0x150] sm:$0xff]  ;;  %v4879_v31 = vld [vmem:[%s7063_s6 + $0x8] sm:$0xff]  ;;  %v4886_v37 = vld [vmem:[%s7063_s6 + $0x40] sm:$0xff] }
  0x78   : > { %1248 = vmatpush.bf16.msra.mxu0 %v4784_v43  ;;  %v4880_v27 = vld [vmem:[%s7063_s6 + $0x10] sm:$0xff]  ;;  %v4887_v32 = vld [vmem:[%s7063_s6 + $0x48] sm:$0xff] }
  0x79   : > { %1261 = vmatpush.bf16.msra.mxu1 %v4792_v44  ;;  %v4888_v28 = vld [vmem:[%s7063_s6 + $0x50] sm:$0xff] }
  0x7a   : > { %1274 = vmatpush.bf16.msra.mxu2 %v4800_v45 }
  0x7b   : > { %1287 = vmatpush.bf16.msra.mxu3 %v4808_v49  ;;  %v813_v49 = vld [vmem:[#allocation9] sm:$0x3f] }
  0x7c   : > { %1249 = vmatpush.bf16.msra.mxu0 %v4783_v53 }
  0x7d   : > { %1262 = vmatpush.bf16.msra.mxu1 %v4791_v54  ;;  %v815_v54 = vperm.slane %v813_v49, 0 }
  0x7e   : > { %1275 = vmatpush.bf16.msra.mxu2 %v4799_v55 }
  0x7f   : > { %1288 = vmatpush.bf16.msra.mxu3 %v4807_v59 }
  0x82   : > { %1276 = vmatpush.bf16.msra.mxu2 %v4798_v3 }
  0x86   : > { %1801 = vmatpush.bf16.msrb.mxu2 %v4885_v7 }
  0x8a   : > { %1802 = vmatpush.bf16.msrb.mxu2 %v4884_v11 }
  0x8e   : > { %1803 = vmatpush.bf16.msrb.mxu2 %v4883_v15  ;;  %v4900_v15 = vld [vmem:[%s7063_s6 + $0xb0] sm:$0xff] }
  0x92   : > { %1804 = vmatpush.bf16.msrb.mxu2 %v4882_v19 }
  0x96   : > { %1805 = vmatpush.bf16.msrb.mxu2 %v4881_v23 }
  0x9a   : > { %1806 = vmatpush.bf16.msrb.mxu2 %v4880_v27  ;;  %v4915_v27 = vld [vmem:[%s7063_s6 + $0x128] sm:$0xff] }
  0x9e   : > { %1807 = vmatpush.bf16.msrb.mxu2 %v4879_v31 }
  0xa2   : > { %1808 = vmatpush.bf16.msrb.mxu2 %v4878_v36 }
  0xe8   : > { %v767_v35 = vpop.xlane.xlu0 %766 }
  0xe9   : > { %v775_v38 = vmul.f32 %v6101_v33, %v767_v35  ;;  %v4822_v35 = vld [vmem:[%s7061_s4 + $0x140] sm:$0xff] }
  0xeb   : > { %v6116_v40 = vsub.f32 %v755_v0, %v775_v38  ;;  %v6118_v41 = vsub.f32 %v756_v1, %v775_v38  ;;  %v6120_v42 = vsub.f32 %v757_v2, %v775_v38  ;;  %v6132_v46 = vsub.f32 %v6044_v4, %v775_v38  ;;  %v4782_v1 = vld [vmem:[%s7061_s4] sm:$0xff] }
  0xec   : > { %v6142_v50 = vsub.f32 %v6046_v6, %v775_v38  ;;  %v6156_v56 = vsub.f32 %v6049_v8, %v775_v38  ;;  %v4790_v2 = vld [vmem:[%s7061_s4 + $0x40] sm:$0xff]  ;;  %v4829_v6 = vld [vmem:[%s7061_s4 + $0x178] sm:$0xff]  ;;  %1250 = vmatpush.bf16.msra.mxu0 %v4782_v1 }
  0xed   : > { %v782_v47 = vmul.f32 %v6116_v40, %v6116_v40  ;;  %v783_v48 = vmul.f32 %v6118_v41, %v6118_v41  ;;  %v784_v51 = vmul.f32 %v6120_v42, %v6120_v42  ;;  %v785_v57 = vmul.f32 %v6132_v46, %v6132_v46  ;;  %v4806_v4 = vld [vmem:[%s7061_s4 + $0xc0] sm:$0xff]  ;;  %1263 = vmatpush.bf16.msra.mxu1 %v4790_v2  ;;  %v4893_v8 = vld [vmem:[%s7063_s6 + $0x78] sm:$0xff] }
  0xee   : > { %v786_v60 = vmul.f32 %v6142_v50, %v6142_v50  ;;  %v787_v62 = vmul.f32 %v6156_v56, %v6156_v56  ;;  %1289 = vmatpush.bf16.msra.mxu3 %v4806_v4 }
  0xef   : > { %v788_v52 = vadd.f32 %v783_v48, %v782_v47 }
  0xf0   : > { %1295 = vmatpush.bf16.msrb.mxu0 %v4821_v5 }
  0xf1   : > { %v789_v58 = vadd.f32 %v788_v52, %v784_v51  ;;  %1308 = vmatpush.bf16.msrb.mxu1 %v4829_v6  ;;  %v6276_v52 = vld [vmem:[#allocation12] sm:$0x3f] }
  0xf2   : > { %1814 = vmatpush.bf16.msrb.mxu3 %v4893_v8  ;;  %v835_v55 = vperm.slane %v6276_v52, 0 }
  0xf3   : > { %v790_v61 = vadd.f32 %v789_v58, %v785_v57  ;;  %v817_v57 = vperm.slane %v813_v49, 2  ;;  %v818_v58 = vperm.slane %v813_v49, 3 }
  0xf4   : > { %1296 = vmatpush.bf16.msrb.mxu0 %v4820_v9 }
  0xf5   : > { %v791_v63 = vadd.f32 %v790_v61, %v786_v60  ;;  %1309 = vmatpush.bf16.msrb.mxu1 %v4828_v10  ;;  %v836_v60 = vperm.slane %v6276_v52, 1  ;;  %v837_v61 = vperm.slane %v6276_v52, 2 }
  0xf6   : > { %1815 = vmatpush.bf16.msrb.mxu3 %v4892_v12 }
  0xf7   : > { %v792_v0 = vadd.f32 %v791_v63, %v787_v62  ;;  %v838_v62 = vperm.slane %v6276_v52, 3 }
  0xf8   : > { %1297 = vmatpush.bf16.msrb.mxu0 %v4819_v13 }
  0xf9   : > { %793 = vadd.xlane.f32.xlu0 %v792_v0  ;;  %1310 = vmatpush.bf16.msrb.mxu1 %v4827_v14  ;;  %v4925_v14 = vld [vmem:[%s7063_s6 + $0x178] sm:$0xff] }
  0xfa   : > { %1816 = vmatpush.bf16.msrb.mxu3 %v4891_v16  ;;  %v4908_v16 = vld [vmem:[%s7063_s6 + $0xf0] sm:$0xff] }
  0xfc   : > { %1298 = vmatpush.bf16.msrb.mxu0 %v4818_v17 }
  0xfd   : > { %1311 = vmatpush.bf16.msrb.mxu1 %v4826_v18  ;;  %v819_v18 = vperm.slane %v813_v49, 4 }
  0xfe   : > { %1817 = vmatpush.bf16.msrb.mxu3 %v4890_v20  ;;  %v820_v20 = vperm.slane %v813_v49, 5 }
 0x100   : > { %1299 = vmatpush.bf16.msrb.mxu0 %v4817_v21  ;;  %v4916_v21 = vld [vmem:[%s7063_s6 + $0x130] sm:$0xff] }
 0x101   : > { %1312 = vmatpush.bf16.msrb.mxu1 %v4825_v22  ;;  %v4924_v22 = vld [vmem:[%s7063_s6 + $0x170] sm:$0xff] }
 0x102   : > { %1818 = vmatpush.bf16.msrb.mxu3 %v4889_v24  ;;  %v839_v24 = vperm.slane %v6276_v52, 4 }
 0x104   : > { %1300 = vmatpush.bf16.msrb.mxu0 %v4816_v25 }
 0x105   : > { %1313 = vmatpush.bf16.msrb.mxu1 %v4824_v26  ;;  %v840_v26 = vperm.slane %v6276_v52, 5  ;;  %v4903_v52 = vld [vmem:[%s7063_s6 + $0xc8] sm:$0xff] }
 0x106   : > { %1819 = vmatpush.bf16.msrb.mxu3 %v4888_v28  ;;  %v4923_v28 = vld [vmem:[%s7063_s6 + $0x168] sm:$0xff] }
 0x108   : > { %1301 = vmatpush.bf16.msrb.mxu0 %v4815_v29  ;;  %v4898_v29 = vld [vmem:[%s7063_s6 + $0xa0] sm:$0xff] }
 0x109   : > { %1314 = vmatpush.bf16.msrb.mxu1 %v4823_v30  ;;  %v4906_v30 = vld [vmem:[%s7063_s6 + $0xe0] sm:$0xff] }
 0x10a   : > { %1820 = vmatpush.bf16.msrb.mxu3 %v4887_v32 }
 0x10c   : > { %1302 = vmatpush.bf16.msrb.mxu0 %v4814_v34  ;;  %v4914_v34 = vld [vmem:[%s7063_s6 + $0x120] sm:$0xff] }
 0x10d   : > { %1315 = vmatpush.bf16.msrb.mxu1 %v4822_v35  ;;  %v4922_v35 = vld [vmem:[%s7063_s6 + $0x160] sm:$0xff] }
 0x10e   : > { %1821 = vmatpush.bf16.msrb.mxu3 %v4886_v37 }
 0x16c   : > { %v794_v38 = vpop.xlane.xlu0 %793 }
 0x16d   : > { %v795_v39 = vmul.f32 %v794_v38, %v6101_v33  ;;  %v816_v33 = vperm.slane %v813_v49, 1  ;;  %v4897_v38 = vld [vmem:[%s7063_s6 + $0x98] sm:$0xff]  ;;  %v4920_v49 = vld [vmem:[%s7063_s6 + $0x150] sm:$0xff] }
 0x16f   : > { %v796_v43 = vadd.f32 1e-05, %v795_v39  ;;  %v4905_v39 = vld [vmem:[%s7063_s6 + $0xd8] sm:$0xff] }
 0x171   : > { %5125 = vrsqrt.f32 %v796_v43  ;;  %vm803_vm2 = vweird.f32 %v796_v43 }
 0x177   : > { %v5126_v44 = vpop.eup %5125 }
 0x178   : > { %v798_v45 = vmul.f32 %v5126_v44, %v796_v43  ;;  %vm804_vm1 = vweird.f32 %v5126_v44  ;;  %v4913_v43 = vld [vmem:[%s7063_s6 + $0x118] sm:$0xff] }
 0x179   : > { %vm805_vm3 = vmor %vm803_vm2, %vm804_vm1 }
 0x17a   : > { %v799_v47 = vmul.f32 %v5126_v44, %v798_v45  ;;  %v4896_v45 = vld [vmem:[%s7063_s6 + $0x90] sm:$0xff] }
 0x17c   : > { %v800_v48 = vmul.f32 0.5, %v799_v47  ;;  %v4904_v47 = vld [vmem:[%s7063_s6 + $0xd0] sm:$0xff] }
 0x17e   : > { %v801_v51 = vsub.f32 1.5, %v800_v48  ;;  %v4912_v48 = vld [vmem:[%s7063_s6 + $0x110] sm:$0xff] }
 0x180   : > { %v802_v53 = vmul.f32 %v5126_v44, %v801_v51  ;;  %v4895_v51 = vld [vmem:[%s7063_s6 + $0x88] sm:$0xff] }
 0x182   : > { %v806_v59 = vsel %vm805_vm3, %v5126_v44, %v802_v53  ;;  %v4921_v44 = vld [vmem:[%s7063_s6 + $0x158] sm:$0xff]  ;;  %v4911_v53 = vld [vmem:[%s7063_s6 + $0x108] sm:$0xff] }
 0x183   : > { %v807_v63 = vmul.f32 %v806_v59, %v6116_v40  ;;  %v808_v0 = vmul.f32 %v806_v59, %v6118_v41  ;;  %v809_v1 = vmul.f32 %v806_v59, %v6120_v42  ;;  %v810_v2 = vmul.f32 %v806_v59, %v6132_v46  ;;  %v4901_v41 = vld [vmem:[%s7063_s6 + $0xb8] sm:$0xff] }
 0x184   : > { %v4909_v42 = vld [vmem:[%s7063_s6 + $0xf8] sm:$0xff]  ;;  %v811_v17 = vmul.f32 %v806_v59, %v6142_v50  ;;  %v812_v19 = vmul.f32 %v806_v59, %v6156_v56  ;;  %v4899_v50 = vld [vmem:[%s7063_s6 + $0xa8] sm:$0xff] }
 0x185   : > { %v827_v3 = vmul.f32 %v815_v54, %v807_v63  ;;  %v828_v4 = vmul.f32 %v816_v33, %v808_v0  ;;  %v829_v5 = vmul.f32 %v817_v57, %v809_v1  ;;  %v830_v6 = vmul.f32 %v818_v58, %v810_v2  ;;  %v4917_v46 = vld [vmem:[%s7063_s6 + $0x138] sm:$0xff]  ;;  %v4907_v56 = vld [vmem:[%s7063_s6 + $0xe8] sm:$0xff]  ;;  %v4902_v33 = vld [vmem:[%s7063_s6 + $0xc0] sm:$0xff] }
 0x186   : > { %v831_v23 = vmul.f32 %v819_v18, %v811_v17  ;;  %v832_v25 = vmul.f32 %v820_v20, %v812_v19  ;;  %v4919_v54 = vld [vmem:[%s7063_s6 + $0x148] sm:$0xff]  ;;  %v4910_v57 = vld [vmem:[%s7063_s6 + $0x100] sm:$0xff]  ;;  %v4837_v59 = vld [vmem:[%s7111_s30 + $0x38] sm:$0xff] }
 0x187   : > { %v847_v7 = vadd.f32 %v835_v55, %v827_v3  ;;  %v848_v8 = vadd.f32 %v836_v60, %v828_v4  ;;  %v849_v9 = vadd.f32 %v837_v61, %v829_v5  ;;  %v850_v10 = vadd.f32 %v838_v62, %v830_v6  ;;  %v4894_v55 = vld [vmem:[%s7063_s6 + $0x80] sm:$0xff]  ;;  %v4845_v60 = vld [vmem:[%s7111_s30 + $0x78] sm:$0xff]  ;;  %v4836_v63 = vld [vmem:[%s7111_s30 + $0x30] sm:$0xff] }
 0x188   : > { %v851_v31 = vadd.f32 %v839_v24, %v831_v23  ;;  %v852_v32 = vadd.f32 %v840_v26, %v832_v25  ;;  %v4918_v58 = vld [vmem:[%s7063_s6 + $0x140] sm:$0xff]  ;;  %v4853_v61 = vld [vmem:[%s7111_s30 + $0xb8] sm:$0xff]  ;;  %v4844_v0 = vld [vmem:[%s7111_s30 + $0x70] sm:$0xff] }
 0x189   : > { %v6286_v11 = vpack.c.bf16 %v847_v7, %v847_v7  ;;  %v6288_v12 = vpack.c.bf16 %v848_v8, %v848_v8  ;;  %v6290_v13 = vpack.c.bf16 %v849_v9, %v849_v9  ;;  %v6292_v40 = vpack.c.bf16 %v850_v10, %v850_v10  ;;  %v4861_v62 = vld [vmem:[%s7111_s30 + $0xf8] sm:$0xff]  ;;  %v4852_v1 = vld [vmem:[%s7111_s30 + $0xb0] sm:$0xff]  ;;  %v4835_v3 = vld [vmem:[%s7111_s30 + $0x28] sm:$0xff] }
 0x18a   : > { %v6350_v36 = vpack.c.bf16 %v851_v31, %v851_v31  ;;  %v6352_v37 = vpack.c.bf16 %v852_v32, %v852_v32  ;;  %v4860_v2 = vld [vmem:[%s7111_s30 + $0xf0] sm:$0xff]  ;;  %v4843_v4 = vld [vmem:[%s7111_s30 + $0x68] sm:$0xff]  ;;  %v4834_v7 = vld [vmem:[%s7111_s30 + $0x20] sm:$0xff] }
 0x18b   : > { %1251 = vmatmul.bf16.vlgmr.msra.gmra.mxu0 %v6286_v11  ;;  %1264 = vmatmul.bf16.vlgmr.msra.gmra.mxu1 %v6288_v12  ;;  %v4851_v5 = vld [vmem:[%s7111_s30 + $0xa8] sm:$0xff]  ;;  %v4842_v8 = vld [vmem:[%s7111_s30 + $0x60] sm:$0xff]  ;;  %v4848_v17 = vld [vmem:[%s7111_s30 + $0x90] sm:$0xff] }
 0x18c   : > { %1277 = vmatmul.bf16.vlgmr.msra.gmra.mxu2 %v6290_v13  ;;  %1290 = vmatmul.bf16.vlgmr.msra.gmra.mxu3 %v6292_v40  ;;  %v4859_v6 = vld [vmem:[%s7111_s30 + $0xe8] sm:$0xff]  ;;  %v4850_v9 = vld [vmem:[%s7111_s30 + $0xa0] sm:$0xff]  ;;  %v4856_v18 = vld [vmem:[%s7111_s30 + $0xd0] sm:$0xff] }
 0x18d   : > { %1827 = vmatpush.bf16.msra.mxu0 %v4901_v41  ;;  %1840 = vmatpush.bf16.msra.mxu1 %v4909_v42  ;;  %v4858_v10 = vld [vmem:[%s7111_s30 + $0xe0] sm:$0xff]  ;;  %v4833_v41 = vld [vmem:[%s7111_s30 + $0x18] sm:$0xff]  ;;  %v4831_v19 = vld [vmem:[%s7111_s30 + $0x8] sm:$0xff] }
 0x18e   : > { %1853 = vmatpush.bf16.msra.mxu2 %v4917_v46  ;;  %1866 = vmatpush.bf16.msra.mxu3 %v4925_v14  ;;  %v4841_v42 = vld [vmem:[%s7111_s30 + $0x58] sm:$0xff]  ;;  %v4839_v20 = vld [vmem:[%s7111_s30 + $0x48] sm:$0xff]  ;;  %v4846_v23 = vld [vmem:[%s7111_s30 + $0x80] sm:$0xff] }
 0x18f   : > { %v4849_v46 = vld [vmem:[%s7111_s30 + $0x98] sm:$0xff]  ;;  %v4854_v24 = vld [vmem:[%s7111_s30 + $0xc0] sm:$0xff]  ;;  %v4864_v31 = vld [vmem:[%s7111_s30 + $0x110] sm:$0xff] }
 0x190   : > { %v4857_v14 = vld [vmem:[%s7111_s30 + $0xd8] sm:$0xff]  ;;  %v4872_v32 = vld [vmem:[%s7111_s30 + $0x150] sm:$0xff] }
 0x191   : > { %1828 = vmatpush.bf16.msra.mxu0 %v4900_v15  ;;  %1841 = vmatpush.bf16.msra.mxu1 %v4908_v16  ;;  %v4832_v15 = vld [vmem:[%s7111_s30 + $0x10] sm:$0xff]  ;;  %v4869_v25 = vld [vmem:[%s7111_s30 + $0x138] sm:$0xff] }
 0x192   : > { %1854 = vmatpush.bf16.msra.mxu2 %v4916_v21  ;;  %1867 = vmatpush.bf16.msra.mxu3 %v4924_v22  ;;  %v4840_v16 = vld [vmem:[%s7111_s30 + $0x50] sm:$0xff]  ;;  %v4847_v21 = vld [vmem:[%s7111_s30 + $0x88] sm:$0xff]  ;;  %v4877_v26 = vld [vmem:[%s7111_s30 + $0x178] sm:$0xff] }
 0x193   : > { %v4855_v22 = vld [vmem:[%s7111_s30 + $0xc8] sm:$0xff] }
 0x195   : > { %1829 = vmatpush.bf16.msra.mxu0 %v4899_v50  ;;  %1842 = vmatpush.bf16.msra.mxu1 %v4907_v56  ;;  %v4830_v50 = vld [vmem:[%s7111_s30] sm:$0xff] }
 0x196   : > { %1855 = vmatpush.bf16.msra.mxu2 %v4915_v27  ;;  %1868 = vmatpush.bf16.msra.mxu3 %v4923_v28  ;;  %v4838_v56 = vld [vmem:[%s7111_s30 + $0x40] sm:$0xff]  ;;  %v4868_v27 = vld [vmem:[%s7111_s30 + $0x130] sm:$0xff] }
 0x197   : > { %v4876_v28 = vld [vmem:[%s7111_s30 + $0x170] sm:$0xff] }
 0x199   : > { %1830 = vmatpush.bf16.msra.mxu0 %v4898_v29  ;;  %1843 = vmatpush.bf16.msra.mxu1 %v4906_v30  ;;  %v4867_v29 = vld [vmem:[%s7111_s30 + $0x128] sm:$0xff] }
 0x19a   : > { %1856 = vmatpush.bf16.msra.mxu2 %v4914_v34  ;;  %1869 = vmatpush.bf16.msra.mxu3 %v4922_v35  ;;  %v4875_v30 = vld [vmem:[%s7111_s30 + $0x168] sm:$0xff] }
 0x19b   : > { %1303 = vmatmul.bf16.vlgmr.msrb.gmra.mxu0 %v6350_v36  ;;  %1316 = vmatmul.bf16.vlgmr.msrb.gmra.mxu1 %v6352_v37  ;;  %v4863_v34 = vld [vmem:[%s7111_s30 + $0x108] sm:$0xff] }
 0x19c   : > { %1809 = vmatmul.bf16.vlgmr.msrb.gmra.mxu2 %v6286_v11  ;;  %1822 = vmatmul.bf16.vlgmr.msrb.gmra.mxu3 %v6288_v12  ;;  %v4871_v35 = vld [vmem:[%s7111_s30 + $0x148] sm:$0xff] }
 0x19d   : > { %1831 = vmatpush.bf16.msra.mxu0 %v4897_v38  ;;  %1844 = vmatpush.bf16.msra.mxu1 %v4905_v39  ;;  %v4862_v38 = vld [vmem:[%s7111_s30 + $0x100] sm:$0xff] }
 0x19e   : > { %1857 = vmatpush.bf16.msra.mxu2 %v4913_v43  ;;  %1870 = vmatpush.bf16.msra.mxu3 %v4921_v44  ;;  %v4870_v39 = vld [vmem:[%s7111_s30 + $0x140] sm:$0xff]  ;;  %v1879_v43 = vlaneseq }
 0x1a0   : > { %v6561_v44 = vshrl.u32 %v1879_v43, 7 }
 0x1a1   : > { %1832 = vmatpush.bf16.msra.mxu0 %v4896_v45  ;;  %1845 = vmatpush.bf16.msra.mxu1 %v4904_v47 }
 0x1a2   : > { %1858 = vmatpush.bf16.msra.mxu2 %v4912_v48  ;;  %1871 = vmatpush.bf16.msra.mxu3 %v4920_v49  ;;  %vm2251_vm4 = vcmp.eq.s32.totalorder %v6561_v44, 0  ;;  %vm2255_vm5 = vcmp.eq.s32.totalorder %v6561_v44, 7 }
 0x1a3   : > { %5118 = vset.pattern.permute.xlu1 %v6561_v44  ;;  %5119 = vset.pattern.permute.xlu2 %v6561_v44 }
 0x1a4   : > { %5120 = vset.pattern.permute.xlu0 %v6561_v44 }
 0x1a5   : > { %1833 = vmatpush.bf16.msra.mxu0 %v4895_v51  ;;  %1846 = vmatpush.bf16.msra.mxu1 %v4903_v52 }
 0x1a6   : > { %1859 = vmatpush.bf16.msra.mxu2 %v4911_v53  ;;  %1872 = vmatpush.bf16.msra.mxu3 %v4919_v54 }
 0x1a9   : > { %1834 = vmatpush.bf16.msra.mxu0 %v4894_v55  ;;  %1847 = vmatpush.bf16.msra.mxu1 %v4902_v33 }
 0x1aa   : > { %1860 = vmatpush.bf16.msra.mxu2 %v4910_v57  ;;  %1873 = vmatpush.bf16.msra.mxu3 %v4918_v58 }
 0x1ac   : > { %1835 = vmatmul.bf16.vlgmr.msra.gmra.mxu0 %v6290_v13  ;;  %1848 = vmatmul.bf16.vlgmr.msra.gmra.mxu1 %v6292_v40 }
 0x1ad   : > { %2173 = vmatpush.bf16.msrb.mxu0 %v4837_v59  ;;  %2186 = vmatpush.bf16.msrb.mxu1 %v4845_v60 }
 0x1ae   : > { %2199 = vmatpush.bf16.msrb.mxu2 %v4853_v61  ;;  %2212 = vmatpush.bf16.msrb.mxu3 %v4861_v62 }
 0x1af   : > { %1861 = vmatmul.bf16.vlgmr.msra.gmra.mxu2 %v6350_v36  ;;  %1874 = vmatmul.bf16.vlgmr.msra.gmra.mxu3 %v6352_v37 }
 0x1b1   : > { %2174 = vmatpush.bf16.msrb.mxu0 %v4836_v63  ;;  %2187 = vmatpush.bf16.msrb.mxu1 %v4844_v0 }
 0x1b2   : > { %2200 = vmatpush.bf16.msrb.mxu2 %v4852_v1  ;;  %2213 = vmatpush.bf16.msrb.mxu3 %v4860_v2 }
 0x1b5   : > { %2175 = vmatpush.bf16.msrb.mxu0 %v4835_v3  ;;  %2188 = vmatpush.bf16.msrb.mxu1 %v4843_v4 }
 0x1b6   : > { %2201 = vmatpush.bf16.msrb.mxu2 %v4851_v5  ;;  %2214 = vmatpush.bf16.msrb.mxu3 %v4859_v6 }
 0x1b9   : > { %2176 = vmatpush.bf16.msrb.mxu0 %v4834_v7  ;;  %2189 = vmatpush.bf16.msrb.mxu1 %v4842_v8  ;;  %v4707_v8 = vld [vmem:[#allocation15 + $0x10] sm:$0xf] }
 0x1ba   : > { %2202 = vmatpush.bf16.msrb.mxu2 %v4850_v9  ;;  %2215 = vmatpush.bf16.msrb.mxu3 %v4858_v10  ;;  %v4929_v9 = vld [vmem:[#allocation15 + $0x14] sm:$0xf0] }
 0x1bb   : > { %v4708_v10 = vor.u32 %v4929_v9, %v4707_v8 }
 0x1bd   : > { %2177 = vmatpush.bf16.msrb.mxu0 %v4833_v41  ;;  %2190 = vmatpush.bf16.msrb.mxu1 %v4841_v42 }
 0x1be   : > { %2203 = vmatpush.bf16.msrb.mxu2 %v4849_v46  ;;  %2216 = vmatpush.bf16.msrb.mxu3 %v4857_v14  ;;  %v4928_v46 = vld [vmem:[#allocation15 + $0x14] sm:$0xf]  ;;  %v4709_v14 = vld [vmem:[#allocation15 + $0x18] sm:$0xf0] }
 0x1c1   : > { %2178 = vmatpush.bf16.msrb.mxu0 %v4832_v15  ;;  %2191 = vmatpush.bf16.msrb.mxu1 %v4840_v16 }
 0x1c2   : > { %2204 = vmatpush.bf16.msrb.mxu2 %v4848_v17  ;;  %2217 = vmatpush.bf16.msrb.mxu3 %v4856_v18  ;;  %v4712_v17 = vor.u32 %v4928_v46, %v4709_v14  ;;  %v4699_v18 = vld [vmem:[#allocation15] sm:$0xf] }
 0x1c5   : > { %2179 = vmatpush.bf16.msrb.mxu0 %v4831_v19  ;;  %2192 = vmatpush.bf16.msrb.mxu1 %v4839_v20  ;;  %v4927_v19 = vld [vmem:[#allocation15 + $0x4] sm:$0xf0]  ;;  %v4926_v20 = vld [vmem:[#allocation15 + $0x4] sm:$0xf] }
 0x1c6   : > { %2205 = vmatpush.bf16.msrb.mxu2 %v4847_v21  ;;  %2218 = vmatpush.bf16.msrb.mxu3 %v4855_v22  ;;  %v4700_v21 = vor.u32 %v4927_v19, %v4699_v18  ;;  %v4701_v22 = vld [vmem:[#allocation15 + $0x8] sm:$0xf0] }
 0x1c9   : > { %2180 = vmatpush.bf16.msrb.mxu0 %v4830_v50  ;;  %2193 = vmatpush.bf16.msrb.mxu1 %v4838_v56  ;;  %v4704_v50 = vor.u32 %v4926_v20, %v4701_v22 }
 0x1ca   : > { %2206 = vmatpush.bf16.msrb.mxu2 %v4846_v23  ;;  %2219 = vmatpush.bf16.msrb.mxu3 %v4854_v24 }
 0x1cc   : > { %2181 = vmatmul.bf16.vlgmr.msrb.gmra.mxu0 %v6286_v11  ;;  %2194 = vmatmul.bf16.vlgmr.msrb.gmra.mxu1 %v6288_v12  ;;  %v4866_v11 = vld [vmem:[%s7111_s30 + $0x120] sm:$0xff] }
 0x1cd   : > { %2225 = vmatpush.bf16.msra.mxu0 %v4869_v25  ;;  %2238 = vmatpush.bf16.msra.mxu1 %v4877_v26  ;;  %v4874_v12 = vld [vmem:[%s7111_s30 + $0x160] sm:$0xff]  ;;  %v6568_v26 = vld [vmem:[#allocation18 + $0x8] sm:$0xff] }
 0x1ce   : > { %2207 = vmatmul.bf16.vlgmr.msrb.gmra.mxu2 %v6290_v13  ;;  %2220 = vmatmul.bf16.vlgmr.msrb.gmra.mxu3 %v6292_v40  ;;  %v4865_v13 = vld [vmem:[%s7111_s30 + $0x118] sm:$0xff] }
 0x1cf   : > { %v4873_v40 = vld [vmem:[%s7111_s30 + $0x158] sm:$0xff]  ;;  %2300 = vmatpush.bf16.msra.mxu2 %v4708_v10  ;;  %2313 = vmatpush.bf16.msra.mxu3 %v4712_v17 }
 0x1d1   : > { %2226 = vmatpush.bf16.msra.mxu0 %v4868_v27  ;;  %2239 = vmatpush.bf16.msra.mxu1 %v4876_v28  ;;  %v6570_v27 = vld [vmem:[#allocation20 + $0x8] sm:$0xff]  ;;  %v6573_v28 = vld [vmem:[#allocation18] sm:$0xff] }
 0x1d3   : > { %2301 = vmatpush.bf16.msra.mxu2 %v4700_v21  ;;  %2314 = vmatpush.bf16.msra.mxu3 %v4704_v50 }
 0x1d5   : > { %2227 = vmatpush.bf16.msra.mxu0 %v4867_v29  ;;  %2240 = vmatpush.bf16.msra.mxu1 %v4875_v30  ;;  %v6576_v29 = vld [vmem:[#allocation20] sm:$0xff]  ;;  %v5121_v30 = vld [vmem:[#allocation14] ss:$0 sm:$0xff] }
 0x1d7   : > { %2352 = vmatpush.bf16.msrb.mxu2 %v6568_v26  ;;  %2416 = vmatpush.bf16.msrb.mxu3 %v6570_v27 }
 0x1d9   : > { %2228 = vmatpush.bf16.msra.mxu0 %v4866_v11  ;;  %2241 = vmatpush.bf16.msra.mxu1 %v4874_v12 }
 0x1db   : > { %2353 = vmatpush.bf16.msrb.mxu2 %v6573_v28  ;;  %2417 = vmatpush.bf16.msrb.mxu3 %v6576_v29 }
 0x1dd   : > { %2229 = vmatpush.bf16.msra.mxu0 %v4865_v13  ;;  %2242 = vmatpush.bf16.msra.mxu1 %v4873_v40 }
 0x1e1   : > { %2230 = vmatpush.bf16.msra.mxu0 %v4864_v31  ;;  %2243 = vmatpush.bf16.msra.mxu1 %v4872_v32 }
 0x1e5   : > { %2231 = vmatpush.bf16.msra.mxu0 %v4863_v34  ;;  %2244 = vmatpush.bf16.msra.mxu1 %v4871_v35 }
 0x1e9   : > { %2232 = vmatpush.bf16.msra.mxu0 %v4862_v38  ;;  %2245 = vmatpush.bf16.msra.mxu1 %v4870_v39 }
 0x1ec   : > { %2233 = vmatmul.bf16.vlgmr.msra.gmra.mxu0 %v6350_v36  ;;  %2246 = vmatmul.bf16.vlgmr.msra.gmra.mxu1 %v6352_v37 }
 0x1ed   : > { %2486 = vmatpush.bf16.msrb.mxu0 %v6568_v26  ;;  %2545 = vmatpush.bf16.msrb.mxu1 %v6570_v27 }
 0x1f1   : > { %2487 = vmatpush.bf16.msrb.mxu0 %v6573_v28  ;;  %2546 = vmatpush.bf16.msrb.mxu1 %v6576_v29 }
 0x1f5   : > { %2742 = vmatpush.bf16.msra.mxu0 %v6568_v26  ;;  %2801 = vmatpush.bf16.msra.mxu1 %v6570_v27 }
 0x1f9   : > { %2743 = vmatpush.bf16.msra.mxu0 %v6573_v28  ;;  %2802 = vmatpush.bf16.msra.mxu1 %v6576_v29 }
 0x208   : > { %v1252_v45 = vpop.f32.mrf.mxu0  ;;  %v1265_v47 = vpop.f32.mrf.mxu1 }
 0x209   : > { %v1266_v48 = vadd.f32 %v1265_v47, %v1252_v45 }
 0x20f   : > { %v1278_v49 = vpop.f32.mrf.mxu2  ;;  %v1291_v51 = vpop.f32.mrf.mxu3 }
 0x210   : > { %v1279_v52 = vadd.f32 %v1278_v49, %v1266_v48  ;;  %v1254_v53 = vpop.f32.mrf.mxu0  ;;  %v1267_v36 = vpop.f32.mrf.mxu1 }
 0x212   : > { %v1292_v54 = vadd.f32 %v1291_v51, %v1279_v52 }
 0x217   : > { %v1280_v37 = vpop.f32.mrf.mxu2  ;;  %v1293_v55 = vpop.f32.mrf.mxu3 }
 0x218   : > { %v1304_v33 = vpop.f32.mrf.mxu0  ;;  %v1317_v57 = vpop.f32.mrf.mxu1 }
 0x219   : > { %v1305_v58 = vadd.f32 %v1304_v33, %v1292_v54 }
 0x21b   : > { %v6566_v59 = vadd.f32 %v1317_v57, %v1305_v58 }
 0x21d   : > { %v2252_v47 = vrot.slane %v6566_v59, 7  ;;  %v5770_v59 = vmov 0  }
 0x21f   : > { %v1810_v60 = vpop.f32.mrf.mxu2  ;;  %v1823_v61 = vpop.f32.mrf.mxu3  ;;  %v2253_v36 = vsel %vm2251_vm4, 0.0, %v2252_v47 }
 0x220   : > { %v1306_v62 = vpop.f32.mrf.mxu0  ;;  %v1319_v63 = vpop.f32.mrf.mxu1  ;;  %v1824_v13 = vadd.f32 %v1823_v61, %v1810_v60  ;;  %v2264_v60 = vld [vmem:[#allocation17] sm:$0x3] }
 0x221   : > { %v2266_v61 = vperm.slane %v2264_v60, 0  ;;  %v2267_v62 = vperm.slane %v2264_v60, 1 }
 0x227   : > { %v1812_v0 = vpop.f32.mrf.mxu2  ;;  %v1825_v1 = vpop.f32.mrf.mxu3 }
 0x229   : > { %v1836_v2 = vpop.f32.mrf.mxu0  ;;  %v1849_v3 = vpop.f32.mrf.mxu1 }
 0x22a   : > { %v1837_v40 = vadd.f32 %v1836_v2, %v1824_v13 }
 0x22c   : > { %v1850_v32 = vadd.f32 %v1849_v3, %v1837_v40 }
 0x231   : > { %v1838_v6 = vpop.f32.mrf.mxu0  ;;  %v1851_v7 = vpop.f32.mrf.mxu1 }
 0x232   : > { %v1862_v4 = vpop.f32.mrf.mxu2  ;;  %v1875_v5 = vpop.f32.mrf.mxu3 }
 0x233   : > { %v1863_v35 = vadd.f32 %v1862_v4, %v1850_v32 }
 0x235   : > { %v1876_v39 = vadd.f32 %v1875_v5, %v1863_v35 }
 0x237   : > { %v2256_v52 = vrot.slane %v1876_v39, 1 }
 0x239   : > { %v2257_v37 = vsel %vm2255_vm5, 0.0, %v2256_v52 }
 0x23a   : > { %v1864_v41 = vpop.f32.mrf.mxu2  ;;  %v1877_v42 = vpop.f32.mrf.mxu3 }
 0x249   : > { %v2182_v15 = vpop.f32.mrf.mxu0  ;;  %v2195_v16 = vpop.f32.mrf.mxu1 }
 0x24a   : > { %v2183_v31 = vadd.f32 %v5121_v30, %v2182_v15 }
 0x24c   : > { %v2196_v34 = vadd.f32 %v2195_v16, %v2183_v31 }
 0x251   : > { %v2208_v56 = vpop.f32.mrf.mxu2  ;;  %v2221_v23 = vpop.f32.mrf.mxu3 }
 0x252   : > { %v2184_v24 = vpop.f32.mrf.mxu0  ;;  %v2197_v25 = vpop.f32.mrf.mxu1  ;;  %v2209_v38 = vadd.f32 %v2208_v56, %v2196_v34 }
 0x254   : > { %v2222_v45 = vadd.f32 %v2221_v23, %v2209_v38 }
 0x259   : > { %v2210_v11 = vpop.f32.mrf.mxu2  ;;  %v2223_v12 = vpop.f32.mrf.mxu3 }
 0x269   : > { %v2234_v48 = vpop.f32.mrf.mxu0  ;;  %v2247_v49 = vpop.f32.mrf.mxu1 }
 0x26a   : > { %v2235_v51 = vadd.f32 %v2234_v48, %v2222_v45 }
 0x26c   : > { %v2248_v53 = vadd.f32 %v2247_v49, %v2235_v51 }
 0x26e   : > { %v2254_v54 = vadd.f32 %v2253_v36, %v2248_v53 }
 0x270   : > { %v2258_v55 = vadd.f32 %v2257_v37, %v2254_v54 }
 0x271   : > { %v2236_v33 = vpop.f32.mrf.mxu0  ;;  %v2249_v57 = vpop.f32.mrf.mxu1 }
 0x272   : > { %v2259_v58 = vpack.c.bf16 %v2258_v55, %v2258_v55 }
 0x274   : > { %4713 = vmatmul.msk.bf16.vlgmr.msra.gmra.mxu2 %vm2290_vm6, %v2259_v58  ;;  %4714 = vmatmul.msk.bf16.vlgmr.msra.gmra.mxu3 %vm2290_vm6, %v2259_v58 }
 0x275   : > { %2614 = vmatpush.bf16.msra.mxu2 %v6568_v26  ;;  %2673 = vmatpush.bf16.msra.mxu3 %v6570_v27 }
 0x279   : > { %2615 = vmatpush.bf16.msra.mxu2 %v6573_v28  ;;  %2674 = vmatpush.bf16.msra.mxu3 %v6576_v29 }
 0x284   : > { %2354 = vmatmul.bf16.vlgmr.msrb.gmra.mxu2 %v5770_v59  ;;  %2418 = vmatmul.bf16.vlgmr.msrb.gmra.mxu3 %v5770_v59 }
 0x285   : > { %2870 = vmatpush.bf16.msrb.mxu2 %v6568_v26  ;;  %2929 = vmatpush.bf16.msrb.mxu3 %v6570_v27 }
 0x289   : > { %2871 = vmatpush.bf16.msrb.mxu2 %v6573_v28  ;;  %2930 = vmatpush.bf16.msrb.mxu3 %v6576_v29 }
 0x2f7   : > { %v2303_v63 = vpop.f32.mrf.mxu2  ;;  %v2316_v0 = vpop.f32.mrf.mxu3 }
 0x2f8   : > { %v2304_v1 = vadd.f32 %v2303_v63, %v2266_v61  ;;  %v2317_v2 = vadd.f32 %v2316_v0, %v2267_v62 }
 0x2fa   : > { %2320 = vst [vmem:[#allocation2] sm:$0xff] %v2304_v1 }
 0x2fb   : > { %2321 = vst [vmem:[#allocation2 + $0x8] sm:$0xff] %v2317_v2 }
 0x2ff   : > { %v2305_v3 = vpop.f32.mrf.mxu2  ;;  %v2318_v4 = vpop.f32.mrf.mxu3 }
 0x301   : > { %v2330_v5 = vld [vmem:[#allocation2] ss:$0 sm:$0xff]  ;;  %v2472_v3 = vld [vmem:[#allocation2 + $0x1] ss:$0 sm:$0xff] }
 0x302   : > { %v2397_v9 = vld [vmem:[#allocation2 + $0xf] ss:$0 sm:$0xff] }
 0x307   : > { %v2355_v6 = vpop.f32.mrf.mxu2  ;;  %v2419_v7 = vpop.f32.mrf.mxu3 }
 0x308   : > { %v2359_v8 = vadd.f32 %v2355_v6, %v2330_v5  ;;  %v2423_v10 = vadd.f32 %v2419_v7, %v2397_v9 }
 0x30a   : > { %5127 = vtanh.f32 %v2359_v8  ;;  %v4723_v15 = vmul.f32 -1.442695, %v2359_v8  ;;  %v4732_v16 = vmul.f32 -1.442695, %v2423_v10  ;;  %v2531_v8 = vld [vmem:[#allocation2 + $0xe] ss:$0 sm:$0xff] }
 0x30b   : > { %5129 = vtanh.f32 %v2423_v10 }
 0x30c   : > { %5131 = vpow2.f32 %v4723_v15 }
 0x30d   : > { %5133 = vpow2.f32 %v4732_v16 }
 0x30f   : > { %v2357_v41 = vpop.f32.mrf.mxu2  ;;  %v2421_v42 = vpop.f32.mrf.mxu3 }
 0x310   : > { %v5128_v46 = vpop.eup %5127 }
 0x311   : > { %2382 = vrot.lane.b32.xlu1 %v5128_v46, %s5771_s28  ;;  %v5130_v14 = vpop.eup %5129 }
 0x312   : > { %v5132_v17 = vpop.eup %5131 }
 0x313   : > { %v2363_v18 = vadd.f32 1.0, %v5132_v17  ;;  %v5134_v19 = vpop.eup %5133 }
 0x314   : > { %v2427_v20 = vadd.f32 1.0, %v5134_v19 }
 0x315   : > { %5135 = vrcp.f32 %v2363_v18  ;;  %v2375_v11 = vand.u32 2147483648, %v2363_v18  ;;  %vm2369_vm8 = vweird.f32 %v2363_v18  ;;  %v2373_v12 = vand.u32 2147483647, %v2363_v18 }
 0x316   : > { %5137 = vrcp.f32 %v2427_v20  ;;  %v2439_v39 = vand.u32 2147483648, %v2427_v20  ;;  %vm2433_vm12 = vweird.f32 %v2427_v20  ;;  %v2437_v45 = vand.u32 2147483647, %v2427_v20 }
 0x317   : > { %v2376_v31 = vor.u32 1.1754944e-38, %v2375_v11  ;;  %vm2374_vm10 = vcmp.eq.f32.partialorder %v2373_v12, 8.507059e+37 }
 0x318   : > { %v2440_v48 = vor.u32 1.1754944e-38, %v2439_v39  ;;  %vm2438_vm14 = vcmp.eq.f32.partialorder %v2437_v45, 8.507059e+37 }
 0x319   : > { %2446 = vrot.lane.b32.xlu1 %v5130_v14, %s5771_s28 }
 0x31b   : > { %v5136_v21 = vpop.eup %5135 }
 0x31c   : > { %v2365_v22 = vmul.f32 %v5136_v21, %v2363_v18  ;;  %v5138_v56 = vpop.eup %5137  ;;  %vm2370_vm7 = vweird.f32 %v5136_v21 }
 0x31d   : > { %v2429_v24 = vmul.f32 %v5138_v56, %v2427_v20  ;;  %vm2371_vm9 = vmor %vm2369_vm8, %vm2370_vm7  ;;  %vm2434_vm11 = vweird.f32 %v5138_v56 }
 0x31e   : > { %v2366_v50 = vsub.f32 1.0, %v2365_v22  ;;  %vm2435_vm13 = vmor %vm2433_vm12, %vm2434_vm11 }
 0x31f   : > { %v2430_v30 = vsub.f32 1.0, %v2429_v24 }
 0x320   : > { %v2367_v23 = vmul.f32 %v5136_v21, %v2366_v50 }
 0x321   : > { %v2431_v40 = vmul.f32 %v5138_v56, %v2430_v30 }
 0x322   : > { %v2368_v25 = vadd.f32 %v5136_v21, %v2367_v23 }
 0x323   : > { %v2432_v38 = vadd.f32 %v5138_v56, %v2431_v40 }
 0x324   : > { %v2372_v13 = vsel %vm2371_vm9, %v5136_v21, %v2368_v25 }
 0x325   : > { %v2377_v34 = vsel %vm2374_vm10, %v2376_v31, %v2372_v13  ;;  %v2436_v47 = vsel %vm2435_vm13, %v5138_v56, %v2432_v38 }
 0x326   : > { %v2441_v49 = vsel %vm2438_vm14, %v2440_v48, %v2436_v47  ;;  %v2380_v53 = vmul.f32 0.0, %v2377_v34 }
 0x327   : > { %v2444_v37 = vmul.f32 0.0, %v2441_v49 }
 0x383   : > { %v2383_v32 = vpop.permute.xlu1 %2382 }
 0x384   : > { %v2385_v35 = vmul.f32 %v2383_v32, %v2377_v34 }
 0x386   : > { %2387 = vrot.lane.b32.xlu2 %v2385_v35, %s5772_s1 }
 0x38b   : > { %v2447_v51 = vpop.permute.xlu1 %2446 }
 0x38c   : > { %v2449_v52 = vmul.f32 %v2447_v51, %v2441_v49 }
 0x38e   : > { %2451 = vrot.lane.b32.xlu2 %v2449_v52, %s5772_s1 }
 0x3e0   : > { %v2388_v36 = vpop.permute.xlu2 %2387 }
 0x3e1   : > { %v6605_v54 = vadd.f32 %v2388_v36, %v2380_v53 }
 0x3e3   : > { %5139 = vtanh.f32 %v6605_v54 }
 0x3e8   : > { %v2452_v55 = vpop.permute.xlu2 %2451 }
 0x3e9   : > { %v5140_v33 = vpop.eup %5139  ;;  %v6608_v57 = vadd.f32 %v2452_v55, %v2444_v37 }
 0x3ea   : > { %2393 = vrot.lane.b32.xlu0 %v5140_v33, %s5771_s28 }
 0x3eb   : > { %5141 = vtanh.f32 %v6608_v57 }
 0x3f1   : > { %v5142_v58 = vpop.eup %5141 }
 0x3f2   : > { %2457 = vrot.lane.b32.xlu1 %v5142_v58, %s5771_s28 }
 0x45c   : > { %v2394_v59 = vpop.permute.xlu0 %2393 }
 0x45d   : > { %v6613_v60 = vmul.f32 %v2394_v59, %v2377_v34 }
 0x45f   : > { %v2473_v61 = vpack.c.bf16 %v6613_v60, %v6613_v60 }
 0x461   : > { %2475 = vrot.lane.b32.xlu2 %v2473_v61, %s5772_s1 }
 0x464   : > { %v2458_v62 = vpop.permute.xlu1 %2457 }
 0x465   : > { %v6618_v63 = vmul.f32 %v2458_v62, %v2441_v49 }
 0x467   : > { %v2532_v0 = vpack.c.bf16 %v6618_v63, %v6618_v63 }
 0x469   : > { %2534 = vrot.lane.b32.xlu1 %v2532_v0, %s5772_s1 }
 0x4bb   : > { %v2476_v1 = vpop.permute.xlu2 %2475 }
 0x4bc   : > { %4733 = vmatmul.msk.bf16.vlgmr.msrb.gmra.mxu0 %vm2290_vm6, %v2476_v1 }
 0x4bd   : > { %2998 = vmatpush.bf16.msrb.mxu0 %v6568_v26 }
 0x4c1   : > { %2999 = vmatpush.bf16.msrb.mxu0 %v6573_v28 }
 0x4db   : > { %v2535_v2 = vpop.permute.xlu1 %2534 }
 0x4dc   : > { %4735 = vmatmul.msk.bf16.vlgmr.msrb.gmra.mxu1 %vm2290_vm6, %v2535_v2 }
 0x4dd   : > { %3057 = vmatpush.bf16.msrb.mxu1 %v6570_v27 }
 0x4e1   : > { %3058 = vmatpush.bf16.msrb.mxu1 %v6576_v29 }
 0x539   : > { %v2489_v4 = vpop.f32.mrf.mxu0 }
 0x53a   : > { %v2493_v5 = vadd.f32 %v2489_v4, %v2472_v3  ;;  %v2600_v3 = vld [vmem:[#allocation2 + $0x2] ss:$0 sm:$0xff] }
 0x53c   : > { %5143 = vtanh.f32 %v2493_v5  ;;  %v4734_v46 = vmul.f32 -1.442695, %v2493_v5 }
 0x541   : > { %v2491_v6 = vpop.f32.mrf.mxu0 }
 0x542   : > { %v5144_v7 = vpop.eup %5143 }
 0x543   : > { %2516 = vrot.lane.b32.xlu2 %v5144_v7, %s5771_s28 }
 0x559   : > { %v2548_v9 = vpop.f32.mrf.mxu1 }
 0x55a   : > { %v2552_v10 = vadd.f32 %v2548_v9, %v2531_v8  ;;  %v2659_v9 = vld [vmem:[#allocation2 + $0xd] ss:$0 sm:$0xff] }
 0x55c   : > { %5145 = vtanh.f32 %v2552_v10  ;;  %v4736_v30 = vmul.f32 -1.442695, %v2552_v10 }
 0x55d   : > { %5147 = vpow2.f32 %v4734_v46 }
 0x561   : > { %v2550_v41 = vpop.f32.mrf.mxu1 }
 0x562   : > { %v5146_v42 = vpop.eup %5145 }
 0x563   : > { %2575 = vrot.lane.b32.xlu1 %v5146_v42, %s5771_s28  ;;  %v5148_v14 = vpop.eup %5147 }
 0x564   : > { %v2497_v15 = vadd.f32 1.0, %v5148_v14 }
 0x566   : > { %5149 = vrcp.f32 %v2497_v15  ;;  %v2509_v21 = vand.u32 2147483648, %v2497_v15  ;;  %vm2503_vm0 = vweird.f32 %v2497_v15  ;;  %v2507_v22 = vand.u32 2147483647, %v2497_v15 }
 0x567   : > { %5151 = vpow2.f32 %v4736_v30 }
 0x568   : > { %v2510_v56 = vor.u32 1.1754944e-38, %v2509_v21  ;;  %vm2508_vm2 = vcmp.eq.f32.partialorder %v2507_v22, 8.507059e+37 }
 0x56c   : > { %v5150_v16 = vpop.eup %5149 }
 0x56d   : > { %v2499_v17 = vmul.f32 %v5150_v16, %v2497_v15  ;;  %vm2504_vm15 = vweird.f32 %v5150_v16  ;;  %v5152_v11 = vpop.eup %5151 }
 0x56e   : > { %vm2505_vm1 = vmor %vm2503_vm0, %vm2504_vm15  ;;  %v2556_v12 = vadd.f32 1.0, %v5152_v11 }
 0x56f   : > { %v2500_v18 = vsub.f32 1.0, %v2499_v17 }
 0x570   : > { %5153 = vrcp.f32 %v2556_v12  ;;  %v2568_v35 = vand.u32 2147483648, %v2556_v12  ;;  %vm2562_vm4 = vweird.f32 %v2556_v12  ;;  %v2566_v38 = vand.u32 2147483647, %v2556_v12 }
 0x571   : > { %v2501_v19 = vmul.f32 %v5150_v16, %v2500_v18 }
 0x572   : > { %v2569_v45 = vor.u32 1.1754944e-38, %v2568_v35  ;;  %vm2567_vm7 = vcmp.eq.f32.partialorder %v2566_v38, 8.507059e+37 }
 0x573   : > { %v2502_v20 = vadd.f32 %v5150_v16, %v2501_v19 }
 0x575   : > { %v2506_v50 = vsel %vm2505_vm1, %v5150_v16, %v2502_v20 }
 0x576   : > { %v2511_v24 = vsel %vm2508_vm2, %v2510_v56, %v2506_v50  ;;  %v5154_v13 = vpop.eup %5153 }
 0x577   : > { %v2558_v40 = vmul.f32 %v5154_v13, %v2556_v12  ;;  %vm2563_vm3 = vweird.f32 %v5154_v13  ;;  %v2514_v51 = vmul.f32 %v2511_v24, %v6605_v54 }
 0x578   : > { %vm2564_vm5 = vmor %vm2562_vm4, %vm2563_vm3 }
 0x579   : > { %v2559_v31 = vsub.f32 1.0, %v2558_v40 }
 0x57b   : > { %v2560_v32 = vmul.f32 %v5154_v13, %v2559_v31 }
 0x57d   : > { %v2561_v34 = vadd.f32 %v5154_v13, %v2560_v32 }
 0x57f   : > { %v2565_v39 = vsel %vm2564_vm5, %v5154_v13, %v2561_v34 }
 0x580   : > { %v2570_v48 = vsel %vm2567_vm7, %v2569_v45, %v2565_v39 }
 0x581   : > { %v2573_v37 = vmul.f32 %v2570_v48, %v6608_v57 }
 0x59d   : > { %v2517_v23 = vpop.permute.xlu2 %2516 }
 0x59e   : > { %v2519_v25 = vmul.f32 %v2517_v23, %v2511_v24 }
 0x5a0   : > { %2521 = vrot.lane.b32.xlu2 %v2519_v25, %s5772_s1 }
 0x5d5   : > { %v2576_v47 = vpop.permute.xlu1 %2575 }
 0x5d6   : > { %v2578_v49 = vmul.f32 %v2576_v47, %v2570_v48 }
 0x5d8   : > { %2580 = vrot.lane.b32.xlu0 %v2578_v49, %s5772_s1 }
 0x5fa   : > { %v2522_v52 = vpop.permute.xlu2 %2521 }
 0x5fb   : > { %v6634_v53 = vadd.f32 %v2522_v52, %v2514_v51 }
 0x5fd   : > { %5155 = vtanh.f32 %v6634_v53 }
 0x603   : > { %v5156_v36 = vpop.eup %5155 }
 0x604   : > { %2527 = vrot.lane.b32.xlu1 %v5156_v36, %s5771_s28 }
 0x64a   : > { %v2581_v55 = vpop.permute.xlu0 %2580 }
 0x64b   : > { %v6639_v33 = vadd.f32 %v2581_v55, %v2573_v37 }
 0x64d   : > { %5157 = vtanh.f32 %v6639_v33 }
 0x653   : > { %v5158_v58 = vpop.eup %5157 }
 0x654   : > { %2586 = vrot.lane.b32.xlu2 %v5158_v58, %s5771_s28 }
 0x676   : > { %v2528_v59 = vpop.permute.xlu1 %2527 }
 0x677   : > { %v6643_v54 = vmul.f32 %v2528_v59, %v2511_v24 }
 0x679   : > { %v2601_v61 = vpack.c.bf16 %v6643_v54, %v6643_v54 }
 0x67b   : > { %2603 = vrot.lane.b32.xlu0 %v2601_v61, %s5772_s1 }
 0x6ae   : > { %v2587_v62 = vpop.permute.xlu2 %2586 }
 0x6af   : > { %v6648_v0 = vmul.f32 %v2587_v62, %v2570_v48 }
 0x6b1   : > { %v2660_v57 = vpack.c.bf16 %v6648_v0, %v6648_v0 }
 0x6b3   : > { %2662 = vrot.lane.b32.xlu1 %v2660_v57, %s5772_s1 }
 0x6ed   : > { %v2604_v1 = vpop.permute.xlu0 %2603 }
 0x6ee   : > { %4737 = vmatmul.msk.bf16.vlgmr.msra.gmra.mxu2 %vm2290_vm6, %v2604_v1 }
 0x6ef   : > { %3126 = vmatpush.bf16.msra.mxu2 %v6568_v26 }
 0x6f3   : > { %3127 = vmatpush.bf16.msra.mxu2 %v6573_v28 }
 0x725   : > { %v2663_v2 = vpop.permute.xlu1 %2662 }
 0x726   : > { %4739 = vmatmul.msk.bf16.vlgmr.msra.gmra.mxu3 %vm2290_vm6, %v2663_v2 }
 0x727   : > { %3185 = vmatpush.bf16.msra.mxu3 %v6570_v27 }
 0x72b   : > { %3186 = vmatpush.bf16.msra.mxu3 %v6576_v29 }
 0x771   : > { %v2617_v4 = vpop.f32.mrf.mxu2 }
 0x772   : > { %v2621_v5 = vadd.f32 %v2617_v4, %v2600_v3 }
 0x774   : > { %5159 = vtanh.f32 %v2621_v5  ;;  %v4738_v8 = vmul.f32 -1.442695, %v2621_v5  ;;  %v2728_v5 = vld [vmem:[#allocation2 + $0x3] ss:$0 sm:$0xff] }
 0x776   : > { %5161 = vpow2.f32 %v4738_v8 }
 0x779   : > { %v2619_v6 = vpop.f32.mrf.mxu2 }
 0x77a   : > { %v5160_v7 = vpop.eup %5159 }
 0x77b   : > { %2644 = vrot.lane.b32.xlu2 %v5160_v7, %s5771_s28 }
 0x77c   : > { %v5162_v42 = vpop.eup %5161 }
 0x77d   : > { %v2625_v15 = vadd.f32 1.0, %v5162_v42 }
 0x77f   : > { %v2637_v21 = vand.u32 2147483648, %v2625_v15  ;;  %vm2631_vm9 = vweird.f32 %v2625_v15  ;;  %v2635_v22 = vand.u32 2147483647, %v2625_v15 }
 0x781   : > { %v2638_v56 = vor.u32 1.1754944e-38, %v2637_v21  ;;  %vm2636_vm11 = vcmp.eq.f32.partialorder %v2635_v22, 8.507059e+37 }
 0x7a9   : > { %v2676_v10 = vpop.f32.mrf.mxu3 }
 0x7aa   : > { %v2680_v41 = vadd.f32 %v2676_v10, %v2659_v9 }
 0x7ac   : > { %5163 = vtanh.f32 %v2680_v41  ;;  %v4740_v30 = vmul.f32 -1.442695, %v2680_v41  ;;  %v2787_v41 = vld [vmem:[#allocation2 + $0xc] ss:$0 sm:$0xff] }
 0x7ad   : > { %5165 = vrcp.f32 %v2625_v15 }
 0x7ae   : > { %5167 = vpow2.f32 %v4740_v30 }
 0x7b1   : > { %v2678_v46 = vpop.f32.mrf.mxu3 }
 0x7b2   : > { %v5164_v14 = vpop.eup %5163 }
 0x7b3   : > { %2703 = vrot.lane.b32.xlu0 %v5164_v14, %s5771_s28  ;;  %v5166_v16 = vpop.eup %5165 }
 0x7b4   : > { %v2627_v17 = vmul.f32 %v5166_v16, %v2625_v15  ;;  %vm2632_vm8 = vweird.f32 %v5166_v16  ;;  %v5168_v11 = vpop.eup %5167 }
 0x7b5   : > { %vm2633_vm10 = vmor %vm2631_vm9, %vm2632_vm8  ;;  %v2684_v12 = vadd.f32 1.0, %v5168_v11 }
 0x7b6   : > { %v2628_v18 = vsub.f32 1.0, %v2627_v17 }
 0x7b7   : > { %5169 = vrcp.f32 %v2684_v12  ;;  %v2696_v35 = vand.u32 2147483648, %v2684_v12  ;;  %vm2690_vm13 = vweird.f32 %v2684_v12  ;;  %v2694_v38 = vand.u32 2147483647, %v2684_v12 }
 0x7b8   : > { %v2629_v19 = vmul.f32 %v5166_v16, %v2628_v18 }
 0x7b9   : > { %v2697_v45 = vor.u32 1.1754944e-38, %v2696_v35  ;;  %vm2695_vm15 = vcmp.eq.f32.partialorder %v2694_v38, 8.507059e+37 }
 0x7ba   : > { %v2630_v20 = vadd.f32 %v5166_v16, %v2629_v19 }
 0x7bc   : > { %v2634_v50 = vsel %vm2633_vm10, %v5166_v16, %v2630_v20 }
 0x7bd   : > { %v2639_v24 = vsel %vm2636_vm11, %v2638_v56, %v2634_v50  ;;  %v5170_v13 = vpop.eup %5169 }
 0x7be   : > { %v2686_v40 = vmul.f32 %v5170_v13, %v2684_v12  ;;  %vm2691_vm12 = vweird.f32 %v5170_v13  ;;  %v2642_v51 = vmul.f32 %v2639_v24, %v6634_v53 }
 0x7bf   : > { %vm2692_vm14 = vmor %vm2690_vm13, %vm2691_vm12 }
 0x7c0   : > { %v2687_v31 = vsub.f32 1.0, %v2686_v40 }
 0x7c2   : > { %v2688_v32 = vmul.f32 %v5170_v13, %v2687_v31 }
 0x7c4   : > { %v2689_v34 = vadd.f32 %v5170_v13, %v2688_v32 }
 0x7c6   : > { %v2693_v39 = vsel %vm2692_vm14, %v5170_v13, %v2689_v34 }
 0x7c7   : > { %v2698_v47 = vsel %vm2695_vm15, %v2697_v45, %v2693_v39 }
 0x7c8   : > { %v2701_v55 = vmul.f32 %v2698_v47, %v6639_v33 }
 0x7d5   : > { %v2645_v23 = vpop.permute.xlu2 %2644 }
 0x7d6   : > { %v2647_v25 = vmul.f32 %v2645_v23, %v2639_v24 }
 0x7d8   : > { %2649 = vrot.lane.b32.xlu1 %v2647_v25, %s5772_s1 }
 0x825   : > { %v2704_v48 = vpop.permute.xlu0 %2703 }
 0x826   : > { %v2706_v49 = vmul.f32 %v2704_v48, %v2698_v47 }
 0x828   : > { %2708 = vrot.lane.b32.xlu2 %v2706_v49, %s5772_s1 }
 0x84a   : > { %v2650_v52 = vpop.permute.xlu1 %2649 }
 0x84b   : > { %v6664_v36 = vadd.f32 %v2650_v52, %v2642_v51 }
 0x84d   : > { %5171 = vtanh.f32 %v6664_v36 }
 0x853   : > { %v5172_v37 = vpop.eup %5171 }
 0x854   : > { %2655 = vrot.lane.b32.xlu0 %v5172_v37, %s5771_s28 }
 0x882   : > { %v2709_v58 = vpop.permute.xlu2 %2708 }
 0x883   : > { %v6669_v59 = vadd.f32 %v2709_v58, %v2701_v55 }
 0x885   : > { %5173 = vtanh.f32 %v6669_v59 }
 0x88b   : > { %v5174_v61 = vpop.eup %5173 }
 0x88c   : > { %2714 = vrot.lane.b32.xlu1 %v5174_v61, %s5771_s28 }
 0x8c6   : > { %v2656_v62 = vpop.permute.xlu0 %2655 }
 0x8c7   : > { %v6673_v53 = vmul.f32 %v2656_v62, %v2639_v24 }
 0x8c9   : > { %v2729_v57 = vpack.c.bf16 %v6673_v53, %v6673_v53 }
 0x8cb   : > { %2731 = vrot.lane.b32.xlu2 %v2729_v57, %s5772_s1 }
 0x8fe   : > { %v2715_v1 = vpop.permute.xlu1 %2714 }
 0x8ff   : > { %v6678_v2 = vmul.f32 %v2715_v1, %v2698_v47 }
 0x901   : > { %v2788_v33 = vpack.c.bf16 %v6678_v2, %v6678_v2 }
 0x903   : > { %2790 = vrot.lane.b32.xlu0 %v2788_v33, %s5772_s1 }
 0x925   : > { %v2732_v3 = vpop.permute.xlu2 %2731 }
 0x926   : > { %4741 = vmatmul.msk.bf16.vlgmr.msra.gmra.mxu0 %vm2290_vm6, %v2732_v3 }
 0x927   : > { %3254 = vmatpush.bf16.msra.mxu0 %v6568_v26 }
 0x92b   : > { %3255 = vmatpush.bf16.msra.mxu0 %v6573_v28 }
 0x975   : > { %v2791_v4 = vpop.permute.xlu0 %2790 }
 0x976   : > { %4743 = vmatmul.msk.bf16.vlgmr.msra.gmra.mxu1 %vm2290_vm6, %v2791_v4 }
 0x977   : > { %3313 = vmatpush.bf16.msra.mxu1 %v6570_v27 }
 0x97b   : > { %3314 = vmatpush.bf16.msra.mxu1 %v6576_v29 }
 0x9a3   : > { %v2745_v6 = vpop.f32.mrf.mxu0 }
 0x9a4   : > { %v2749_v7 = vadd.f32 %v2745_v6, %v2728_v5  ;;  %v2856_v5 = vld [vmem:[#allocation2 + $0x4] ss:$0 sm:$0xff] }
 0x9a6   : > { %5175 = vtanh.f32 %v2749_v7  ;;  %v4742_v10 = vmul.f32 -1.442695, %v2749_v7 }
 0x9a8   : > { %5177 = vpow2.f32 %v4742_v10  ;;  %v2915_v10 = vld [vmem:[#allocation2 + $0xb] ss:$0 sm:$0xff] }
 0x9ab   : > { %v2747_v8 = vpop.f32.mrf.mxu0 }
 0x9ac   : > { %v5176_v9 = vpop.eup %5175 }
 0x9ad   : > { %2772 = vrot.lane.b32.xlu1 %v5176_v9, %s5771_s28 }
 0x9ae   : > { %v5178_v28 = vpop.eup %5177 }
 0x9af   : > { %v2753_v27 = vadd.f32 1.0, %v5178_v28 }
 0x9b1   : > { %v2765_v19 = vand.u32 2147483648, %v2753_v27  ;;  %vm2759_vm1 = vweird.f32 %v2753_v27  ;;  %v2763_v20 = vand.u32 2147483647, %v2753_v27 }
 0x9b3   : > { %v2766_v22 = vor.u32 1.1754944e-38, %v2765_v19  ;;  %vm2764_vm3 = vcmp.eq.f32.partialorder %v2763_v20, 8.507059e+37 }
 0x9f3   : > { %v2804_v26 = vpop.f32.mrf.mxu1 }
 0x9f4   : > { %v2808_v42 = vadd.f32 %v2804_v26, %v2787_v41 }
 0x9f6   : > { %5179 = vtanh.f32 %v2808_v42  ;;  %v4744_v24 = vmul.f32 -1.442695, %v2808_v42 }
 0x9f7   : > { %5181 = vrcp.f32 %v2753_v27 }
 0x9f8   : > { %5183 = vpow2.f32 %v4744_v24 }
 0x9fb   : > { %v2806_v46 = vpop.f32.mrf.mxu1 }
 0x9fc   : > { %v5180_v14 = vpop.eup %5179 }
 0x9fd   : > { %2831 = vrot.lane.b32.xlu2 %v5180_v14, %s5771_s28  ;;  %v5182_v29 = vpop.eup %5181 }
 0x9fe   : > { %v2755_v15 = vmul.f32 %v5182_v29, %v2753_v27  ;;  %vm2760_vm0 = vweird.f32 %v5182_v29  ;;  %v5184_v25 = vpop.eup %5183 }
 0x9ff   : > { %vm2761_vm2 = vmor %vm2759_vm1, %vm2760_vm0  ;;  %v2812_v30 = vadd.f32 1.0, %v5184_v25 }
 0xa00   : > { %v2756_v16 = vsub.f32 1.0, %v2755_v15 }
 0xa01   : > { %5185 = vrcp.f32 %v2812_v30  ;;  %v2824_v32 = vand.u32 2147483648, %v2812_v30  ;;  %vm2818_vm5 = vweird.f32 %v2812_v30  ;;  %v2822_v34 = vand.u32 2147483647, %v2812_v30 }
 0xa02   : > { %v2757_v17 = vmul.f32 %v5182_v29, %v2756_v16 }
 0xa03   : > { %v2825_v38 = vor.u32 1.1754944e-38, %v2824_v32  ;;  %vm2823_vm8 = vcmp.eq.f32.partialorder %v2822_v34, 8.507059e+37 }
 0xa04   : > { %v2758_v18 = vadd.f32 %v5182_v29, %v2757_v17 }
 0xa06   : > { %v2762_v21 = vsel %vm2761_vm2, %v5182_v29, %v2758_v18 }
 0xa07   : > { %v2767_v56 = vsel %vm2764_vm3, %v2766_v22, %v2762_v21  ;;  %v5186_v11 = vpop.eup %5185 }
 0xa08   : > { %v2814_v12 = vmul.f32 %v5186_v11, %v2812_v30  ;;  %vm2819_vm4 = vweird.f32 %v5186_v11  ;;  %v2770_v48 = vmul.f32 %v2767_v56, %v6664_v36 }
 0xa09   : > { %vm2820_vm7 = vmor %vm2818_vm5, %vm2819_vm4 }
 0xa0a   : > { %v2815_v13 = vsub.f32 1.0, %v2814_v12 }
 0xa0c   : > { %v2816_v40 = vmul.f32 %v5186_v11, %v2815_v13 }
 0xa0e   : > { %v2817_v31 = vadd.f32 %v5186_v11, %v2816_v40 }
 0xa10   : > { %v2821_v35 = vsel %vm2820_vm7, %v5186_v11, %v2817_v31 }
 0xa11   : > { %v2826_v45 = vsel %vm2823_vm8, %v2825_v38, %v2821_v35 }
 0xa12   : > { %v2829_v37 = vmul.f32 %v2826_v45, %v6669_v59 }
 0xa1f   : > { %v2773_v50 = vpop.permute.xlu1 %2772 }
 0xa20   : > { %v2775_v23 = vmul.f32 %v2773_v50, %v2767_v56 }
 0xa22   : > { %2777 = vrot.lane.b32.xlu0 %v2775_v23, %s5772_s1 }
 0xa57   : > { %v2832_v39 = vpop.permute.xlu2 %2831 }
 0xa58   : > { %v2834_v47 = vmul.f32 %v2832_v39, %v2826_v45 }
 0xa5a   : > { %2836 = vrot.lane.b32.xlu1 %v2834_v47, %s5772_s1 }
 0xa94   : > { %v2778_v49 = vpop.permute.xlu0 %2777 }
 0xa95   : > { %v6694_v51 = vadd.f32 %v2778_v49, %v2770_v48 }
 0xa97   : > { %5187 = vtanh.f32 %v6694_v51 }
 0xa9d   : > { %v5188_v52 = vpop.eup %5187 }
 0xa9e   : > { %2783 = vrot.lane.b32.xlu2 %v5188_v52, %s5771_s28 }
 0xacc   : > { %v2837_v55 = vpop.permute.xlu1 %2836 }
 0xacd   : > { %v6699_v58 = vadd.f32 %v2837_v55, %v2829_v37 }
 0xacf   : > { %5189 = vtanh.f32 %v6699_v58 }
 0xad5   : > { %v5190_v61 = vpop.eup %5189 }
 0xad6   : > { %2842 = vrot.lane.b32.xlu0 %v5190_v61, %s5771_s28 }
 0xaf8   : > { %v2784_v62 = vpop.permute.xlu2 %2783 }
 0xaf9   : > { %v6703_v36 = vmul.f32 %v2784_v62, %v2767_v56 }
 0xafb   : > { %v2857_v57 = vpack.c.bf16 %v6703_v36, %v6703_v36 }
 0xafd   : > { %2859 = vrot.lane.b32.xlu1 %v2857_v57, %s5772_s1 }
 0xb48   : > { %v2843_v1 = vpop.permute.xlu0 %2842 }
 0xb49   : > { %v6708_v33 = vmul.f32 %v2843_v1, %v2826_v45 }
 0xb4b   : > { %v2916_v59 = vpack.c.bf16 %v6708_v33, %v6708_v33 }
 0xb4d   : > { %2918 = vrot.lane.b32.xlu2 %v2916_v59, %s5772_s1 }
 0xb6f   : > { %v2860_v3 = vpop.permute.xlu1 %2859 }
 0xb70   : > { %4745 = vmatmul.msk.bf16.vlgmr.msrb.gmra.mxu2 %vm2290_vm6, %v2860_v3 }
 0xba7   : > { %v2919_v4 = vpop.permute.xlu2 %2918 }
 0xba8   : > { %4747 = vmatmul.msk.bf16.vlgmr.msrb.gmra.mxu3 %vm2290_vm6, %v2919_v4 }
 0xbf3   : > { %v2873_v6 = vpop.f32.mrf.mxu2 }
 0xbf4   : > { %v2877_v7 = vadd.f32 %v2873_v6, %v2856_v5 }
 0xbf6   : > { %5191 = vtanh.f32 %v2877_v7  ;;  %v4746_v46 = vmul.f32 -1.442695, %v2877_v7  ;;  %v2984_v7 = vld [vmem:[#allocation2 + $0x5] ss:$0 sm:$0xff] }
 0xbfb   : > { %v2875_v8 = vpop.f32.mrf.mxu2 }
 0xbfc   : > { %v5192_v9 = vpop.eup %5191 }
 0xbfd   : > { %2900 = vrot.lane.b32.xlu0 %v5192_v9, %s5771_s28 }
 0xc2b   : > { %v2932_v41 = vpop.f32.mrf.mxu3 }
 0xc2c   : > { %v2936_v26 = vadd.f32 %v2932_v41, %v2915_v10 }
 0xc2e   : > { %5193 = vtanh.f32 %v2936_v26  ;;  %v4748_v24 = vmul.f32 -1.442695, %v2936_v26 }
 0xc2f   : > { %5195 = vpow2.f32 %v4746_v46 }
 0xc33   : > { %v2934_v42 = vpop.f32.mrf.mxu3 }
 0xc34   : > { %v5194_v28 = vpop.eup %5193  ;;  %v3043_v42 = vld [vmem:[#allocation2 + $0xa] ss:$0 sm:$0xff] }
 0xc35   : > { %2959 = vrot.lane.b32.xlu1 %v5194_v28, %s5771_s28  ;;  %v5196_v14 = vpop.eup %5195 }
 0xc36   : > { %v2881_v27 = vadd.f32 1.0, %v5196_v14 }
 0xc38   : > { %5197 = vrcp.f32 %v2881_v27  ;;  %v2893_v19 = vand.u32 2147483648, %v2881_v27  ;;  %vm2887_vm10 = vweird.f32 %v2881_v27  ;;  %v2891_v20 = vand.u32 2147483647, %v2881_v27 }
 0xc39   : > { %5199 = vpow2.f32 %v4748_v24 }
 0xc3a   : > { %v2894_v22 = vor.u32 1.1754944e-38, %v2893_v19  ;;  %vm2892_vm12 = vcmp.eq.f32.partialorder %v2891_v20, 8.507059e+37 }
 0xc3e   : > { %v5198_v29 = vpop.eup %5197 }
 0xc3f   : > { %v2883_v15 = vmul.f32 %v5198_v29, %v2881_v27  ;;  %vm2888_vm9 = vweird.f32 %v5198_v29  ;;  %v5200_v25 = vpop.eup %5199 }
 0xc40   : > { %vm2889_vm11 = vmor %vm2887_vm10, %vm2888_vm9  ;;  %v2940_v30 = vadd.f32 1.0, %v5200_v25 }
 0xc41   : > { %v2884_v16 = vsub.f32 1.0, %v2883_v15 }
 0xc42   : > { %5201 = vrcp.f32 %v2940_v30  ;;  %v2952_v32 = vand.u32 2147483648, %v2940_v30  ;;  %vm2946_vm14 = vweird.f32 %v2940_v30  ;;  %v2950_v34 = vand.u32 2147483647, %v2940_v30 }
 0xc43   : > { %v2885_v17 = vmul.f32 %v5198_v29, %v2884_v16 }
 0xc44   : > { %v2953_v38 = vor.u32 1.1754944e-38, %v2952_v32  ;;  %vm2951_vm0 = vcmp.eq.f32.partialorder %v2950_v34, 8.507059e+37 }
 0xc45   : > { %v2886_v18 = vadd.f32 %v5198_v29, %v2885_v17 }
 0xc47   : > { %v2890_v21 = vsel %vm2889_vm11, %v5198_v29, %v2886_v18 }
 0xc48   : > { %v2895_v50 = vsel %vm2892_vm12, %v2894_v22, %v2890_v21  ;;  %v5202_v11 = vpop.eup %5201 }
 0xc49   : > { %v2942_v12 = vmul.f32 %v5202_v11, %v2940_v30  ;;  %vm2947_vm13 = vweird.f32 %v5202_v11  ;;  %v2898_v48 = vmul.f32 %v2895_v50, %v6694_v51 }
 0xc4a   : > { %vm2948_vm15 = vmor %vm2946_vm14, %vm2947_vm13 }
 0xc4b   : > { %v2943_v13 = vsub.f32 1.0, %v2942_v12 }
 0xc4d   : > { %v2944_v40 = vmul.f32 %v5202_v11, %v2943_v13 }
 0xc4f   : > { %v2945_v31 = vadd.f32 %v5202_v11, %v2944_v40 }
 0xc51   : > { %v2949_v35 = vsel %vm2948_vm15, %v5202_v11, %v2945_v31 }
 0xc52   : > { %v2954_v45 = vsel %vm2951_vm0, %v2953_v38, %v2949_v35 }
 0xc53   : > { %v2957_v55 = vmul.f32 %v2954_v45, %v6699_v58 }
 0xc6f   : > { %v2901_v56 = vpop.permute.xlu0 %2900 }
 0xc70   : > { %v2903_v23 = vmul.f32 %v2901_v56, %v2895_v50 }
 0xc72   : > { %2905 = vrot.lane.b32.xlu2 %v2903_v23, %s5772_s1 }
 0xca7   : > { %v2960_v39 = vpop.permute.xlu1 %2959 }
 0xca8   : > { %v2962_v47 = vmul.f32 %v2960_v39, %v2954_v45 }
 0xcaa   : > { %2964 = vrot.lane.b32.xlu0 %v2962_v47, %s5772_s1 }
 0xccc   : > { %v2906_v49 = vpop.permute.xlu2 %2905 }
 0xccd   : > { %v6720_v52 = vadd.f32 %v2906_v49, %v2898_v48 }
 0xccf   : > { %5203 = vtanh.f32 %v6720_v52 }
 0xcd5   : > { %v5204_v37 = vpop.eup %5203 }
 0xcd6   : > { %2911 = vrot.lane.b32.xlu1 %v5204_v37, %s5771_s28 }
 0xd1c   : > { %v2965_v61 = vpop.permute.xlu0 %2964 }
 0xd1d   : > { %v6725_v62 = vadd.f32 %v2965_v61, %v2957_v55 }
 0xd1f   : > { %5205 = vtanh.f32 %v6725_v62 }
 0xd25   : > { %v5206_v57 = vpop.eup %5205 }
 0xd26   : > { %2970 = vrot.lane.b32.xlu2 %v5206_v57, %s5771_s28 }
 0xd48   : > { %v2912_v1 = vpop.permute.xlu1 %2911 }
 0xd49   : > { %v6729_v51 = vmul.f32 %v2912_v1, %v2895_v50 }
 0xd4b   : > { %v2985_v59 = vpack.c.bf16 %v6729_v51, %v6729_v51 }
 0xd4d   : > { %2987 = vrot.lane.b32.xlu0 %v2985_v59, %s5772_s1 }
 0xd80   : > { %v2971_v3 = vpop.permute.xlu2 %2970 }
 0xd81   : > { %v6734_v4 = vmul.f32 %v2971_v3, %v2954_v45 }
 0xd83   : > { %v3044_v58 = vpack.c.bf16 %v6734_v4, %v6734_v4 }
 0xd85   : > { %3046 = vrot.lane.b32.xlu1 %v3044_v58, %s5772_s1 }
 0xdbf   : > { %v2988_v5 = vpop.permute.xlu0 %2987 }
 0xdc0   : > { %4749 = vmatmul.msk.bf16.vlgmr.msrb.gmra.mxu0 %vm2290_vm6, %v2988_v5 }
 0xdf7   : > { %v3047_v6 = vpop.permute.xlu1 %3046 }
 0xdf8   : > { %4751 = vmatmul.msk.bf16.vlgmr.msrb.gmra.mxu1 %vm2290_vm6, %v3047_v6 }
 0xe3d   : > { %v3001_v8 = vpop.f32.mrf.mxu0 }
 0xe3e   : > { %v3005_v9 = vadd.f32 %v3001_v8, %v2984_v7 }
 0xe40   : > { %5207 = vtanh.f32 %v3005_v9  ;;  %v4750_v26 = vmul.f32 -1.442695, %v3005_v9 }
 0xe42   : > { %5209 = vpow2.f32 %v4750_v26 }
 0xe45   : > { %v3003_v10 = vpop.f32.mrf.mxu0 }
 0xe46   : > { %v5208_v41 = vpop.eup %5207 }
 0xe47   : > { %3028 = vrot.lane.b32.xlu2 %v5208_v41, %s5771_s28  ;;  %v3112_v41 = vld [vmem:[#allocation2 + $0x6] ss:$0 sm:$0xff] }
 0xe48   : > { %v5210_v14 = vpop.eup %5209 }
 0xe49   : > { %v3009_v15 = vadd.f32 1.0, %v5210_v14 }
 0xe4b   : > { %v3021_v21 = vand.u32 2147483648, %v3009_v15  ;;  %vm3015_vm2 = vweird.f32 %v3009_v15  ;;  %v3019_v22 = vand.u32 2147483647, %v3009_v15 }
 0xe4d   : > { %v3022_v56 = vor.u32 1.1754944e-38, %v3021_v21  ;;  %vm3020_vm4 = vcmp.eq.f32.partialorder %v3019_v22, 8.507059e+37 }
 0xe75   : > { %v3060_v28 = vpop.f32.mrf.mxu1 }
 0xe76   : > { %v3064_v46 = vadd.f32 %v3060_v28, %v3043_v42 }
 0xe78   : > { %5211 = vtanh.f32 %v3064_v46  ;;  %v4752_v30 = vmul.f32 -1.442695, %v3064_v46 }
 0xe79   : > { %5213 = vrcp.f32 %v3009_v15 }
 0xe7a   : > { %5215 = vpow2.f32 %v4752_v30 }
 0xe7d   : > { %v3062_v27 = vpop.f32.mrf.mxu1 }
 0xe7e   : > { %v5212_v29 = vpop.eup %5211  ;;  %v3171_v27 = vld [vmem:[#allocation2 + $0x9] ss:$0 sm:$0xff] }
 0xe7f   : > { %3087 = vrot.lane.b32.xlu0 %v5212_v29, %s5771_s28  ;;  %v5214_v16 = vpop.eup %5213 }
 0xe80   : > { %v3011_v17 = vmul.f32 %v5214_v16, %v3009_v15  ;;  %vm3016_vm1 = vweird.f32 %v5214_v16  ;;  %v5216_v11 = vpop.eup %5215 }
 0xe81   : > { %vm3017_vm3 = vmor %vm3015_vm2, %vm3016_vm1  ;;  %v3068_v12 = vadd.f32 1.0, %v5216_v11 }
 0xe82   : > { %v3012_v18 = vsub.f32 1.0, %v3011_v17 }
 0xe83   : > { %5217 = vrcp.f32 %v3068_v12  ;;  %v3080_v35 = vand.u32 2147483648, %v3068_v12  ;;  %vm3074_vm7 = vweird.f32 %v3068_v12  ;;  %v3078_v38 = vand.u32 2147483647, %v3068_v12 }
 0xe84   : > { %v3013_v19 = vmul.f32 %v5214_v16, %v3012_v18 }
 0xe85   : > { %v3081_v45 = vor.u32 1.1754944e-38, %v3080_v35  ;;  %vm3079_vm9 = vcmp.eq.f32.partialorder %v3078_v38, 8.507059e+37 }
 0xe86   : > { %v3014_v20 = vadd.f32 %v5214_v16, %v3013_v19 }
 0xe88   : > { %v3018_v50 = vsel %vm3017_vm3, %v5214_v16, %v3014_v20 }
 0xe89   : > { %v3023_v24 = vsel %vm3020_vm4, %v3022_v56, %v3018_v50  ;;  %v5218_v13 = vpop.eup %5217 }
 0xe8a   : > { %v3070_v40 = vmul.f32 %v5218_v13, %v3068_v12  ;;  %vm3075_vm5 = vweird.f32 %v5218_v13  ;;  %v3026_v37 = vmul.f32 %v3023_v24, %v6720_v52 }
 0xe8b   : > { %vm3076_vm8 = vmor %vm3074_vm7, %vm3075_vm5 }
 0xe8c   : > { %v3071_v31 = vsub.f32 1.0, %v3070_v40 }
 0xe8e   : > { %v3072_v32 = vmul.f32 %v5218_v13, %v3071_v31 }
 0xe90   : > { %v3073_v34 = vadd.f32 %v5218_v13, %v3072_v32 }
 0xe92   : > { %v3077_v39 = vsel %vm3076_vm8, %v5218_v13, %v3073_v34 }
 0xe93   : > { %v3082_v47 = vsel %vm3079_vm9, %v3081_v45, %v3077_v39 }
 0xe94   : > { %v3085_v1 = vmul.f32 %v3082_v47, %v6725_v62 }
 0xea1   : > { %v3029_v23 = vpop.permute.xlu2 %3028 }
 0xea2   : > { %v3031_v25 = vmul.f32 %v3029_v23, %v3023_v24 }
 0xea4   : > { %3033 = vrot.lane.b32.xlu1 %v3031_v25, %s5772_s1 }
 0xef1   : > { %v3088_v48 = vpop.permute.xlu0 %3087 }
 0xef2   : > { %v3090_v49 = vmul.f32 %v3088_v48, %v3082_v47 }
 0xef4   : > { %3092 = vrot.lane.b32.xlu2 %v3090_v49, %s5772_s1 }
 0xf16   : > { %v3034_v55 = vpop.permute.xlu1 %3033 }
 0xf17   : > { %v6746_v61 = vadd.f32 %v3034_v55, %v3026_v37 }
 0xf19   : > { %5219 = vtanh.f32 %v6746_v61 }
 0xf1f   : > { %v5220_v57 = vpop.eup %5219 }
 0xf20   : > { %3039 = vrot.lane.b32.xlu0 %v5220_v57, %s5771_s28 }
 0xf4e   : > { %v3093_v59 = vpop.permute.xlu2 %3092 }
 0xf4f   : > { %v6751_v3 = vadd.f32 %v3093_v59, %v3085_v1 }
 0xf51   : > { %5221 = vtanh.f32 %v6751_v3 }
 0xf57   : > { %v5222_v58 = vpop.eup %5221 }
 0xf58   : > { %3098 = vrot.lane.b32.xlu1 %v5222_v58, %s5771_s28 }
 0xf92   : > { %v3040_v5 = vpop.permute.xlu0 %3039 }
 0xf93   : > { %v6755_v52 = vmul.f32 %v3040_v5, %v3023_v24 }
 0xf95   : > { %v3113_v6 = vpack.c.bf16 %v6755_v52, %v6755_v52 }
 0xf97   : > { %3115 = vrot.lane.b32.xlu2 %v3113_v6, %s5772_s1 }
 0xfca   : > { %v3099_v7 = vpop.permute.xlu1 %3098 }
 0xfcb   : > { %v6760_v8 = vmul.f32 %v3099_v7, %v3082_v47 }
 0xfcd   : > { %v3172_v62 = vpack.c.bf16 %v6760_v8, %v6760_v8 }
 0xfcf   : > { %3174 = vrot.lane.b32.xlu0 %v3172_v62, %s5772_s1 }
 0xff1   : > { %v3116_v9 = vpop.permute.xlu2 %3115 }
 0xff2   : > { %4753 = vmatmul.msk.bf16.vlgmr.msra.gmra.mxu2 %vm2290_vm6, %v3116_v9 }
0x1041   : > { %v3175_v10 = vpop.permute.xlu0 %3174 }
0x1042   : > { %4755 = vmatmul.msk.bf16.vlgmr.msra.gmra.mxu3 %vm2290_vm6, %v3175_v10 }
0x1075   : > { %v3129_v26 = vpop.f32.mrf.mxu2 }
0x1076   : > { %v3133_v42 = vadd.f32 %v3129_v26, %v3112_v41 }
0x1078   : > { %5223 = vtanh.f32 %v3133_v42  ;;  %v4754_v14 = vmul.f32 -1.442695, %v3133_v42 }
0x107a   : > { %5225 = vpow2.f32 %v4754_v14 }
0x107d   : > { %v3131_v28 = vpop.f32.mrf.mxu2 }
0x107e   : > { %v5224_v46 = vpop.eup %5223 }
0x107f   : > { %3156 = vrot.lane.b32.xlu1 %v5224_v46, %s5771_s28 }
0x1080   : > { %v5226_v16 = vpop.eup %5225 }
0x1081   : > { %v3137_v19 = vadd.f32 1.0, %v5226_v16 }
0x1083   : > { %v3149_v23 = vand.u32 2147483648, %v3137_v19  ;;  %vm3143_vm11 = vweird.f32 %v3137_v19  ;;  %v3147_v24 = vand.u32 2147483647, %v3137_v19 }
0x1085   : > { %v3150_v30 = vor.u32 1.1754944e-38, %v3149_v23  ;;  %vm3148_vm13 = vcmp.eq.f32.partialorder %v3147_v24, 8.507059e+37 }
0x10c5   : > { %v3188_v29 = vpop.f32.mrf.mxu3 }
0x10c6   : > { %v3192_v15 = vadd.f32 %v3188_v29, %v3171_v27  ;;  %v3240_v27 = vld [vmem:[#allocation2 + $0x7] ss:$0 sm:$0xff] }
0x10c8   : > { %5227 = vtanh.f32 %v3192_v15  ;;  %v4756_v40 = vmul.f32 -1.442695, %v3192_v15 }
0x10c9   : > { %5229 = vrcp.f32 %v3137_v19 }
0x10ca   : > { %5231 = vpow2.f32 %v4756_v40 }
0x10cd   : > { %v3190_v17 = vpop.f32.mrf.mxu3 }
0x10ce   : > { %v5228_v18 = vpop.eup %5227 }
0x10cf   : > { %3215 = vrot.lane.b32.xlu2 %v5228_v18, %s5771_s28  ;;  %v5230_v20 = vpop.eup %5229  ;;  %v3299_v18 = vld [vmem:[#allocation2 + $0x8] ss:$0 sm:$0xff] }
0x10d0   : > { %v3139_v21 = vmul.f32 %v5230_v20, %v3137_v19  ;;  %vm3144_vm10 = vweird.f32 %v5230_v20  ;;  %v5232_v31 = vpop.eup %5231 }
0x10d1   : > { %vm3145_vm12 = vmor %vm3143_vm11, %vm3144_vm10  ;;  %v3196_v32 = vadd.f32 1.0, %v5232_v31  ;;  %vm2465_vm11 = vcmask 253952  }
0x10d2   : > { %v3140_v22 = vsub.f32 1.0, %v3139_v21 }
0x10d3   : > { %5233 = vrcp.f32 %v3196_v32  ;;  %v3208_v47 = vand.u32 2147483648, %v3196_v32  ;;  %vm3202_vm15 = vweird.f32 %v3196_v32  ;;  %v3206_v48 = vand.u32 2147483647, %v3196_v32 }
0x10d4   : > { %v3141_v50 = vmul.f32 %v5230_v20, %v3140_v22 }
0x10d5   : > { %v3209_v37 = vor.u32 1.1754944e-38, %v3208_v47  ;;  %vm3207_vm1 = vcmp.eq.f32.partialorder %v3206_v48, 8.507059e+37 }
0x10d6   : > { %v3142_v56 = vadd.f32 %v5230_v20, %v3141_v50 }
0x10d8   : > { %v3146_v25 = vsel %vm3145_vm12, %v5230_v20, %v3142_v56 }
0x10d9   : > { %v3151_v12 = vsel %vm3148_vm13, %v3150_v30, %v3146_v25  ;;  %v5234_v34 = vpop.eup %5233 }
0x10da   : > { %v3198_v35 = vmul.f32 %v5234_v34, %v3196_v32  ;;  %vm3203_vm14 = vweird.f32 %v5234_v34  ;;  %v3154_v59 = vmul.f32 %v3151_v12, %v6746_v61 }
0x10db   : > { %vm3204_vm0 = vmor %vm3202_vm15, %vm3203_vm14 }
0x10dc   : > { %v3199_v38 = vsub.f32 1.0, %v3198_v35 }
0x10de   : > { %v3200_v39 = vmul.f32 %v5234_v34, %v3199_v38 }
0x10e0   : > { %v3201_v45 = vadd.f32 %v5234_v34, %v3200_v39 }
0x10e2   : > { %v3205_v49 = vsel %vm3204_vm0, %v5234_v34, %v3201_v45 }
0x10e3   : > { %v3210_v57 = vsel %vm3207_vm1, %v3209_v37, %v3205_v49 }
0x10e4   : > { %v3213_v7 = vmul.f32 %v3210_v57, %v6751_v3 }
0x10f1   : > { %v3157_v11 = vpop.permute.xlu1 %3156 }
0x10f2   : > { %v3159_v13 = vmul.f32 %v3157_v11, %v3151_v12 }
0x10f4   : > { %3161 = vrot.lane.b32.xlu0 %v3159_v13, %s5772_s1 }
0x1129   : > { %v3216_v55 = vpop.permute.xlu2 %3215 }
0x112a   : > { %v3218_v1 = vmul.f32 %v3216_v55, %v3210_v57 }
0x112c   : > { %3220 = vrot.lane.b32.xlu1 %v3218_v1, %s5772_s1 }
0x1166   : > { %v3162_v58 = vpop.permute.xlu0 %3161 }
0x1167   : > { %v6772_v5 = vadd.f32 %v3162_v58, %v3154_v59 }
0x1169   : > { %5235 = vtanh.f32 %v6772_v5 }
0x116f   : > { %v5236_v6 = vpop.eup %5235 }
0x1170   : > { %3167 = vrot.lane.b32.xlu2 %v5236_v6, %s5771_s28 }
0x119e   : > { %v3221_v62 = vpop.permute.xlu1 %3220 }
0x119f   : > { %v6777_v9 = vadd.f32 %v3221_v62, %v3213_v7 }
0x11a1   : > { %5237 = vtanh.f32 %v6777_v9 }
0x11a7   : > { %v5238_v10 = vpop.eup %5237 }
0x11a8   : > { %3226 = vrot.lane.b32.xlu0 %v5238_v10, %s5771_s28 }
0x11ca   : > { %v3168_v41 = vpop.permute.xlu2 %3167 }
0x11cb   : > { %v6781_v61 = vmul.f32 %v3168_v41, %v3151_v12 }
0x11cd   : > { %v3241_v26 = vpack.c.bf16 %v6781_v61, %v6781_v61 }
0x11cf   : > { %3243 = vrot.lane.b32.xlu1 %v3241_v26, %s5772_s1 }
0x121a   : > { %v3227_v42 = vpop.permute.xlu0 %3226 }
0x121b   : > { %v6786_v28 = vmul.f32 %v3227_v42, %v3210_v57 }
0x121d   : > { %v3300_v3 = vpack.c.bf16 %v6786_v28, %v6786_v28 }
0x121f   : > { %3302 = vrot.lane.b32.xlu2 %v3300_v3, %s5772_s1 }
0x1241   : > { %v3244_v46 = vpop.permute.xlu1 %3243 }
0x1242   : > { %4757 = vmatmul.msk.bf16.vlgmr.msra.gmra.mxu0 %vm2290_vm6, %v3244_v46 }
0x1279   : > { %v3303_v14 = vpop.permute.xlu2 %3302 }
0x127a   : > { %4759 = vmatmul.msk.bf16.vlgmr.msra.gmra.mxu1 %vm2290_vm6, %v3303_v14 }
0x12bf   : > { %v3257_v29 = vpop.f32.mrf.mxu0 }
0x12c0   : > { %v3261_v15 = vadd.f32 %v3257_v29, %v3240_v27  ;;  %v4935_v29 = vld [vmem:[#allocation21 + $0x8] sm:$0xff] }
0x12c1   : > { %3429 = vmatpush.bf16.msrb.mxu3 %v4935_v29 }
0x12c2   : > { %5239 = vtanh.f32 %v3261_v15  ;;  %v4758_v50 = vmul.f32 -1.442695, %v3261_v15  ;;  %v4934_v15 = vld [vmem:[#allocation21] sm:$0xff] }
0x12c5   : > { %3430 = vmatpush.bf16.msrb.mxu3 %v4934_v15 }
0x12c7   : > { %v3259_v16 = vpop.f32.mrf.mxu0 }
0x12c8   : > { %v5240_v17 = vpop.eup %5239 }
0x12c9   : > { %3284 = vrot.lane.b32.xlu0 %v5240_v17, %s5771_s28  ;;  %v4937_v17 = vld [vmem:[#allocation23 + $0x8] sm:$0xff] }
0x12ca   : > { %3401 = vmatpush.bf16.msrb.mxu2 %v4937_v17 }
0x12f7   : > { %v3316_v19 = vpop.f32.mrf.mxu1 }
0x12f8   : > { %v3320_v20 = vadd.f32 %v3316_v19, %v3299_v18 }
0x12fa   : > { %5241 = vtanh.f32 %v3320_v20  ;;  %v4760_v39 = vmul.f32 -1.442695, %v3320_v20 }
0x12fb   : > { %5243 = vpow2.f32 %v4758_v50  ;;  %v4936_v50 = vld [vmem:[#allocation23] sm:$0xff] }
0x12fc   : > { %3402 = vmatpush.bf16.msrb.mxu2 %v4936_v50 }
0x12ff   : > { %v3318_v21 = vpop.f32.mrf.mxu1 }
0x1300   : > { %v5242_v22 = vpop.eup %5241 }
0x1301   : > { %3343 = vrot.lane.b32.xlu1 %v5242_v22, %s5771_s28  ;;  %v5244_v56 = vpop.eup %5243 }
0x1302   : > { %v3265_v23 = vadd.f32 1.0, %v5244_v56 }
0x1304   : > { %5245 = vrcp.f32 %v3265_v23  ;;  %v3277_v13 = vand.u32 2147483648, %v3265_v23  ;;  %vm3271_vm3 = vweird.f32 %v3265_v23  ;;  %v3275_v40 = vand.u32 2147483647, %v3265_v23 }
0x1305   : > { %5247 = vpow2.f32 %v4760_v39  ;;  %v6860_v39 = vld [vmem:[#allocation29] sm:$0xff] }
0x1306   : > { %v3278_v32 = vor.u32 1.1754944e-38, %v3277_v13  ;;  %vm3276_vm5 = vcmp.eq.f32.partialorder %v3275_v40, 8.507059e+37 }
0x130a   : > { %v5246_v24 = vpop.eup %5245 }
0x130b   : > { %v3267_v25 = vmul.f32 %v5246_v24, %v3265_v23  ;;  %vm3272_vm2 = vweird.f32 %v5246_v24  ;;  %v5248_v45 = vpop.eup %5247 }
0x130c   : > { %vm3273_vm4 = vmor %vm3271_vm3, %vm3272_vm2  ;;  %v3324_v47 = vadd.f32 1.0, %v5248_v45 }
0x130d   : > { %v3268_v30 = vsub.f32 1.0, %v3267_v25 }
0x130e   : > { %5249 = vrcp.f32 %v3324_v47  ;;  %v3336_v1 = vand.u32 2147483648, %v3324_v47  ;;  %vm3330_vm8 = vweird.f32 %v3324_v47  ;;  %v3334_v59 = vand.u32 2147483647, %v3324_v47 }
0x130f   : > { %v3269_v11 = vmul.f32 %v5246_v24, %v3268_v30 }
0x1310   : > { %v3337_v6 = vor.u32 1.1754944e-38, %v3336_v1  ;;  %vm3335_vm10 = vcmp.eq.f32.partialorder %v3334_v59, 8.507059e+37  ;;  %v3481_v1 = vstv %s3480_s8 }
0x1311   : > { %v3270_v12 = vadd.f32 %v5246_v24, %v3269_v11  ;;  %v5122_v11 = vld [vmem:[#allocation24] ss:$0 sm:$0xff] }
0x1313   : > { %v3274_v31 = vsel %vm3273_vm4, %v5246_v24, %v3270_v12 }
0x1314   : > { %v6795_v34 = vsel %vm3276_vm5, %v3278_v32, %v3274_v31  ;;  %v5250_v48 = vpop.eup %5249  ;;  %v3445_v32 = vld [vmem:[#allocation26] sm:$0x1] }
0x1315   : > { %v3326_v49 = vmul.f32 %v5250_v48, %v3324_v47  ;;  %vm3331_vm7 = vweird.f32 %v5250_v48  ;;  %v3282_v41 = vmul.f32 %v6795_v34, %v6772_v5 }
0x1316   : > { %vm3332_vm9 = vmor %vm3330_vm8, %vm3331_vm7 }
0x1317   : > { %v3327_v37 = vsub.f32 1.0, %v3326_v49 }
0x1319   : > { %v3328_v55 = vmul.f32 %v5250_v48, %v3327_v37 }
0x131b   : > { %v3329_v57 = vadd.f32 %v5250_v48, %v3328_v55 }
0x131d   : > { %v3333_v58 = vsel %vm3332_vm9, %v5250_v48, %v3329_v57 }
0x131e   : > { %v3338_v62 = vsel %vm3335_vm10, %v3337_v6, %v3333_v58 }
0x133b   : > { %v3285_v35 = vpop.permute.xlu0 %3284 }
0x133c   : > { %v3287_v38 = vmul.f32 %v3285_v35, %v6795_v34 }
0x133e   : > { %3289 = vrot.lane.b32.xlu2 %v3287_v38, %s5772_s1 }
0x1373   : > { %v3344_v7 = vpop.permute.xlu1 %3343 }
0x1374   : > { %v3346_v10 = vmul.f32 %v3344_v7, %v3338_v62 }
0x1376   : > { %3348 = vrot.lane.b32.xlu0 %v3346_v10, %s5772_s1 }
0x137e   : > { %2462 = vrot.lane.b32.xlu0 %v6613_v60, %s5772_s1  ;;  %v3341_v60 = vmul.f32 %v3338_v62, %v6777_v9 }
0x1386   : > { %2596 = vrot.lane.b32.xlu0 %v6648_v0, %s5772_s1 }
0x138e   : > { %2847 = vrot.lane.b32.xlu0 %v6703_v36, %s5772_s1 }
0x1396   : > { %2980 = vrot.lane.b32.xlu0 %v6734_v4, %s5772_s1 }
0x1398   : > { %v3290_v26 = vpop.permute.xlu2 %3289 }
0x1399   : > { %v3292_v42 = vadd.f32 %v3290_v26, %v3282_v41 }
0x139b   : > { %5251 = vtanh.f32 %v3292_v42 }
0x139e   : > { %3231 = vrot.lane.b32.xlu0 %v6781_v61, %s5772_s1 }
0x13a1   : > { %v5252_v3 = vpop.eup %5251 }
0x13a2   : > { %3295 = vrot.lane.b32.xlu1 %v5252_v3, %s5771_s28 }
0x13aa   : > { %2468 = vrot.lane.b32.xlu1 %v6618_v63, %s5772_s1 }
0x13b2   : > { %2719 = vrot.lane.b32.xlu1 %v6673_v53, %s5772_s1 }
0x13ba   : > { %2852 = vrot.lane.b32.xlu1 %v6708_v33, %s5772_s1 }
0x13c2   : > { %3103 = vrot.lane.b32.xlu1 %v6755_v52, %s5772_s1 }
0x13ca   : > { %3236 = vrot.lane.b32.xlu1 %v6786_v28, %s5772_s1 }
0x13e8   : > { %v3349_v0 = vpop.permute.xlu0 %3348 }
0x13e9   : > { %v3351_v36 = vadd.f32 %v3349_v0, %v3341_v60 }
0x13eb   : > { %5253 = vtanh.f32 %v3351_v36 }
0x13f0   : > { %v2463_v4 = vpop.permute.xlu0 %2462 }
0x13f1   : > { %v5254_v63 = vpop.eup %5253  ;;  %2466 = vst.msk [vmem:[#allocation3] sm:$0x1] %vm2465_vm11, %v2463_v4 }
0x13f2   : > { %3354 = vrot.lane.b32.xlu2 %v5254_v63, %s5771_s28  ;;  %s3620_s28 = scalar_select %p3617_p4, 1, 0 }
0x13f8   : > { %v2597_v53 = vpop.permute.xlu0 %2596 }
0x13f9   : > { %2599 = vst.msk [vmem:[#allocation4 + $0x6] sm:$0x1] %vm2465_vm11, %v2597_v53 }
0x13fa   : > { %2591 = vrot.lane.b32.xlu2 %v6643_v54, %s5772_s1 }
0x1400   : > { %v2848_v33 = vpop.permute.xlu0 %2847 }
0x1401   : > { %2850 = vst.msk [vmem:[#allocation3 + $0x3] sm:$0x1] %vm2465_vm11, %v2848_v33 }
0x1402   : > { %2724 = vrot.lane.b32.xlu2 %v6678_v2, %s5772_s1 }
0x1408   : > { %v2981_v52 = vpop.permute.xlu0 %2980 }
0x1409   : > { %2983 = vst.msk [vmem:[#allocation4 + $0x3] sm:$0x1] %vm2465_vm11, %v2981_v52 }
0x140a   : > { %2975 = vrot.lane.b32.xlu2 %v6729_v51, %s5772_s1 }
0x1410   : > { %v3232_v5 = vpop.permute.xlu0 %3231 }
0x1411   : > { %3234 = vst.msk [vmem:[#allocation3 + $0x6] sm:$0x1] %vm2465_vm11, %v3232_v5 }
0x1412   : > { %3108 = vrot.lane.b32.xlu2 %v6760_v8, %s5772_s1 }
0x1414   : > { %v3296_v9 = vpop.permute.xlu1 %3295 }
0x1415   : > { %v3298_v54 = vmul.f32 %v3296_v9, %v6795_v34  ;;  %v3516_v9 = vstv %s3515_s2  ;;  %s3686_s2 = sld [smem:[#allocation8 + %s3685_s27]] }
0x1416   : > { %vm3517_vm0 = vcmp.eq.s32.totalorder %v3516_v9, 1 }
0x141a   : > { %3359 = vrot.lane.b32.xlu2 %v3298_v54, %s5772_s1 }
0x141b   : > { %p3687_p8 = scmp.gt.s32.totalorder %s3686_s2, 0 }
0x141c   : > { %v2469_v61 = vpop.permute.xlu1 %2468 }
0x141d   : > { %2471 = vst.msk [vmem:[#allocation4 + $0x7] sm:$0x1] %vm2465_vm11, %v2469_v61  ;;  %s3690_s23 = scalar_select %p3687_p8, 1, 0 }
0x1424   : > { %v2720_v2 = vpop.permute.xlu1 %2719 }
0x1425   : > { %2722 = vst.msk [vmem:[#allocation3 + $0x2] sm:$0x1] %vm2465_vm11, %v2720_v2 }
0x142c   : > { %v2853_v28 = vpop.permute.xlu1 %2852 }
0x142d   : > { %2855 = vst.msk [vmem:[#allocation4 + $0x4] sm:$0x1] %vm2465_vm11, %v2853_v28 }
0x1434   : > { %v3104_v51 = vpop.permute.xlu1 %3103 }
0x1435   : > { %3106 = vst.msk [vmem:[#allocation3 + $0x5] sm:$0x1] %vm2465_vm11, %v3104_v51 }
0x143c   : > { %v3237_v46 = vpop.permute.xlu1 %3236 }
0x143d   : > { %3239 = vst.msk [vmem:[#allocation4 + $0x1] sm:$0x1] %vm2465_vm11, %v3237_v46 }
0x144c   : > { %v3355_v8 = vpop.permute.xlu2 %3354 }
0x144d   : > { %v3357_v14 = vmul.f32 %v3355_v8, %v3338_v62 }
0x144f   : > { %3364 = vrot.lane.b32.xlu0 %v3357_v14, %s5772_s1  ;;  %s3650_s1 = sadd.s32 6, %s6855_s12 }
0x1450   : > { %s3651_s25 = sld [smem:[#allocation8 + %s3650_s1]] }
0x1454   : > { %v2592_v27 = vpop.permute.xlu2 %2591 }
0x1455   : > { %2594 = vst.msk [vmem:[#allocation3 + $0x1] sm:$0x1] %vm2465_vm11, %v2592_v27 }
0x1456   : > { %p3652_p7 = scmp.gt.s32.totalorder %s3651_s25, 0 }
0x1458   : > { %s3655_s8 = scalar_select %p3652_p7, 1, 0 }
0x145c   : > { %v2725_v16 = vpop.permute.xlu2 %2724 }
0x145d   : > { %2727 = vst.msk [vmem:[#allocation4 + $0x5] sm:$0x1] %vm2465_vm11, %v2725_v16 }
0x1464   : > { %v2976_v18 = vpop.permute.xlu2 %2975 }
0x1465   : > { %2978 = vst.msk [vmem:[#allocation3 + $0x4] sm:$0x1] %vm2465_vm11, %v2976_v18 }
0x146c   : > { %v3109_v19 = vpop.permute.xlu2 %3108 }
0x146d   : > { %3111 = vst.msk [vmem:[#allocation4 + $0x2] sm:$0x1] %vm2465_vm11, %v3109_v19 }
0x1474   : > { %v3360_v20 = vpop.permute.xlu2 %3359 }
0x1475   : > { %3362 = vst.msk [vmem:[#allocation3 + $0x7] sm:$0x1] %vm2465_vm11, %v3360_v20 }
0x147c   : > { %v3368_v21 = vld [vmem:[#allocation3] sm:$0xff] }
0x147d   : > { %v3369_v22 = vpack.c.bf16 %v3368_v21, %v3368_v21 }
0x147f   : > { %4778 = vmatmul.msk.bf16.vlgmr.msrb.gmra.mxu3 %vm2290_vm6, %v3369_v22 }
0x14c1   : > { %v3365_v56 = vpop.permute.xlu0 %3364 }
0x14c2   : > { %3367 = vst.msk [vmem:[#allocation4] sm:$0x1] %vm2465_vm11, %v3365_v56  ;;  %v3551_v56 = vstv %s3550_s20  ;;  %s3737_s20 = sld [smem:[#allocation8 + %s3650_s1]] }
0x14c3   : > { %vm3552_vm5 = vcmp.eq.s32.totalorder %v3551_v56, 1 }
0x14c8   : > { %p3738_p9 = scmp.gt.s32.totalorder %s3737_s20, 0  ;;  %s3905_s20 = scalar_lea.hbm %s7075_s18, %s5892_s5 }
0x14c9   : > { %v3374_v23 = vld [vmem:[#allocation4] sm:$0xff] }
0x14ca   : > { %v3375_v24 = vpack.c.bf16 %v3374_v23, %v3374_v23  ;;  %s3740_s29 = scalar_select %p3738_p9, 1, 0 }
0x14cc   : > { %4769 = vmatmul.msk.bf16.vlgmr.msrb.gmra.mxu2 %vm2290_vm6, %v3375_v24  ;;  %vm3482_vm6 = vcmp.eq.s32.totalorder %v3481_v1, 1 }
0x1502   : > { %v3432_v25 = vpop.f32.mrf.mxu3 }
0x150a   : > { %v3434_v30 = vpop.f32.mrf.mxu3 }
0x154f   : > { %v3404_v12 = vpop.f32.mrf.mxu2 }
0x1550   : > { %v3433_v13 = vadd.f32 %v3432_v25, %v3404_v12 }
0x1552   : > { %v3440_v40 = vadd.f32 %v5122_v11, %v3433_v13 }
0x1554   : > { %3441 = vst [vmem:[#allocation5] sm:$0xff] %v3440_v40 }
0x1557   : > { %v3406_v31 = vpop.f32.mrf.mxu2 }
0x155b   : > { %v3446_v34 = vld [vmem:[#allocation5] sm:$0x1]  ;;  %v3478_v58 = vld [vmem:[#allocation5 + $0x1] sm:$0x1]  ;;  %v3513_v61 = vld [vmem:[#allocation5 + $0x2] sm:$0x1] }
0x155c   : > { %v3447_v35 = vadd.f32 %v3446_v34, %v3445_v32  ;;  %v3548_v24 = vld [vmem:[#allocation5 + $0x3] sm:$0x1] }
0x155e   : > { %v3448_v38 = vperm.slane %v3447_v35, 0 }
0x1560   : > { %3453 = vperm.xlu1 %5118, %v3448_v38  }
0x15d2   : > { %v3454_v45 = vpop.permute.xlu1 %3453 }
0x15d3   : > { %v3455_v47 = vadd.f32 %v3454_v45, %v6860_v39 }
0x15d5   : > { %v3456_v48 = vrot.slane %v3455_v47, 4 }
0x15d7   : > { %v3457_v49 = vmax.f32 %v3455_v47, %v3456_v48 }
0x15d9   : > { %v3458_v37 = vrot.slane %v3457_v49, 2 }
0x15db   : > { %v3459_v55 = vmax.f32 %v3457_v49, %v3458_v37 }
0x15dd   : > { %v3460_v57 = vrot.slane %v3459_v55, 1 }
0x15df   : > { %v3461_v59 = vmax.f32 %v3459_v55, %v3460_v57  ;;  %v3586_v57 = vstv %s3585_s10  ;;  %s3762_s10 = sld [smem:[#allocation8 + %s3615_s24]] }
0x15e0   : > { %vm3587_vm11 = vcmp.eq.s32.totalorder %v3586_v57, 1  ;;  %s3787_s24 = sld [smem:[#allocation8 + %s3580_s0]] }
0x15e1   : > { %vm3462_vm12 = vcmp.eq.f32.partialorder %v3455_v47, %v3461_v59  ;;  %v3479_v6 = vadd.f32 %v3478_v58, %v3461_v59  ;;  %v3583_v59 = vld [vmem:[#allocation5 + $0x4] sm:$0x1]  ;;  %s3812_s0 = sld [smem:[#allocation8 + %s3545_s26]] }
0x15e2   : > { %v3463_v7 = vsel %vm3462_vm12, %v6561_v44, 8  ;;  %s3837_s26 = sld [smem:[#allocation8 + %s3510_s22]] }
0x15e3   : > { %v3464_v62 = vrot.slane %v3463_v7, 4  ;;  %v3483_v10 = vsel %vm3482_vm6, %v3479_v6, %v3447_v35  ;;  %s3862_s22 = sld [smem:[#allocation8 + %s3475_s21]] }
0x15e4   : > { %v3484_v41 = vperm.slane %v3483_v10, 0 }
0x15e5   : > { %vm3465_vm13 = vcmp.lt.s32.totalorder %v3463_v7, %v3464_v62  ;;  %p3763_p10 = scmp.gt.s32.totalorder %s3762_s10, 0  ;;  %s3909_s10 = sshll.u32 %s3905_s20, 4  ;;  %s3910_s10 = int_to_ptr.hbm [resolvable:$true] %s3909_s10 }
0x15e6   : > { %v3466_v26 = vsel %vm3465_vm13, %v3463_v7, %v3464_v62  ;;  %3489 = vperm.xlu2 %5119, %v3484_v41   ;;  %p3788_p11 = scmp.gt.s32.totalorder %s3787_s24, 0 }
0x15e7   : > { %v3467_v42 = vrot.slane %v3466_v26, 2  ;;  %s3765_s3 = scalar_select %p3763_p10, 1, 0 }
0x15e8   : > { %p3813_p12 = scmp.gt.s32.totalorder %s3812_s0, 0  ;;  %p3838_p13 = scmp.gt.s32.totalorder %s3837_s26, 0 }
0x15e9   : > { %vm3468_vm14 = vcmp.lt.s32.totalorder %v3466_v26, %v3467_v42  ;;  %p3863_p0 = scmp.gt.s32.totalorder %s3862_s22, 0 }
0x15ea   : > { %v3469_v3 = vsel %vm3468_vm14, %v3466_v26, %v3467_v42  ;;  %s3815_s1 = scalar_select %p3813_p12, 1, 0 }
0x15eb   : > { %v3470_v60 = vrot.slane %v3469_v3, 1  ;;  %s3840_s25 = scalar_select %p3838_p13, 1, 0 }
0x15ec   : > { %s3865_s27 = scalar_select %p3863_p0, 1, 0 }
0x15ed   : > { %vm3471_vm15 = vcmp.lt.s32.totalorder %v3469_v3, %v3470_v60 }
0x15ee   : > { %v3472_v0 = vsel %vm3471_vm15, %v3469_v3, %v3470_v60 }
0x15ef   : > { %3473 = vst [vmem:[#allocation6 + $0x1] sm:$0x1] %v3472_v0 }
0x1640   : > { %v3490_v36 = vpop.permute.xlu2 %3489 }
0x1641   : > { %v3491_v4 = vadd.f32 %v3490_v36, %v6860_v39 }
0x1643   : > { %v3492_v63 = vrot.slane %v3491_v4, 4 }
0x1645   : > { %v3493_v53 = vmax.f32 %v3491_v4, %v3492_v63 }
0x1647   : > { %v3494_v33 = vrot.slane %v3493_v53, 2 }
0x1649   : > { %v3495_v52 = vmax.f32 %v3493_v53, %v3494_v33 }
0x164b   : > { %v3496_v5 = vrot.slane %v3495_v52, 1 }
0x164d   : > { %v3497_v54 = vmax.f32 %v3495_v52, %v3496_v5  ;;  %v3621_v5 = vstv %s3620_s28  ;;  %s3790_s28 = scalar_select %p3788_p11, 1, 0 }
0x164e   : > { %vm3622_vm15 = vcmp.eq.s32.totalorder %v3621_v5, 1 }
0x164f   : > { %vm3498_vm1 = vcmp.eq.f32.partialorder %v3491_v4, %v3497_v54  ;;  %v3514_v2 = vadd.f32 %v3513_v61, %v3497_v54  ;;  %v3618_v54 = vld [vmem:[#allocation5 + $0x5] sm:$0x1] }
0x1650   : > { %v3499_v28 = vsel %vm3498_vm1, %v6561_v44, 8 }
0x1651   : > { %v3500_v51 = vrot.slane %v3499_v28, 4  ;;  %v3518_v46 = vsel %vm3517_vm0, %v3514_v2, %v3483_v10 }
0x1652   : > { %v3519_v8 = vperm.slane %v3518_v46, 0 }
0x1653   : > { %vm3501_vm2 = vcmp.lt.s32.totalorder %v3499_v28, %v3500_v51 }
0x1654   : > { %v3502_v14 = vsel %vm3501_vm2, %v3499_v28, %v3500_v51  ;;  %3524 = vperm.xlu0 %5120, %v3519_v8  }
0x1655   : > { %v3503_v27 = vrot.slane %v3502_v14, 2 }
0x1657   : > { %vm3504_vm3 = vcmp.lt.s32.totalorder %v3502_v14, %v3503_v27 }
0x1658   : > { %v3505_v29 = vsel %vm3504_vm3, %v3502_v14, %v3503_v27 }
0x1659   : > { %v3506_v15 = vrot.slane %v3505_v29, 1 }
0x165b   : > { %vm3507_vm4 = vcmp.lt.s32.totalorder %v3505_v29, %v3506_v15 }
0x165c   : > { %v3508_v16 = vsel %vm3507_vm4, %v3505_v29, %v3506_v15 }
0x165d   : > { %3509 = vst [vmem:[#allocation6 + $0x2] sm:$0x1] %v3508_v16 }
0x16c6   : > { %v3525_v17 = vpop.permute.xlu0 %3524 }
0x16c7   : > { %v3526_v18 = vadd.f32 %v3525_v17, %v6860_v39 }
0x16c9   : > { %v3527_v19 = vrot.slane %v3526_v18, 4 }
0x16cb   : > { %v3528_v20 = vmax.f32 %v3526_v18, %v3527_v19 }
0x16cd   : > { %v3529_v21 = vrot.slane %v3528_v20, 2 }
0x16cf   : > { %v3530_v22 = vmax.f32 %v3528_v20, %v3529_v21 }
0x16d1   : > { %v3531_v50 = vrot.slane %v3530_v22, 1 }
0x16d3   : > { %v3532_v23 = vmax.f32 %v3530_v22, %v3531_v50  ;;  %v3656_v50 = vstv %s3655_s8  ;;  %s3888_s8 = sld [smem:[#allocation8 + %s6855_s12]]  ;;  %s747_s12 = sand.u32 1, %s5741_s19  }
0x16d4   : > { %vm3657_vm4 = vcmp.eq.s32.totalorder %v3656_v50, 1  ;;  %s748_s5 = scalar_lea.vmem [#allocation30], %s747_s12  ;;  %s3897_s24 = scalar_lea.sflag [#allocation11], %s747_s12 }
0x16d5   : > { %vm3533_vm7 = vcmp.eq.f32.partialorder %v3526_v18, %v3532_v23  ;;  %v3549_v25 = vadd.f32 %v3548_v24, %v3532_v23  ;;  %v3653_v23 = vld [vmem:[#allocation5 + $0x6] sm:$0x1] }
0x16d6   : > { %v3534_v30 = vsel %vm3533_vm7, %v6561_v44, 8 }
0x16d7   : > { %v3535_v11 = vrot.slane %v3534_v30, 4  ;;  %v3553_v12 = vsel %vm3552_vm5, %v3549_v25, %v3518_v46 }
0x16d8   : > { %v3554_v13 = vperm.slane %v3553_v12, 0 }
0x16d9   : > { %vm3536_vm8 = vcmp.lt.s32.totalorder %v3534_v30, %v3535_v11  ;;  %p3889_p1 = scmp.gt.s32.totalorder %s3888_s8, 0 }
0x16da   : > { %v3537_v40 = vsel %vm3536_vm8, %v3534_v30, %v3535_v11  ;;  %3559 = vperm.xlu1 %5118, %v3554_v13  }
0x16db   : > { %v3538_v31 = vrot.slane %v3537_v40, 2  ;;  %s3890_s2 = scalar_select %p3889_p1, 1, 0 }
0x16dd   : > { %vm3539_vm9 = vcmp.lt.s32.totalorder %v3537_v40, %v3538_v31 }
0x16de   : > { %v3540_v32 = vsel %vm3539_vm9, %v3537_v40, %v3538_v31 }
0x16df   : > { %v3541_v34 = vrot.slane %v3540_v32, 1 }
0x16e1   : > { %vm3542_vm10 = vcmp.lt.s32.totalorder %v3540_v32, %v3541_v34 }
0x16e2   : > { %v3543_v35 = vsel %vm3542_vm10, %v3540_v32, %v3541_v34 }
0x16e3   : > { %3544 = vst [vmem:[#allocation6 + $0x3] sm:$0x1] %v3543_v35 }
0x174c   : > { %v3560_v38 = vpop.permute.xlu1 %3559 }
0x174d   : > { %v3561_v45 = vadd.f32 %v3560_v38, %v6860_v39 }
0x174f   : > { %v3562_v47 = vrot.slane %v3561_v45, 4 }
0x1751   : > { %v3563_v48 = vmax.f32 %v3561_v45, %v3562_v47 }
0x1753   : > { %v3564_v49 = vrot.slane %v3563_v48, 2 }
0x1755   : > { %v3565_v37 = vmax.f32 %v3563_v48, %v3564_v49 }
0x1757   : > { %v3566_v55 = vrot.slane %v3565_v37, 1 }
0x1759   : > { %v3567_v1 = vmax.f32 %v3565_v37, %v3566_v55  ;;  %v3691_v55 = vstv %s3690_s23 }
0x175a   : > { %vm6891_vm10 = vcmp.eq.s32.totalorder %v3691_v55, 1 }
0x175b   : > { %vm3568_vm6 = vcmp.eq.f32.partialorder %v3561_v45, %v3567_v1  ;;  %v3584_v58 = vadd.f32 %v3583_v59, %v3567_v1  ;;  %v3688_v1 = vld [vmem:[#allocation5 + $0x7] sm:$0x1] }
0x175c   : > { %v3569_v6 = vsel %vm3568_vm6, %v6561_v44, 8  ;;  %vm3696_vm6 = vcmask 1040384  }
0x175d   : > { %v3570_v7 = vrot.slane %v3569_v6, 4  ;;  %v3588_v62 = vsel %vm3587_vm11, %v3584_v58, %v3553_v12 }
0x175e   : > { %v3589_v10 = vperm.slane %v3588_v62, 0 }
0x175f   : > { %vm3571_vm12 = vcmp.lt.s32.totalorder %v3569_v6, %v3570_v7 }
0x1760   : > { %v3572_v41 = vsel %vm3571_vm12, %v3569_v6, %v3570_v7  ;;  %3594 = vperm.xlu2 %5119, %v3589_v10   ;;  %v3694_v6 = vld [vmem:[#allocation27] sm:$0x1] }
0x1761   : > { %v3573_v26 = vrot.slane %v3572_v41, 2 }
0x1763   : > { %vm3574_vm13 = vcmp.lt.s32.totalorder %v3572_v41, %v3573_v26 }
0x1764   : > { %v3575_v42 = vsel %vm3574_vm13, %v3572_v41, %v3573_v26 }
0x1765   : > { %v3576_v3 = vrot.slane %v3575_v42, 1 }
0x1767   : > { %vm3577_vm14 = vcmp.lt.s32.totalorder %v3575_v42, %v3576_v3 }
0x1768   : > { %v3578_v60 = vsel %vm3577_vm14, %v3575_v42, %v3576_v3 }
0x1769   : > { %3579 = vst [vmem:[#allocation6 + $0x4] sm:$0x1] %v3578_v60 }
0x17ba   : > { %v3595_v0 = vpop.permute.xlu2 %3594 }
0x17bb   : > { %v3596_v36 = vadd.f32 %v3595_v0, %v6860_v39 }
0x17bd   : > { %v3597_v4 = vrot.slane %v3596_v36, 4 }
0x17bf   : > { %v3598_v63 = vmax.f32 %v3596_v36, %v3597_v4 }
0x17c1   : > { %v3599_v53 = vrot.slane %v3598_v63, 2 }
0x17c3   : > { %v3600_v33 = vmax.f32 %v3598_v63, %v3599_v53 }
0x17c5   : > { %v3601_v52 = vrot.slane %v3600_v33, 1 }
0x17c7   : > { %v3602_v9 = vmax.f32 %v3600_v33, %v3601_v52 }
0x17c9   : > { %vm3603_vm0 = vcmp.eq.f32.partialorder %v3596_v36, %v3602_v9  ;;  %v3619_v61 = vadd.f32 %v3618_v54, %v3602_v9 }
0x17ca   : > { %v3604_v2 = vsel %vm3603_vm0, %v6561_v44, 8 }
0x17cb   : > { %v3605_v28 = vrot.slane %v3604_v2, 4  ;;  %v3623_v51 = vsel %vm3622_vm15, %v3619_v61, %v3588_v62 }
0x17cc   : > { %v3624_v46 = vperm.slane %v3623_v51, 0 }
0x17cd   : > { %vm3606_vm1 = vcmp.lt.s32.totalorder %v3604_v2, %v3605_v28 }
0x17ce   : > { %v3607_v8 = vsel %vm3606_vm1, %v3604_v2, %v3605_v28  ;;  %3629 = vperm.xlu1 %5118, %v3624_v46  }
0x17cf   : > { %v3608_v14 = vrot.slane %v3607_v8, 2 }
0x17d1   : > { %vm3609_vm2 = vcmp.lt.s32.totalorder %v3607_v8, %v3608_v14 }
0x17d2   : > { %v3610_v27 = vsel %vm3609_vm2, %v3607_v8, %v3608_v14 }
0x17d3   : > { %v3611_v29 = vrot.slane %v3610_v27, 1 }
0x17d5   : > { %vm3612_vm3 = vcmp.lt.s32.totalorder %v3610_v27, %v3611_v29 }
0x17d6   : > { %v3613_v15 = vsel %vm3612_vm3, %v3610_v27, %v3611_v29 }
0x17d7   : > { %3614 = vst [vmem:[#allocation6 + $0x5] sm:$0x1] %v3613_v15 }
0x1840   : > { %v3630_v16 = vpop.permute.xlu1 %3629 }
0x1841   : > { %v3631_v17 = vadd.f32 %v3630_v16, %v6860_v39 }
0x1843   : > { %v3632_v18 = vrot.slane %v3631_v17, 4 }
0x1845   : > { %v3633_v19 = vmax.f32 %v3631_v17, %v3632_v18 }
0x1847   : > { %v3634_v20 = vrot.slane %v3633_v19, 2 }
0x1849   : > { %v3635_v21 = vmax.f32 %v3633_v19, %v3634_v20 }
0x184b   : > { %v3636_v22 = vrot.slane %v3635_v21, 1 }
0x184d   : > { %v3637_v56 = vmax.f32 %v3635_v21, %v3636_v22 }
0x184f   : > { %vm3638_vm5 = vcmp.eq.f32.partialorder %v3631_v17, %v3637_v56  ;;  %v3654_v24 = vadd.f32 %v3653_v23, %v3637_v56 }
0x1850   : > { %v3639_v25 = vsel %vm3638_vm5, %v6561_v44, 8 }
0x1851   : > { %v3640_v30 = vrot.slane %v3639_v25, 4  ;;  %v3658_v11 = vsel %vm3657_vm4, %v3654_v24, %v3623_v51 }
0x1852   : > { %v3659_v12 = vperm.slane %v3658_v11, 0 }
0x1853   : > { %vm3641_vm7 = vcmp.lt.s32.totalorder %v3639_v25, %v3640_v30 }
0x1854   : > { %v3642_v13 = vsel %vm3641_vm7, %v3639_v25, %v3640_v30  ;;  %3664 = vperm.xlu2 %5119, %v3659_v12  }
0x1855   : > { %v3643_v40 = vrot.slane %v3642_v13, 2 }
0x1857   : > { %vm3644_vm8 = vcmp.lt.s32.totalorder %v3642_v13, %v3643_v40 }
0x1858   : > { %v3645_v31 = vsel %vm3644_vm8, %v3642_v13, %v3643_v40 }
0x1859   : > { %v3646_v32 = vrot.slane %v3645_v31, 1 }
0x185b   : > { %vm3647_vm9 = vcmp.lt.s32.totalorder %v3645_v31, %v3646_v32 }
0x185c   : > { %v3648_v34 = vsel %vm3647_vm9, %v3645_v31, %v3646_v32  ;;  %v3741_v32 = vstv %s3740_s29  ;;  %s3907_s29 = sshll.u32 %s748_s5, 4  ;;  %s3908_s29 = int_to_ptr.vmem [resolvable:$true] %s3907_s29 }
0x185d   : > { %3649 = vst [vmem:[#allocation6 + $0x6] sm:$0x1] %v3648_v34  ;;  %vm6919_vm3 = vcmp.eq.s32.totalorder %v3741_v32, 1 }
0x1864   : > { %v3746_v56 = vld [vmem:[#allocation6 + $0x6] sm:$0x1] }
0x18ae   : > { %v3665_v35 = vpop.permute.xlu2 %3664 }
0x18af   : > { %v3666_v38 = vadd.f32 %v3665_v35, %v6860_v39 }
0x18b1   : > { %v3667_v45 = vrot.slane %v3666_v38, 4 }
0x18b3   : > { %v3668_v47 = vmax.f32 %v3666_v38, %v3667_v45 }
0x18b5   : > { %v3669_v48 = vrot.slane %v3668_v47, 2 }
0x18b7   : > { %v3670_v49 = vmax.f32 %v3668_v47, %v3669_v48  ;;  %v3771_v48 = vld [vmem:[#allocation6 + $0x5] sm:$0x1] }
0x18b9   : > { %v3671_v37 = vrot.slane %v3670_v49, 1 }
0x18bb   : > { %v3672_v57 = vmax.f32 %v3670_v49, %v3671_v37 }
0x18bd   : > { %vm3673_vm11 = vcmp.eq.f32.partialorder %v3666_v38, %v3672_v57  ;;  %v3689_v58 = vadd.f32 %v3688_v1, %v3672_v57 }
0x18be   : > { %v3674_v7 = vsel %vm3673_vm11, %v6561_v44, 8  ;;  %v6900_v44 = vand.u32 127, %v1879_v43 }
0x18bf   : > { %v3675_v39 = vrot.slane %v3674_v7, 4  ;;  %v3693_v62 = vsel %vm6891_vm10, %v3689_v58, %v3658_v11 }
0x18c0   : > { %v3695_v10 = vadd.f32 %v3694_v6, %v3693_v62  ;;  %v3766_v62 = vstv %s3765_s3 }
0x18c1   : > { %vm3676_vm12 = vcmp.lt.s32.totalorder %v3674_v7, %v3675_v39  ;;  %vm6933_vm5 = vcmp.eq.s32.totalorder %v3766_v62, 1 }
0x18c2   : > { %v3677_v41 = vsel %vm3676_vm12, %v3674_v7, %v3675_v39  ;;  %v3697_v26 = vsel %vm3696_vm6, %v3695_v10, -inf }
0x18c3   : > { %v3678_v42 = vrot.slane %v3677_v41, 2  ;;  %3698 = vmax.xlane.f32.xlu0 %v3697_v26 }
0x18c5   : > { %vm3679_vm13 = vcmp.lt.s32.totalorder %v3677_v41, %v3678_v42 }
0x18c6   : > { %v3680_v3 = vsel %vm3679_vm13, %v3677_v41, %v3678_v42 }
0x18c7   : > { %v3681_v60 = vrot.slane %v3680_v3, 1 }
0x18c9   : > { %vm3682_vm14 = vcmp.lt.s32.totalorder %v3680_v3, %v3681_v60 }
0x18ca   : > { %v3683_v0 = vsel %vm3682_vm14, %v3680_v3, %v3681_v60  ;;  %v3796_v60 = vld [vmem:[#allocation6 + $0x4] sm:$0x1] }
0x18cb   : > { %3684 = vst [vmem:[#allocation6 + $0x7] sm:$0x1] %v3683_v0 }
0x18d2   : > { %v3721_v46 = vld [vmem:[#allocation6 + $0x7] sm:$0x1] }
0x1936   : > { %v3699_v36 = vpop.xlane.xlu0 %3698 }
0x1937   : > { %vm3700_vm15 = vcmp.eq.f32.partialorder %v3695_v10, %v3699_v36 }
0x1938   : > { %v3701_v4 = vsel %vm3700_vm15, %v6900_v44, 128  ;;  %vm3717_vm15 = vcmp.eq.s32.totalorder %v6900_v44, 7 }
0x1939   : > { %v3702_v63 = vsel %vm3696_vm6, %v3701_v4, 2147483647 }
0x193a   : > { %v3704_v53 = vshra.s32 %v3702_v63, 16  ;;  %v3703_v52 = vand.u32 65535, %v3702_v63 }
0x193c   : > { %v3706_v33 = vcvt.s32.f32 %v3704_v53  ;;  %v3705_v9 = vcvt.s32.f32 %v3703_v52 }
0x193e   : > { %3707 = vmin.xlane.f32.xlu1 %v3706_v33 }
0x19b1   : > { %v3708_v5 = vpop.xlane.xlu1 %3707 }
0x19b2   : > { %vm3709_vm0 = vcmp.eq.f32.partialorder %v3706_v33, %v3708_v5  ;;  %v3714_v61 = vcvt.f32.s32 %v3708_v5 }
0x19b3   : > { %v3710_v54 = vsel %vm3709_vm0, %v3705_v9, inf  ;;  %vm3764_vm0 = vcmp.eq.s32.totalorder %v6900_v44, 5 }
0x19b4   : > { %3711 = vmin.xlane.f32.xlu2 %v3710_v54  ;;  %v3715_v28 = vshll.u32 %v3714_v61, 16  ;;  %v3791_v54 = vstv %s3790_s28  ;;  %s5671_s28 = sshra.s32 %s3910_s10, 4  ;;  %s5672_s28 = int_to_ptr.hbm [resolvable:$true] %s5671_s28 }
0x19b5   : > { %vm6947_vm8 = vcmp.eq.s32.totalorder %v3791_v54, 1  ;;  %s5673_s0 = scalar_lea.hbm %s5672_s28, 1  ;;  %p5678_p7 = scmp.lt.s32.totalorder %s5672_s28, %s7075_s18 }
0x19b6   : > { %p5674_p2 = scmp.ne.s32.totalorder %s5672_s28, %s5673_s0 }
0x19b8   : > { %p5675_p3 = pnand %p5674_p2, %p5909_p5 }
0x19ba   : > { %p5676_p4 = pneg %p5675_p3 }
0x1a27   : > { %v3712_v2 = vpop.xlane.xlu2 %3711 }
0x1a28   : > { %v3713_v43 = vcvt.f32.s32 %v3712_v2 }
0x1a2a   : > { %v6904_v51 = vadd.s32 %v3715_v28, %v3713_v43 }
0x1a2c   : > { %vm3720_vm1 = vcmp.eq.s32.totalorder %v6900_v44, %v6904_v51 }
0x1a2d   : > { %v3722_v8 = vsel %vm3720_vm1, %v3721_v46, 0 }
0x1a2e   : > { %v3723_v14 = vsel %vm3696_vm6, %v3722_v8, 0  ;;  %v3821_v8 = vld [vmem:[#allocation6 + $0x3] sm:$0x1] }
0x1a2f   : > { %v3725_v27 = vshrl.u32 %v3723_v14, 16  ;;  %v3724_v29 = vand.u32 65535, %v3723_v14 }
0x1a31   : > { %v3727_v15 = vcvt.s32.f32 %v3725_v27  ;;  %v3726_v16 = vcvt.s32.f32 %v3724_v29 }
0x1a33   : > { %3730 = vadd.xlane.f32.xlu0 %v3727_v15  ;;  %3728 = vadd.xlane.f32.xlu2 %v3726_v16 }
0x1aa6   : > { %v3731_v17 = vpop.xlane.xlu0 %3730  ;;  %v3729_v18 = vpop.xlane.xlu2 %3728 }
0x1aa7   : > { %v3733_v19 = vcvt.f32.s32 %v3731_v17  ;;  %v3732_v21 = vcvt.f32.s32 %v3729_v18 }
0x1aa9   : > { %v3734_v20 = vshll.u32 %v3733_v19, 16 }
0x1aab   : > { %v3735_v22 = vadd.s32 %v3734_v20, %v3732_v21  ;;  %v3816_v21 = vstv %s3815_s1 }
0x1aac   : > { %vm6961_vm11 = vcmp.eq.s32.totalorder %v3816_v21, 1 }
0x1aad   : > { %v6912_v50 = vsel %vm6891_vm10, %v3735_v22, %v6904_v51 }
0x1aae   : > { %vm3745_vm2 = vcmp.eq.s32.totalorder %v6900_v44, %v6912_v50 }
0x1aaf   : > { %v3747_v23 = vsel %vm3745_vm2, %v3746_v56, 0  ;;  %vm3814_vm2 = vcmp.eq.s32.totalorder %v6900_v44, 3 }
0x1ab0   : > { %v3748_v24 = vsel %vm3696_vm6, %v3747_v23, 0 }
0x1ab1   : > { %v3750_v25 = vshrl.u32 %v3748_v24, 16  ;;  %v3749_v30 = vand.u32 65535, %v3748_v24 }
0x1ab3   : > { %v3752_v11 = vcvt.s32.f32 %v3750_v25  ;;  %v3751_v12 = vcvt.s32.f32 %v3749_v30  ;;  %v3846_v30 = vld [vmem:[#allocation6 + $0x2] sm:$0x1] }
0x1ab5   : > { %3755 = vadd.xlane.f32.xlu1 %v3752_v11  ;;  %3753 = vadd.xlane.f32.xlu0 %v3751_v12 }
0x1b28   : > { %v3756_v13 = vpop.xlane.xlu1 %3755  ;;  %v3754_v40 = vpop.xlane.xlu0 %3753 }
0x1b29   : > { %v3758_v31 = vcvt.f32.s32 %v3756_v13  ;;  %v3757_v35 = vcvt.f32.s32 %v3754_v40 }
0x1b2b   : > { %v3759_v34 = vshll.u32 %v3758_v31, 16 }
0x1b2d   : > { %v3760_v38 = vadd.s32 %v3759_v34, %v3757_v35 }
0x1b2f   : > { %v6926_v47 = vsel %vm6919_vm3, %v3760_v38, %v6912_v50 }
0x1b30   : > { %vm3770_vm4 = vcmp.eq.s32.totalorder %v6900_v44, %v6926_v47 }
0x1b31   : > { %v3772_v49 = vsel %vm3770_vm4, %v3771_v48, 0 }
0x1b32   : > { %v3773_v37 = vsel %vm3696_vm6, %v3772_v49, 0  ;;  %v3841_v49 = vstv %s3840_s25  ;;  %s5677_s25 = scalar_lea.hbm %s7075_s18, 2 }
0x1b33   : > { %v3775_v55 = vshrl.u32 %v3773_v37, 16  ;;  %v3774_v57 = vand.u32 65535, %v3773_v37  ;;  %vm6975_vm13 = vcmp.eq.s32.totalorder %v3841_v49, 1  ;;  %p5679_p8 = scmp.lt.s32.totalorder %s5677_s25, %s5673_s0 }
0x1b35   : > { %v3777_v1 = vcvt.s32.f32 %v3775_v55  ;;  %v3776_v58 = vcvt.s32.f32 %v3774_v57  ;;  %p5680_p9 = por %p5679_p8, %p5678_p7 }
0x1b37   : > { %3780 = vadd.xlane.f32.xlu2 %v3777_v1  ;;  %3778 = vadd.xlane.f32.xlu1 %v3776_v58  ;;  %v3871_v58 = vld [vmem:[#allocation6 + $0x1] sm:$0x1]  ;;  %p5681_p10 = pnand %p5680_p9, %p5676_p4 }
0x1baa   : > { %v3781_v6 = vpop.xlane.xlu2 %3780  ;;  %v3779_v7 = vpop.xlane.xlu1 %3778 }
0x1bab   : > { %v3783_v39 = vcvt.f32.s32 %v3781_v6  ;;  %v3782_v41 = vcvt.f32.s32 %v3779_v7 }
0x1bad   : > { %v3784_v10 = vshll.u32 %v3783_v39, 16 }
0x1baf   : > { %v3785_v26 = vadd.s32 %v3784_v10, %v3782_v41 }
0x1bb1   : > { %v6940_v3 = vsel %vm6933_vm5, %v3785_v26, %v6926_v47  ;;  %v3718_v26 = vsel %vm6891_vm10, %v6904_v51, 0  ;;  %vm3789_vm10 = vcmp.eq.s32.totalorder %v6900_v44, 4 }
0x1bb2   : > { %vm3795_vm7 = vcmp.eq.s32.totalorder %v6900_v44, %v6940_v3 }
0x1bb3   : > { %v3797_v0 = vsel %vm3795_vm7, %v3796_v60, 0  ;;  %v3743_v60 = vsel %vm6919_vm3, %v6912_v50, 0  ;;  %v3793_v50 = vsel %vm6947_vm8, %v6940_v3, 0  ;;  %vm3839_vm3 = vcmp.eq.s32.totalorder %v6900_v44, 2 }
0x1bb4   : > { %v3798_v36 = vsel %vm3696_vm6, %v3797_v0, 0  ;;  %v3768_v0 = vsel %vm6933_vm5, %v6926_v47, 0  ;;  %v3891_v47 = vstv %s3890_s2  ;;  %vm3864_vm5 = vcmp.eq.s32.totalorder %v6900_v44, 1 }
0x1bb5   : > { %v3800_v4 = vshrl.u32 %v3798_v36, 16  ;;  %v3799_v63 = vand.u32 65535, %v3798_v36  ;;  %v3866_v36 = vstv %s3865_s27  ;;  %vm3892_vm4 = vcmp.eq.s32.totalorder %v3891_v47, 1 }
0x1bb6   : > { %vm7004_vm1 = vcmp.eq.s32.totalorder %v3866_v36, 1  ;;  %vm3887_vm7 = vcmp.eq.s32.totalorder %v6900_v44, 0 }
0x1bb7   : > { %v3802_v53 = vcvt.s32.f32 %v3800_v4  ;;  %v3801_v33 = vcvt.s32.f32 %v3799_v63  ;;  %v3719_v4 = vsel %vm3717_vm15, %v3718_v26, 0 }
0x1bb9   : > { %3805 = vadd.xlane.f32.xlu0 %v3802_v53  ;;  %3803 = vadd.xlane.f32.xlu2 %v3801_v33 }
0x1c2c   : > { %v3806_v52 = vpop.xlane.xlu0 %3805  ;;  %v3804_v5 = vpop.xlane.xlu2 %3803 }
0x1c2d   : > { %v3808_v9 = vcvt.f32.s32 %v3806_v52  ;;  %v3807_v2 = vcvt.f32.s32 %v3804_v5 }
0x1c2f   : > { %v3809_v61 = vshll.u32 %v3808_v9, 16 }
0x1c31   : > { %v3810_v28 = vadd.s32 %v3809_v61, %v3807_v2 }
0x1c33   : > { %v6954_v46 = vsel %vm6947_vm8, %v3810_v28, %v6940_v3 }
0x1c34   : > { %vm3820_vm9 = vcmp.eq.s32.totalorder %v6900_v44, %v6954_v46  ;;  %v3818_v42 = vsel %vm6961_vm11, %v6954_v46, 0 }
0x1c35   : > { %v3822_v14 = vsel %vm3820_vm9, %v3821_v8, 0 }
0x1c36   : > { %v3823_v27 = vsel %vm3696_vm6, %v3822_v14, 0 }
0x1c37   : > { %v3825_v29 = vshrl.u32 %v3823_v27, 16  ;;  %v3824_v15 = vand.u32 65535, %v3823_v27 }
0x1c39   : > { %v3827_v16 = vcvt.s32.f32 %v3825_v29  ;;  %v3826_v17 = vcvt.s32.f32 %v3824_v15 }
0x1c3b   : > { %3830 = vadd.xlane.f32.xlu1 %v3827_v16  ;;  %3828 = vadd.xlane.f32.xlu0 %v3826_v17 }
0x1cae   : > { %v3831_v18 = vpop.xlane.xlu1 %3830  ;;  %v3829_v19 = vpop.xlane.xlu0 %3828 }
0x1caf   : > { %v3833_v20 = vcvt.f32.s32 %v3831_v18  ;;  %v3832_v56 = vcvt.f32.s32 %v3829_v19 }
0x1cb1   : > { %v3834_v22 = vshll.u32 %v3833_v20, 16 }
0x1cb3   : > { %v3835_v23 = vadd.s32 %v3834_v22, %v3832_v56 }
0x1cb5   : > { %v6968_v25 = vsel %vm6961_vm11, %v3835_v23, %v6954_v46 }
0x1cb6   : > { %vm3845_vm12 = vcmp.eq.s32.totalorder %v6900_v44, %v6968_v25  ;;  %v3843_v9 = vsel %vm6975_vm13, %v6968_v25, 0 }
0x1cb7   : > { %v3847_v11 = vsel %vm3845_vm12, %v3846_v30, 0 }
0x1cb8   : > { %v3848_v12 = vsel %vm3696_vm6, %v3847_v11, 0 }
0x1cb9   : > { %v3850_v13 = vshrl.u32 %v3848_v12, 16  ;;  %v3849_v40 = vand.u32 65535, %v3848_v12 }
0x1cbb   : > { %v3852_v31 = vcvt.s32.f32 %v3850_v13  ;;  %v3851_v32 = vcvt.s32.f32 %v3849_v40 }
0x1cbd   : > { %3855 = vadd.xlane.f32.xlu2 %v3852_v31  ;;  %3853 = vadd.xlane.f32.xlu1 %v3851_v32 }
0x1d30   : > { %v3856_v34 = vpop.xlane.xlu2 %3855  ;;  %v3854_v35 = vpop.xlane.xlu1 %3853 }
0x1d31   : > { %v3858_v38 = vcvt.f32.s32 %v3856_v34  ;;  %v3857_v37 = vcvt.f32.s32 %v3854_v35 }
0x1d33   : > { %v3859_v48 = vshll.u32 %v3858_v38, 16 }
0x1d35   : > { %v3860_v55 = vadd.s32 %v3859_v48, %v3857_v37 }
0x1d37   : > { %v3861_v1 = vsel %vm6975_vm13, %v3860_v55, %v6968_v25 }
0x1d38   : > { %vm3870_vm14 = vcmp.eq.s32.totalorder %v6900_v44, %v3861_v1  ;;  %v3868_v54 = vsel %vm7004_vm1, %v3861_v1, 0 }
0x1d39   : > { %v3872_v6 = vsel %vm3870_vm14, %v3871_v58, 0 }
0x1d3a   : > { %v3873_v7 = vsel %vm3696_vm6, %v3872_v6, 0  ;;  %vm3739_vm6 = vcmp.eq.s32.totalorder %v6900_v44, 6 }
0x1d3b   : > { %v3875_v39 = vshrl.u32 %v3873_v7, 16  ;;  %v3874_v62 = vand.u32 65535, %v3873_v7  ;;  %v3744_v51 = vsel %vm3739_vm6, %v3743_v60, %v3719_v4 }
0x1d3c   : > { %v3769_v53 = vsel %vm3764_vm0, %v3768_v0, %v3744_v51 }
0x1d3d   : > { %v3877_v10 = vcvt.s32.f32 %v3875_v39  ;;  %v3876_v41 = vcvt.s32.f32 %v3874_v62  ;;  %v3794_v5 = vsel %vm3789_vm10, %v3793_v50, %v3769_v53 }
0x1d3e   : > { %v3819_v2 = vsel %vm3814_vm2, %v3818_v42, %v3794_v5 }
0x1d3f   : > { %3880 = vadd.xlane.f32.xlu0 %v3877_v10  ;;  %3878 = vadd.xlane.f32.xlu2 %v3876_v41  ;;  %v3844_v28 = vsel %vm3839_vm3, %v3843_v9, %v3819_v2 }
0x1d40   : > { %v3869_v8 = vsel %vm3864_vm5, %v3868_v54, %v3844_v28 }
0x1db2   : > { %v3881_v63 = vpop.xlane.xlu0 %3880  ;;  %v3879_v59 = vpop.xlane.xlu2 %3878 }
0x1db3   : > { %v3883_v45 = vcvt.f32.s32 %v3881_v63  ;;  %v3882_v3 = vcvt.f32.s32 %v3879_v59 }
0x1db5   : > { %v3884_v52 = vshll.u32 %v3883_v45, 16 }
0x1db7   : > { %v3885_v61 = vadd.s32 %v3884_v52, %v3882_v3 }
0x1db9   : > { %v3886_v43 = vsel %vm7004_vm1, %v3885_v61, %v3861_v1 }
0x1dba   : > { %v3893_v46 = vsel %vm3892_vm4, %v3886_v43, 0 }
0x1dbb   : > { %v3894_v14 = vsel %vm3887_vm7, %v3893_v46, %v3869_v8 }
0x1dbc   : > { %3895 = vst [vmem:[%s748_s5] sm:$0x1] %v3894_v14 }
0x1dbd   : > { %5684 = shalt.err (!%p5681_p10)
}
0x1dbe   : > { %4991 = dma.vmem_to_hbm [thread:$0]  (%p5909_p5), %s3908_s29, 16, %s3910_s10, %s3897_s24  }
0x1dbf PF: > { %s7127_s27 = sld [smem:[#allocation42_spill]] }
0x1dc0   : > { %s7128_s2 = sld [smem:[#allocation40_spill]] }
0x1dc5   : > { %p5063_p11 = scmp.ge.s32.totalorder %s7127_s27, 2 }
0x1dc6   : > { %s3921_s21 = sand.u32 1, %s7128_s2  }
0x1dc7   : > { %p5034_p12 = pnand %p5063_p11, %p5913_p6  ;;  %s3922_s23 = scalar_lea.sflag [#allocation11], %s3921_s21 }
0x1dc9   : > { %p5035_p13 = pneg %p5034_p12 }
0x1dcb   : > { %5732 = dma.done.wait (%p5035_p13), %s3922_s23, 16  }
0x1dcc   : > { %5734 = vsyncadd (%p5035_p13), %s3922_s23, 4294967280  ;;  %s7130_s20 = sld [smem:[#allocation43_spill]]  ;;  %s7133_s0 = smov %s5741_s19 }
0x1dcd   : > { %s7131_s5 = sld [smem:[#allocation41_spill]] }
0x1dce   : > { %s7132_s1 = sld [smem:[#allocation44_spill]] }
0x1dd2   : > { %p43_p0 = scmp.ge.s32.totalorder %s7130_s20, 4  }
0x1dd3   : > { %s7134_s19 = smov %s7131_s5 }
0x1dd4   :  { %45 = sbr.rel (!%p43_p0) target bundleno = 30 (0x1e), region = 176 }
0x1dd9   :  { %3927 = vsyncpa [#allocation10], 1 }
0x1dda   :  { %3929 = vsyncpa [#allocation10 + $0x1], 1 }
0x1ddb   :  { %3930 = vsyncpa [#allocation13], 1 }
0x1ddc   :  { %3931 = vsyncpa [#allocation16], 1 }
0x1ddd   :  { %3932 = vsyncpa [#allocation19], 1 }
0x1dde   :  { %3933 = vsyncpa [#allocation22], 1 }
0x1ddf   :  { %3934 = vsyncpa [#allocation25], 1 }
0x1de0   :  { %3935 = vsyncpa [#allocation28], 1 }
0x1de1   :  { %3936 = vsyncpa [#allocation11], 1 }
0x1de2   :  { %3938 = vsyncpa [#allocation11 + $0x1], 1 }

</bundles_post_ra>
